<compile_context>
chip_gen: v5e
topology: v5e:2x2
jax: 0.10.0
libtpu: 0.0.40
codegen_flags: <defaults>
</compile_context>

<pallas_src>
import functools

import jax
import jax.numpy as jnp
from jax import lax
from jax.experimental import pallas as pl
from jax.experimental.pallas import tpu as pltpu

VMEM_SPEC = pl.BlockSpec(memory_space=pltpu.MemorySpace.VMEM)
EPS = 1e-5


# ---------------------------------------------------------------------------
# In-kernel helpers
# ---------------------------------------------------------------------------
def _conv_pad_matmul(pad_ref, x3, w_ref, ksize, *, B, T, P, cin, cout):
    """PyTorch Conv1d (cross-correlation, padding=ksize//2, keep first T outputs)
    as flattened (B*T, cin) x (cin, cout) matmuls, one per tap.

    pad_ref rows outside [P, P+T) are permanently zero => implicit time padding.
    """
    p = ksize // 2
    if p == 0:
        return jnp.dot(x3.reshape(B * T, cin), w_ref[0],
                       preferred_element_type=jnp.float32)
    pad_ref[:, P:P + T, :cin] = x3
    acc = jnp.zeros((B * T, cout), jnp.float32)
    for j in range(ksize):
        lhs = pad_ref[:, P - p + j:P - p + j + T, :cin].reshape(B * T, cin)
        acc = acc + jnp.dot(lhs, w_ref[j], preferred_element_type=jnp.float32)
    return acc


def _batchnorm(y, g_ref, b_ref):
    """Training-mode BatchNorm1d over all (batch*time) rows of y: (B*T, C)."""
    mean = jnp.mean(y, axis=0, keepdims=True)
    var = jnp.mean((y - mean) ** 2, axis=0, keepdims=True)
    return (y - mean) * lax.rsqrt(var + EPS) * g_ref[...] + b_ref[...]


# ---------------------------------------------------------------------------
# Fused "front" kernel: conv bank + maxpool + projections + highway
# ---------------------------------------------------------------------------
def _cbhg_front_kernel(*refs, K, B, T, hidden, proj, num_hw, maxpad):
    it = iter(refs)
    x_ref = next(it)
    bank = [tuple(next(it) for _ in range(4)) for _ in range(K)]
    w1_ref, b1_ref, g1_ref, bt1_ref = (next(it) for _ in range(4))
    w2_ref, b2_ref, g2_ref, bt2_ref = (next(it) for _ in range(4))
    hw_w1, hw_b1, hw_w2, hw_b2 = (next(it) for _ in range(4))
    o_ref = next(it)
    pad_ref = next(it)

    P = maxpad
    pad_ref[...] = jnp.zeros(pad_ref.shape, jnp.float32)   # zero time padding

    x3 = x_ref[...]                                        # (B, T, proj)
    x_flat = x3.reshape(B * T, proj)

    # ---- conv bank chain, fused max-pool and projection-1 conv accumulation --
    acc1 = jnp.zeros((B * T, hidden), jnp.float32)
    cur3, cin = x3, proj
    for k in range(1, K + 1):
        wk, bk, gk, btk = bank[k - 1]
        yk = _conv_pad_matmul(pad_ref, cur3, wk, k, B=B, T=T, P=P,
                              cin=cin, cout=hidden) + bk[...]
        yk = jnp.maximum(_batchnorm(yk, gk, btk), 0.0)      # (B*T, hidden) >= 0
        yk3 = yk.reshape(B, T, hidden)

        # MaxPool1d(2, stride=1, pad=1)[:, :, :-1] == max(y[t-1], y[t]);
        # zero padding is exact because yk3 >= 0 (post-ReLU).
        pad_ref[:, P:P + T, :hidden] = yk3
        pooled3 = jnp.maximum(yk3, pad_ref[:, P - 1:P - 1 + T, :hidden])

        # projection-1 conv over the (virtual) channel concat == sum over banks
        # of k=3 convs against the matching input-channel slice of W1.
        pad_ref[:, P:P + T, :hidden] = pooled3
        for j in range(3):
            lhs = pad_ref[:, P - 1 + j:P - 1 + j + T, :hidden].reshape(
                B * T, hidden)
            acc1 = acc1 + jnp.dot(
                lhs, w1_ref[j, (k - 1) * hidden:k * hidden, :],
                preferred_element_type=jnp.float32)

        cur3, cin = yk3, hidden

    # projection 1: bias + BN + ReLU
    h1 = jnp.maximum(_batchnorm(acc1 + b1_ref[...], g1_ref, bt1_ref), 0.0)

    # projection 2: conv(k=3) + BN + residual (original input)
    acc2 = _conv_pad_matmul(pad_ref, h1.reshape(B, T, hidden), w2_ref, 3,
                            B=B, T=T, P=P, cin=hidden, cout=proj)
    out = _batchnorm(acc2 + b2_ref[...], g2_ref, bt2_ref) + x_flat

    # highway network: plain (B*T, proj) matmuls
    for l in range(num_hw):
        h = jnp.maximum(
            jnp.dot(out, hw_w1[l], preferred_element_type=jnp.float32)
            + hw_b1[l], 0.0)
        t = jax.nn.sigmoid(
            jnp.dot(out, hw_w2[l], preferred_element_type=jnp.float32)
            + hw_b2[l])
        out = h * t + out * (1.0 - t)

    o_ref[...] = out                                       # single store


def cbhg_front(params, x_btd, *, K, hidden, proj):
    B, T, _ = x_btd.shape
    num_hw = params["highway"]["w1"].shape[0]
    maxpad = max(K // 2, 1)
    cmax = max(proj, hidden)

    args = [x_btd]
    for k in range(1, K + 1):
        p = params["bank"][k - 1]
        args += [jnp.transpose(p["w"], (2, 1, 0)), p["b"].reshape(1, -1),
                 p["gamma"].reshape(1, -1), p["beta"].reshape(1, -1)]
    for name in ("proj1", "proj2"):
        p = params[name]
        args += [jnp.transpose(p["w"], (2, 1, 0)), p["b"].reshape(1, -1),
                 p["gamma"].reshape(1, -1), p["beta"].reshape(1, -1)]
    hp = params["highway"]
    args += [hp["w1"], hp["b1"], hp["w2"], hp["b2"]]

    kern = functools.partial(_cbhg_front_kernel, K=K, B=B, T=T, hidden=hidden,
                             proj=proj, num_hw=num_hw, maxpad=maxpad)
    return pl.pallas_call(
        kern,
        out_shape=jax.ShapeDtypeStruct((B * T, proj), jnp.float32),
        in_specs=[VMEM_SPEC] * len(args),
        out_specs=VMEM_SPEC,
        scratch_shapes=[pltpu.VMEM((B, T + 2 * maxpad, cmax), jnp.float32)],
        compiler_params=pltpu.CompilerParams(
            vmem_limit_bytes=64 * 1024 * 1024),
    )(*args)


# ---------------------------------------------------------------------------
# Bidirectional GRU layer: grid=(2,) over direction (parallel on v7x megacore)
# ---------------------------------------------------------------------------
def _bigru_layer_kernel(x_ref, wih_ref, bih_ref, whh_ref, bhh_ref, o_ref,
                        gi_ref, *, T, B, H):
    reverse = pl.program_id(0) == 1

    # Hoisted input projection for all timesteps: one (T*B, Din)x(Din, 3H) matmul
    gi_all = jnp.dot(x_ref[...], wih_ref[...],
                     preferred_element_type=jnp.float32) + bih_ref[...]
    for t in range(T):                       # static scatter into time-major scratch
        gi_ref[t] = gi_all[t * B:(t + 1) * B, :]

    def body(i, h):
        t = jnp.where(reverse, T - 1 - i, i)
        gi = gi_ref[t]                                     # (B, 3H)
        gh = jnp.dot(h, whh_ref[...],
                     preferred_element_type=jnp.float32) + bhh_ref[...]
        r = jax.nn.sigmoid(gi[:, 0:H] + gh[:, 0:H])
        z = jax.nn.sigmoid(gi[:, H:2 * H] + gh[:, H:2 * H])
        n = jnp.tanh(gi[:, 2 * H:3 * H] + r * gh[:, 2 * H:3 * H])
        h_new = (1.0 - z) * n + z * h
        o_ref[t] = h_new
        return h_new

    lax.fori_loop(0, T, body, jnp.zeros((B, H), jnp.float32))


def bigru_layer(x_tb_flat, layer_p, *, T, B):
    """x_tb_flat: (T*B, Din) time-major flattened input. Returns (T*B, 2H)."""
    H = layer_p["fwd"]["w_hh"].shape[1]
    Din = layer_p["fwd"]["w_ih"].shape[1]

    wih = jnp.stack([layer_p["fwd"]["w_ih"].T, layer_p["bwd"]["w_ih"].T])
    bih = jnp.stack([layer_p["fwd"]["b_ih"].reshape(1, -1),
                     layer_p["bwd"]["b_ih"].reshape(1, -1)])
    whh = jnp.stack([layer_p["fwd"]["w_hh"].T, layer_p["bwd"]["w_hh"].T])
    bhh = jnp.stack([layer_p["fwd"]["b_hh"].reshape(1, -1),
                     layer_p["bwd"]["b_hh"].reshape(1, -1)])

    kern = functools.partial(_bigru_layer_kernel, T=T, B=B, H=H)
    out = pl.pallas_call(
        kern,
        out_shape=jax.ShapeDtypeStruct((2, T, B, H), jnp.float32),
        grid=(2,),
        in_specs=[
            pl.BlockSpec((T * B, Din), lambda d: (0, 0)),
            pl.BlockSpec((None, Din, 3 * H), lambda d: (d, 0, 0)),
            pl.BlockSpec((None, 1, 3 * H), lambda d: (d, 0, 0)),
            pl.BlockSpec((None, H, 3 * H), lambda d: (d, 0, 0)),
            pl.BlockSpec((None, 1, 3 * H), lambda d: (d, 0, 0)),
        ],
        out_specs=pl.BlockSpec((None, T, B, H), lambda d: (d, 0, 0, 0)),
        scratch_shapes=[pltpu.VMEM((T, B, 3 * H), jnp.float32)],
        compiler_params=pltpu.CompilerParams(
            dimension_semantics=("parallel",),
            vmem_limit_bytes=64 * 1024 * 1024),
    )(x_tb_flat, wih, bih, whh, bhh)

    out_tbc = jnp.concatenate([out[0], out[1]], axis=-1)    # (T, B, 2H)
    return out_tbc.reshape(T * B, 2 * H)


# ---------------------------------------------------------------------------
# Full CBHG forward (is_post=False branch)
# ---------------------------------------------------------------------------
def cbhg_forward(params, x_nct, *, K, hidden, proj):
    B, _, T = x_nct.shape
    x_btd = jnp.transpose(x_nct, (0, 2, 1))                 # (B, T, proj)

    hw_flat = cbhg_front(params, x_btd, K=K, hidden=hidden, proj=proj)

    # time-major flattened (T*B, proj) for the GRU stack
    cur = jnp.transpose(hw_flat.reshape(B, T, proj), (1, 0, 2)).reshape(
        T * B, proj)
    for layer_p in params["gru"]:                           # 2 bi-GRU layers
        cur = bigru_layer(cur, layer_p, T=T, B=B)           # (T*B, 2*hidden)

    return jnp.transpose(cur.reshape(T, B, 2 * hidden), (1, 0, 2))


# ---------------------------------------------------------------------------
# Deterministic synthetic parameters (PyTorch layouts)
# ---------------------------------------------------------------------------
def init_params(key, hidden, K, proj, num_highway=4):
    ks = iter(jax.random.split(key, 256))

    def u(shape, scale=0.1):
        return jax.random.uniform(next(ks), shape, jnp.float32, -scale, scale)

    params = {}
    bank = []
    in_ch = proj
    for k in range(1, K + 1):
        bank.append(dict(w=u((hidden, in_ch, k)), b=u((hidden,)),
                         gamma=1.0 + u((hidden,)), beta=u((hidden,))))
        in_ch = hidden
    params["bank"] = bank
    params["proj1"] = dict(w=u((hidden, hidden * K, 3)), b=u((hidden,)),
                           gamma=1.0 + u((hidden,)), beta=u((hidden,)))
    params["proj2"] = dict(w=u((proj, hidden, 3)), b=u((proj,)),
                           gamma=1.0 + u((proj,)), beta=u((proj,)))
    params["highway"] = dict(
        w1=u((num_highway, proj, proj)), b1=u((num_highway, 1, proj)),
        w2=u((num_highway, proj, proj)), b2=u((num_highway, 1, proj)))
    gru = []
    din = proj
    H = hidden
    for _layer in range(2):
        layer_p = {}
        for d in ("fwd", "bwd"):
            layer_p[d] = dict(w_ih=u((3 * H, din)), w_hh=u((3 * H, H)),
                              b_ih=u((3 * H,)), b_hh=u((3 * H,)))
        gru.append(layer_p)
        din = 2 * H
    params["gru"] = gru
    return params


if __name__ == "__main__":
    B, T = 2, 8
    hidden, K, proj = 16, 4, 32

    key = jax.random.PRNGKey(0)
    pkey, xkey = jax.random.split(key)
    params = init_params(pkey, hidden, K, proj)

    # PyTorch Conv1d input layout: (batch, projection_size, time)
    x = jax.random.normal(xkey, (B, proj, T), jnp.float32)

    fwd = jax.jit(functools.partial(cbhg_forward, params,
                                    K=K, hidden=hidden, proj=proj))
    out = fwd(x)
    out = jax.block_until_ready(out)

    assert out.shape == (B, T, 2 * hidden), out.shape
    assert jnp.all(jnp.isfinite(out))
    print("KERNEL_OK")
</pallas_src>

<mosaic_0001>
module attributes {stable_mosaic.version = 11 : i64} {
  func.func @_bigru_layer_kernel(%arg0: i32, %arg1: memref<16x32xf32, #tpu.memory_space<vmem>>, %arg2: memref<1x32x48xf32, #tpu.memory_space<vmem>>, %arg3: memref<1x1x48xf32, #tpu.memory_space<vmem>>, %arg4: memref<1x16x48xf32, #tpu.memory_space<vmem>>, %arg5: memref<1x1x48xf32, #tpu.memory_space<vmem>>, %arg6: memref<1x8x2x16xf32, #tpu.memory_space<vmem>>, %arg7: memref<8x2x48xf32, #tpu.memory_space<vmem>>) attributes {dimension_semantics = [#tpu.dimension_semantics<parallel>], iteration_bounds = array<i64: 2>, scalar_prefetch = 0 : i64, scratch_operands = 1 : i64, tpu.core_type = #tpu.core_type<tc>, window_params = [{pipeline_mode = #tpu.pipeline_mode<synchronous>, transform_indices = @transform_0, window_bounds = array<i64: 16, 32>}, {transform_indices = @transform_1, window_bounds = array<i64: 1, 32, 48>}, {transform_indices = @transform_2, window_bounds = array<i64: 1, 1, 48>}, {transform_indices = @transform_3, window_bounds = array<i64: 1, 16, 48>}, {transform_indices = @transform_4, window_bounds = array<i64: 1, 1, 48>}, {transform_indices = @transform_5, window_bounds = array<i64: 1, 8, 2, 16>}]} {
    %c1_i32 = arith.constant 1 : i32
    %0 = arith.cmpi eq, %arg0, %c1_i32 : i32
    %c0 = arith.constant 0 : index
    %c0_0 = arith.constant 0 : index
    %1 = vector.load %arg1[%c0, %c0_0] : memref<16x32xf32, #tpu.memory_space<vmem>>, vector<16x32xf32>
    %c0_1 = arith.constant 0 : index
    %c0_2 = arith.constant 0 : index
    %c0_3 = arith.constant 0 : index
    %2 = vector.load %arg2[%c0_1, %c0_2, %c0_3] : memref<1x32x48xf32, #tpu.memory_space<vmem>>, vector<1x32x48xf32>
    %3 = vector.shape_cast %2 : vector<1x32x48xf32> to vector<32x48xf32>
    %cst = arith.constant dense<0.000000e+00> : vector<16x48xf32>
    %4 = tpu.matmul %1, %3, %cst {dimension_numbers = #tpu.dot_dimension_numbers<[1], [0], [0], [1], [0, 0, 1, 1], [], []>} : vector<16x32xf32>, vector<32x48xf32>, vector<16x48xf32> -> vector<16x48xf32>
    %c0_4 = arith.constant 0 : index
    %c0_5 = arith.constant 0 : index
    %c0_6 = arith.constant 0 : index
    %5 = vector.load %arg3[%c0_4, %c0_5, %c0_6] : memref<1x1x48xf32, #tpu.memory_space<vmem>>, vector<1x1x48xf32>
    %6 = vector.shape_cast %5 : vector<1x1x48xf32> to vector<1x48xf32>
    %7 = vector.broadcast %6 : vector<1x48xf32> to vector<16x48xf32>
    %8 = arith.addf %4, %7 : vector<16x48xf32>
    %9 = vector.extract_strided_slice %8 {offsets = [0, 0], sizes = [2, 48], strides = [1, 1]} : vector<16x48xf32> to vector<2x48xf32>
    %c0_7 = arith.constant 0 : index
    %c0_8 = arith.constant 0 : index
    %c0_9 = arith.constant 0 : index
    %10 = vector.load %arg7[%c0_7, %c0_8, %c0_9] : memref<8x2x48xf32, #tpu.memory_space<vmem>>, vector<1x2x48xf32>
    %11 = vector.shape_cast %10 : vector<1x2x48xf32> to vector<2x48xf32>
    %12 = vector.shape_cast %9 : vector<2x48xf32> to vector<1x2x48xf32>
    tpu.vector_store %arg7[%c0_7, %c0_8, %c0_9], %12 {strides = array<i32>} : memref<8x2x48xf32, #tpu.memory_space<vmem>>, vector<1x2x48xf32>,
    %13 = vector.extract_strided_slice %8 {offsets = [2, 0], sizes = [2, 48], strides = [1, 1]} : vector<16x48xf32> to vector<2x48xf32>
    %c1 = arith.constant 1 : index
    %c0_10 = arith.constant 0 : index
    %c0_11 = arith.constant 0 : index
    %14 = vector.load %arg7[%c1, %c0_10, %c0_11] : memref<8x2x48xf32, #tpu.memory_space<vmem>>, vector<1x2x48xf32>
    %15 = vector.shape_cast %14 : vector<1x2x48xf32> to vector<2x48xf32>
    %16 = vector.shape_cast %13 : vector<2x48xf32> to vector<1x2x48xf32>
    tpu.vector_store %arg7[%c1, %c0_10, %c0_11], %16 {strides = array<i32>} : memref<8x2x48xf32, #tpu.memory_space<vmem>>, vector<1x2x48xf32>,
    %17 = vector.extract_strided_slice %8 {offsets = [4, 0], sizes = [2, 48], strides = [1, 1]} : vector<16x48xf32> to vector<2x48xf32>
    %c2 = arith.constant 2 : index
    %c0_12 = arith.constant 0 : index
    %c0_13 = arith.constant 0 : index
    %18 = vector.load %arg7[%c2, %c0_12, %c0_13] : memref<8x2x48xf32, #tpu.memory_space<vmem>>, vector<1x2x48xf32>
    %19 = vector.shape_cast %18 : vector<1x2x48xf32> to vector<2x48xf32>
    %20 = vector.shape_cast %17 : vector<2x48xf32> to vector<1x2x48xf32>
    tpu.vector_store %arg7[%c2, %c0_12, %c0_13], %20 {strides = array<i32>} : memref<8x2x48xf32, #tpu.memory_space<vmem>>, vector<1x2x48xf32>,
    %21 = vector.extract_strided_slice %8 {offsets = [6, 0], sizes = [2, 48], strides = [1, 1]} : vector<16x48xf32> to vector<2x48xf32>
    %c3 = arith.constant 3 : index
    %c0_14 = arith.constant 0 : index
    %c0_15 = arith.constant 0 : index
    %22 = vector.load %arg7[%c3, %c0_14, %c0_15] : memref<8x2x48xf32, #tpu.memory_space<vmem>>, vector<1x2x48xf32>
    %23 = vector.shape_cast %22 : vector<1x2x48xf32> to vector<2x48xf32>
    %24 = vector.shape_cast %21 : vector<2x48xf32> to vector<1x2x48xf32>
    tpu.vector_store %arg7[%c3, %c0_14, %c0_15], %24 {strides = array<i32>} : memref<8x2x48xf32, #tpu.memory_space<vmem>>, vector<1x2x48xf32>,
    %25 = vector.extract_strided_slice %8 {offsets = [8, 0], sizes = [2, 48], strides = [1, 1]} : vector<16x48xf32> to vector<2x48xf32>
    %c4 = arith.constant 4 : index
    %c0_16 = arith.constant 0 : index
    %c0_17 = arith.constant 0 : index
    %26 = vector.load %arg7[%c4, %c0_16, %c0_17] : memref<8x2x48xf32, #tpu.memory_space<vmem>>, vector<1x2x48xf32>
    %27 = vector.shape_cast %26 : vector<1x2x48xf32> to vector<2x48xf32>
    %28 = vector.shape_cast %25 : vector<2x48xf32> to vector<1x2x48xf32>
    tpu.vector_store %arg7[%c4, %c0_16, %c0_17], %28 {strides = array<i32>} : memref<8x2x48xf32, #tpu.memory_space<vmem>>, vector<1x2x48xf32>,
    %29 = vector.extract_strided_slice %8 {offsets = [10, 0], sizes = [2, 48], strides = [1, 1]} : vector<16x48xf32> to vector<2x48xf32>
    %c5 = arith.constant 5 : index
    %c0_18 = arith.constant 0 : index
    %c0_19 = arith.constant 0 : index
    %30 = vector.load %arg7[%c5, %c0_18, %c0_19] : memref<8x2x48xf32, #tpu.memory_space<vmem>>, vector<1x2x48xf32>
    %31 = vector.shape_cast %30 : vector<1x2x48xf32> to vector<2x48xf32>
    %32 = vector.shape_cast %29 : vector<2x48xf32> to vector<1x2x48xf32>
    tpu.vector_store %arg7[%c5, %c0_18, %c0_19], %32 {strides = array<i32>} : memref<8x2x48xf32, #tpu.memory_space<vmem>>, vector<1x2x48xf32>,
    %33 = vector.extract_strided_slice %8 {offsets = [12, 0], sizes = [2, 48], strides = [1, 1]} : vector<16x48xf32> to vector<2x48xf32>
    %c6 = arith.constant 6 : index
    %c0_20 = arith.constant 0 : index
    %c0_21 = arith.constant 0 : index
    %34 = vector.load %arg7[%c6, %c0_20, %c0_21] : memref<8x2x48xf32, #tpu.memory_space<vmem>>, vector<1x2x48xf32>
    %35 = vector.shape_cast %34 : vector<1x2x48xf32> to vector<2x48xf32>
    %36 = vector.shape_cast %33 : vector<2x48xf32> to vector<1x2x48xf32>
    tpu.vector_store %arg7[%c6, %c0_20, %c0_21], %36 {strides = array<i32>} : memref<8x2x48xf32, #tpu.memory_space<vmem>>, vector<1x2x48xf32>,
    %37 = vector.extract_strided_slice %8 {offsets = [14, 0], sizes = [2, 48], strides = [1, 1]} : vector<16x48xf32> to vector<2x48xf32>
    %c7 = arith.constant 7 : index
    %c0_22 = arith.constant 0 : index
    %c0_23 = arith.constant 0 : index
    %38 = vector.load %arg7[%c7, %c0_22, %c0_23] : memref<8x2x48xf32, #tpu.memory_space<vmem>>, vector<1x2x48xf32>
    %39 = vector.shape_cast %38 : vector<1x2x48xf32> to vector<2x48xf32>
    %40 = vector.shape_cast %37 : vector<2x48xf32> to vector<1x2x48xf32>
    tpu.vector_store %arg7[%c7, %c0_22, %c0_23], %40 {strides = array<i32>} : memref<8x2x48xf32, #tpu.memory_space<vmem>>, vector<1x2x48xf32>,
    %cst_24 = arith.constant 0.000000e+00 : f32
    %41 = vector.broadcast %cst_24 : f32 to vector<2x16xf32>
    %c0_i32 = arith.constant 0 : i32
    %c8_i32 = arith.constant 8 : i32
    %42 = arith.addi %c0_i32, %c8_i32 : i32
    %c1_i32_25 = arith.constant 1 : i32
    %43 = scf.for %arg8 = %c0_i32 to %42 step %c1_i32_25 iter_args(%arg9 = %41) -> (vector<2x16xf32>)  : i32 {
      %c7_i32 = arith.constant 7 : i32
      %44 = arith.subi %c7_i32, %arg8 : i32
      %45 = arith.select %0, %44, %arg8 : i32
      %46 = arith.index_cast %45 : i32 to index
      %c0_27 = arith.constant 0 : index
      %c0_28 = arith.constant 0 : index
      %47 = vector.load %arg7[%46, %c0_27, %c0_28] : memref<8x2x48xf32, #tpu.memory_space<vmem>>, vector<1x2x48xf32>
      %48 = vector.shape_cast %47 : vector<1x2x48xf32> to vector<2x48xf32>
      %c0_29 = arith.constant 0 : index
      %c0_30 = arith.constant 0 : index
      %c0_31 = arith.constant 0 : index
      %49 = vector.load %arg4[%c0_29, %c0_30, %c0_31] : memref<1x16x48xf32, #tpu.memory_space<vmem>>, vector<1x16x48xf32>
      %50 = vector.shape_cast %49 : vector<1x16x48xf32> to vector<16x48xf32>
      %cst_32 = arith.constant dense<0.000000e+00> : vector<2x48xf32>
      %51 = tpu.matmul %arg9, %50, %cst_32 {dimension_numbers = #tpu.dot_dimension_numbers<[1], [0], [0], [1], [0, 0, 1, 1], [], []>} : vector<2x16xf32>, vector<16x48xf32>, vector<2x48xf32> -> vector<2x48xf32>
      %c0_33 = arith.constant 0 : index
      %c0_34 = arith.constant 0 : index
      %c0_35 = arith.constant 0 : index
      %52 = vector.load %arg5[%c0_33, %c0_34, %c0_35] : memref<1x1x48xf32, #tpu.memory_space<vmem>>, vector<1x1x48xf32>
      %53 = vector.shape_cast %52 : vector<1x1x48xf32> to vector<1x48xf32>
      %54 = vector.broadcast %53 : vector<1x48xf32> to vector<2x48xf32>
      %55 = arith.addf %51, %54 : vector<2x48xf32>
      %56 = vector.extract_strided_slice %48 {offsets = [0, 0], sizes = [2, 16], strides = [1, 1]} : vector<2x48xf32> to vector<2x16xf32>
      %57 = vector.extract_strided_slice %55 {offsets = [0, 0], sizes = [2, 16], strides = [1, 1]} : vector<2x48xf32> to vector<2x16xf32>
      %58 = arith.addf %56, %57 : vector<2x16xf32>
      %59 = arith.negf %58 : vector<2x16xf32>
      %60 = math.exp %59 : vector<2x16xf32>
      %cst_36 = arith.constant 1.000000e+00 : f32
      %61 = vector.broadcast %cst_36 : f32 to vector<2x16xf32>
      %62 = arith.addf %61, %60 : vector<2x16xf32>
      %63 = arith.divf %61, %62 : vector<2x16xf32>
      %64 = vector.extract_strided_slice %48 {offsets = [0, 16], sizes = [2, 16], strides = [1, 1]} : vector<2x48xf32> to vector<2x16xf32>
      %65 = vector.extract_strided_slice %55 {offsets = [0, 16], sizes = [2, 16], strides = [1, 1]} : vector<2x48xf32> to vector<2x16xf32>
      %66 = arith.addf %64, %65 : vector<2x16xf32>
      %67 = arith.negf %66 : vector<2x16xf32>
      %68 = math.exp %67 : vector<2x16xf32>
      %cst_37 = arith.constant 1.000000e+00 : f32
      %69 = vector.broadcast %cst_37 : f32 to vector<2x16xf32>
      %70 = arith.addf %69, %68 : vector<2x16xf32>
      %71 = arith.divf %69, %70 : vector<2x16xf32>
      %72 = vector.extract_strided_slice %48 {offsets = [0, 32], sizes = [2, 16], strides = [1, 1]} : vector<2x48xf32> to vector<2x16xf32>
      %73 = vector.extract_strided_slice %55 {offsets = [0, 32], sizes = [2, 16], strides = [1, 1]} : vector<2x48xf32> to vector<2x16xf32>
      %74 = arith.mulf %63, %73 : vector<2x16xf32>
      %75 = arith.addf %72, %74 : vector<2x16xf32>
      %76 = math.tanh %75 : vector<2x16xf32>
      %cst_38 = arith.constant 1.000000e+00 : f32
      %77 = vector.broadcast %cst_38 : f32 to vector<2x16xf32>
      %78 = arith.subf %77, %71 : vector<2x16xf32>
      %79 = arith.mulf %78, %76 : vector<2x16xf32>
      %80 = arith.mulf %71, %arg9 : vector<2x16xf32>
      %81 = arith.addf %79, %80 : vector<2x16xf32>
      %c0_39 = arith.constant 0 : index
      %82 = arith.index_cast %45 : i32 to index
      %c0_40 = arith.constant 0 : index
      %c0_41 = arith.constant 0 : index
      %83 = vector.load %arg6[%c0_39, %82, %c0_40, %c0_41] : memref<1x8x2x16xf32, #tpu.memory_space<vmem>>, vector<1x1x2x16xf32>
      %84 = vector.shape_cast %83 : vector<1x1x2x16xf32> to vector<2x16xf32>
      %85 = vector.shape_cast %81 : vector<2x16xf32> to vector<1x1x2x16xf32>
      tpu.vector_store %arg6[%c0_39, %82, %c0_40, %c0_41], %85 {strides = array<i32>} : memref<1x8x2x16xf32, #tpu.memory_space<vmem>>, vector<1x1x2x16xf32>,
      scf.yield %81 : vector<2x16xf32>
    }
    %c8_i32_26 = arith.constant 8 : i32
    return
  }
  func.func @transform_0(%arg0: i32) -> (i32, i32) {
    %c0_i32 = arith.constant 0 : i32
    %c0_i32_0 = arith.constant 0 : i32
    %c0_i32_1 = arith.constant 0 : i32
    return %c0_i32, %c0_i32_0 : i32, i32
  }
  func.func @transform_1(%arg0: i32) -> (i32, i32, i32) {
    %c0_i32 = arith.constant 0 : i32
    %c0_i32_0 = arith.constant 0 : i32
    %c0_i32_1 = arith.constant 0 : i32
    return %arg0, %c0_i32, %c0_i32_0 : i32, i32, i32
  }
  func.func @transform_2(%arg0: i32) -> (i32, i32, i32) {
    %c0_i32 = arith.constant 0 : i32
    %c0_i32_0 = arith.constant 0 : i32
    %c0_i32_1 = arith.constant 0 : i32
    return %arg0, %c0_i32, %c0_i32_0 : i32, i32, i32
  }
  func.func @transform_3(%arg0: i32) -> (i32, i32, i32) {
    %c0_i32 = arith.constant 0 : i32
    %c0_i32_0 = arith.constant 0 : i32
    %c0_i32_1 = arith.constant 0 : i32
    return %arg0, %c0_i32, %c0_i32_0 : i32, i32, i32
  }
  func.func @transform_4(%arg0: i32) -> (i32, i32, i32) {
    %c0_i32 = arith.constant 0 : i32
    %c0_i32_0 = arith.constant 0 : i32
    %c0_i32_1 = arith.constant 0 : i32
    return %arg0, %c0_i32, %c0_i32_0 : i32, i32, i32
  }
  func.func @transform_5(%arg0: i32) -> (i32, i32, i32, i32) {
    %c0_i32 = arith.constant 0 : i32
    %c0_i32_0 = arith.constant 0 : i32
    %c0_i32_1 = arith.constant 0 : i32
    %c0_i32_2 = arith.constant 0 : i32
    return %arg0, %c0_i32, %c0_i32_0, %c0_i32_1 : i32, i32, i32, i32
  }
}

module attributes {stable_mosaic.version = 11 : i64} {
  func.func @_cbhg_front_kernel(%arg0: memref<2x8x32xf32, #tpu.memory_space<vmem>>, %arg1: memref<1x32x16xf32, #tpu.memory_space<vmem>>, %arg2: memref<1x16xf32, #tpu.memory_space<vmem>>, %arg3: memref<1x16xf32, #tpu.memory_space<vmem>>, %arg4: memref<1x16xf32, #tpu.memory_space<vmem>>, %arg5: memref<2x16x16xf32, #tpu.memory_space<vmem>>, %arg6: memref<1x16xf32, #tpu.memory_space<vmem>>, %arg7: memref<1x16xf32, #tpu.memory_space<vmem>>, %arg8: memref<1x16xf32, #tpu.memory_space<vmem>>, %arg9: memref<3x16x16xf32, #tpu.memory_space<vmem>>, %arg10: memref<1x16xf32, #tpu.memory_space<vmem>>, %arg11: memref<1x16xf32, #tpu.memory_space<vmem>>, %arg12: memref<1x16xf32, #tpu.memory_space<vmem>>, %arg13: memref<4x16x16xf32, #tpu.memory_space<vmem>>, %arg14: memref<1x16xf32, #tpu.memory_space<vmem>>, %arg15: memref<1x16xf32, #tpu.memory_space<vmem>>, %arg16: memref<1x16xf32, #tpu.memory_space<vmem>>, %arg17: memref<3x64x16xf32, #tpu.memory_space<vmem>>, %arg18: memref<1x16xf32, #tpu.memory_space<vmem>>, %arg19: memref<1x16xf32, #tpu.memory_space<vmem>>, %arg20: memref<1x16xf32, #tpu.memory_space<vmem>>, %arg21: memref<3x16x32xf32, #tpu.memory_space<vmem>>, %arg22: memref<1x32xf32, #tpu.memory_space<vmem>>, %arg23: memref<1x32xf32, #tpu.memory_space<vmem>>, %arg24: memref<1x32xf32, #tpu.memory_space<vmem>>, %arg25: memref<4x32x32xf32, #tpu.memory_space<vmem>>, %arg26: memref<4x1x32xf32, #tpu.memory_space<vmem>>, %arg27: memref<4x32x32xf32, #tpu.memory_space<vmem>>, %arg28: memref<4x1x32xf32, #tpu.memory_space<vmem>>, %arg29: memref<16x32xf32, #tpu.memory_space<vmem>>, %arg30: memref<2x12x32xf32, #tpu.memory_space<vmem>>) attributes {dimension_semantics = [], scalar_prefetch = 0 : i64, scratch_operands = 1 : i64, tpu.core_type = #tpu.core_type<tc>} {
    %cst = arith.constant 0.000000e+00 : f32
    %0 = vector.broadcast %cst : f32 to vector<2x12x32xf32>
    %c0 = arith.constant 0 : index
    %c0_0 = arith.constant 0 : index
    %c0_1 = arith.constant 0 : index
    %1 = vector.load %arg30[%c0, %c0_0, %c0_1] : memref<2x12x32xf32, #tpu.memory_space<vmem>>, vector<2x12x32xf32>
    tpu.vector_store %arg30[%c0, %c0_0, %c0_1], %0 {strides = array<i32>} : memref<2x12x32xf32, #tpu.memory_space<vmem>>, vector<2x12x32xf32>,
    %c0_2 = arith.constant 0 : index
    %c0_3 = arith.constant 0 : index
    %c0_4 = arith.constant 0 : index
    %2 = vector.load %arg0[%c0_2, %c0_3, %c0_4] : memref<2x8x32xf32, #tpu.memory_space<vmem>>, vector<2x8x32xf32>
    %3 = vector.shape_cast %2 : vector<2x8x32xf32> to vector<16x32xf32>
    %cst_5 = arith.constant 0.000000e+00 : f32
    %4 = vector.broadcast %cst_5 : f32 to vector<16x16xf32>
    %5 = vector.shape_cast %2 : vector<2x8x32xf32> to vector<16x32xf32>
    %c0_6 = arith.constant 0 : index
    %c0_7 = arith.constant 0 : index
    %c0_8 = arith.constant 0 : index
    %6 = vector.load %arg1[%c0_6, %c0_7, %c0_8] : memref<1x32x16xf32, #tpu.memory_space<vmem>>, vector<1x32x16xf32>
    %7 = vector.shape_cast %6 : vector<1x32x16xf32> to vector<32x16xf32>
    %cst_9 = arith.constant dense<0.000000e+00> : vector<16x16xf32>
    %8 = tpu.matmul %5, %7, %cst_9 {dimension_numbers = #tpu.dot_dimension_numbers<[1], [0], [0], [1], [0, 0, 1, 1], [], []>} : vector<16x32xf32>, vector<32x16xf32>, vector<16x16xf32> -> vector<16x16xf32>
    %c0_10 = arith.constant 0 : index
    %c0_11 = arith.constant 0 : index
    %9 = vector.load %arg2[%c0_10, %c0_11] : memref<1x16xf32, #tpu.memory_space<vmem>>, vector<1x16xf32>
    %10 = vector.broadcast %9 : vector<1x16xf32> to vector<16x16xf32>
    %11 = arith.addf %8, %10 : vector<16x16xf32>
    %cst_12 = arith.constant dense<0.000000e+00> : vector<16xf32>
    %12 = vector.multi_reduction <add>, %11, %cst_12 [0] : vector<16x16xf32> to vector<16xf32>
    %13 = vector.shape_cast %12 : vector<16xf32> to vector<1x16xf32>
    %cst_13 = arith.constant 1.600000e+01 : f32
    %14 = vector.broadcast %cst_13 : f32 to vector<1x16xf32>
    %15 = arith.divf %13, %14 : vector<1x16xf32>
    %16 = vector.broadcast %15 : vector<1x16xf32> to vector<16x16xf32>
    %17 = arith.subf %11, %16 : vector<16x16xf32>
    %18 = arith.mulf %17, %17 : vector<16x16xf32>
    %cst_14 = arith.constant dense<0.000000e+00> : vector<16xf32>
    %19 = vector.multi_reduction <add>, %18, %cst_14 [0] : vector<16x16xf32> to vector<16xf32>
    %20 = vector.shape_cast %19 : vector<16xf32> to vector<1x16xf32>
    %cst_15 = arith.constant 1.600000e+01 : f32
    %21 = vector.broadcast %cst_15 : f32 to vector<1x16xf32>
    %22 = arith.divf %20, %21 : vector<1x16xf32>
    %23 = vector.broadcast %15 : vector<1x16xf32> to vector<16x16xf32>
    %24 = arith.subf %11, %23 : vector<16x16xf32>
    %cst_16 = arith.constant 9.99999974E-6 : f32
    %25 = vector.broadcast %cst_16 : f32 to vector<1x16xf32>
    %26 = arith.addf %22, %25 : vector<1x16xf32>
    %27 = math.rsqrt %26 : vector<1x16xf32>
    %28 = vector.broadcast %27 : vector<1x16xf32> to vector<16x16xf32>
    %29 = arith.mulf %24, %28 : vector<16x16xf32>
    %c0_17 = arith.constant 0 : index
    %c0_18 = arith.constant 0 : index
    %30 = vector.load %arg3[%c0_17, %c0_18] : memref<1x16xf32, #tpu.memory_space<vmem>>, vector<1x16xf32>
    %31 = vector.broadcast %30 : vector<1x16xf32> to vector<16x16xf32>
    %32 = arith.mulf %29, %31 : vector<16x16xf32>
    %c0_19 = arith.constant 0 : index
    %c0_20 = arith.constant 0 : index
    %33 = vector.load %arg4[%c0_19, %c0_20] : memref<1x16xf32, #tpu.memory_space<vmem>>, vector<1x16xf32>
    %34 = vector.broadcast %33 : vector<1x16xf32> to vector<16x16xf32>
    %35 = arith.addf %32, %34 : vector<16x16xf32>
    %cst_21 = arith.constant 0.000000e+00 : f32
    %36 = vector.broadcast %cst_21 : f32 to vector<16x16xf32>
    %37 = arith.maximumf %35, %36 : vector<16x16xf32>
    %38 = vector.shape_cast %37 : vector<16x16xf32> to vector<2x8x16xf32>
    %c0_22 = arith.constant 0 : index
    %c2 = arith.constant 2 : index
    %c0_23 = arith.constant 0 : index
    %39 = vector.load %arg30[%c0_22, %c2, %c0_23] : memref<2x12x32xf32, #tpu.memory_space<vmem>>, vector<2x8x16xf32>
    tpu.vector_store %arg30[%c0_22, %c2, %c0_23], %38 {strides = array<i32>} : memref<2x12x32xf32, #tpu.memory_space<vmem>>, vector<2x8x16xf32>,
    %c0_24 = arith.constant 0 : index
    %c1 = arith.constant 1 : index
    %c0_25 = arith.constant 0 : index
    %40 = vector.load %arg30[%c0_24, %c1, %c0_25] : memref<2x12x32xf32, #tpu.memory_space<vmem>>, vector<2x8x16xf32>
    %41 = arith.maximumf %38, %40 : vector<2x8x16xf32>
    %c0_26 = arith.constant 0 : index
    %c2_27 = arith.constant 2 : index
    %c0_28 = arith.constant 0 : index
    %42 = vector.load %arg30[%c0_26, %c2_27, %c0_28] : memref<2x12x32xf32, #tpu.memory_space<vmem>>, vector<2x8x16xf32>
    tpu.vector_store %arg30[%c0_26, %c2_27, %c0_28], %41 {strides = array<i32>} : memref<2x12x32xf32, #tpu.memory_space<vmem>>, vector<2x8x16xf32>,
    %c0_29 = arith.constant 0 : index
    %c1_30 = arith.constant 1 : index
    %c0_31 = arith.constant 0 : index
    %43 = vector.load %arg30[%c0_29, %c1_30, %c0_31] : memref<2x12x32xf32, #tpu.memory_space<vmem>>, vector<2x8x16xf32>
    %44 = vector.shape_cast %43 : vector<2x8x16xf32> to vector<16x16xf32>
    %c0_32 = arith.constant 0 : index
    %c0_33 = arith.constant 0 : index
    %c0_34 = arith.constant 0 : index
    %45 = vector.load %arg17[%c0_32, %c0_33, %c0_34] : memref<3x64x16xf32, #tpu.memory_space<vmem>>, vector<1x16x16xf32>
    %46 = vector.shape_cast %45 : vector<1x16x16xf32> to vector<16x16xf32>
    %cst_35 = arith.constant dense<0.000000e+00> : vector<16x16xf32>
    %47 = tpu.matmul %44, %46, %cst_35 {dimension_numbers = #tpu.dot_dimension_numbers<[1], [0], [0], [1], [0, 0, 1, 1], [], []>} : vector<16x16xf32>, vector<16x16xf32>, vector<16x16xf32> -> vector<16x16xf32>
    %48 = arith.addf %4, %47 : vector<16x16xf32>
    %c0_36 = arith.constant 0 : index
    %c2_37 = arith.constant 2 : index
    %c0_38 = arith.constant 0 : index
    %49 = vector.load %arg30[%c0_36, %c2_37, %c0_38] : memref<2x12x32xf32, #tpu.memory_space<vmem>>, vector<2x8x16xf32>
    %50 = vector.shape_cast %49 : vector<2x8x16xf32> to vector<16x16xf32>
    %c1_39 = arith.constant 1 : index
    %c0_40 = arith.constant 0 : index
    %c0_41 = arith.constant 0 : index
    %51 = vector.load %arg17[%c1_39, %c0_40, %c0_41] : memref<3x64x16xf32, #tpu.memory_space<vmem>>, vector<1x16x16xf32>
    %52 = vector.shape_cast %51 : vector<1x16x16xf32> to vector<16x16xf32>
    %cst_42 = arith.constant dense<0.000000e+00> : vector<16x16xf32>
    %53 = tpu.matmul %50, %52, %cst_42 {dimension_numbers = #tpu.dot_dimension_numbers<[1], [0], [0], [1], [0, 0, 1, 1], [], []>} : vector<16x16xf32>, vector<16x16xf32>, vector<16x16xf32> -> vector<16x16xf32>
    %54 = arith.addf %48, %53 : vector<16x16xf32>
    %c0_43 = arith.constant 0 : index
    %c3 = arith.constant 3 : index
    %c0_44 = arith.constant 0 : index
    %55 = vector.load %arg30[%c0_43, %c3, %c0_44] : memref<2x12x32xf32, #tpu.memory_space<vmem>>, vector<2x8x16xf32>
    %56 = vector.shape_cast %55 : vector<2x8x16xf32> to vector<16x16xf32>
    %c2_45 = arith.constant 2 : index
    %c0_46 = arith.constant 0 : index
    %c0_47 = arith.constant 0 : index
    %57 = vector.load %arg17[%c2_45, %c0_46, %c0_47] : memref<3x64x16xf32, #tpu.memory_space<vmem>>, vector<1x16x16xf32>
    %58 = vector.shape_cast %57 : vector<1x16x16xf32> to vector<16x16xf32>
    %cst_48 = arith.constant dense<0.000000e+00> : vector<16x16xf32>
    %59 = tpu.matmul %56, %58, %cst_48 {dimension_numbers = #tpu.dot_dimension_numbers<[1], [0], [0], [1], [0, 0, 1, 1], [], []>} : vector<16x16xf32>, vector<16x16xf32>, vector<16x16xf32> -> vector<16x16xf32>
    %60 = arith.addf %54, %59 : vector<16x16xf32>
    %c0_49 = arith.constant 0 : index
    %c2_50 = arith.constant 2 : index
    %c0_51 = arith.constant 0 : index
    %61 = vector.load %arg30[%c0_49, %c2_50, %c0_51] : memref<2x12x32xf32, #tpu.memory_space<vmem>>, vector<2x8x16xf32>
    tpu.vector_store %arg30[%c0_49, %c2_50, %c0_51], %38 {strides = array<i32>} : memref<2x12x32xf32, #tpu.memory_space<vmem>>, vector<2x8x16xf32>,
    %cst_52 = arith.constant 0.000000e+00 : f32
    %62 = vector.broadcast %cst_52 : f32 to vector<16x16xf32>
    %c0_53 = arith.constant 0 : index
    %c1_54 = arith.constant 1 : index
    %c0_55 = arith.constant 0 : index
    %63 = vector.load %arg30[%c0_53, %c1_54, %c0_55] : memref<2x12x32xf32, #tpu.memory_space<vmem>>, vector<2x8x16xf32>
    %64 = vector.shape_cast %63 : vector<2x8x16xf32> to vector<16x16xf32>
    %c0_56 = arith.constant 0 : index
    %c0_57 = arith.constant 0 : index
    %c0_58 = arith.constant 0 : index
    %65 = vector.load %arg5[%c0_56, %c0_57, %c0_58] : memref<2x16x16xf32, #tpu.memory_space<vmem>>, vector<1x16x16xf32>
    %66 = vector.shape_cast %65 : vector<1x16x16xf32> to vector<16x16xf32>
    %cst_59 = arith.constant dense<0.000000e+00> : vector<16x16xf32>
    %67 = tpu.matmul %64, %66, %cst_59 {dimension_numbers = #tpu.dot_dimension_numbers<[1], [0], [0], [1], [0, 0, 1, 1], [], []>} : vector<16x16xf32>, vector<16x16xf32>, vector<16x16xf32> -> vector<16x16xf32>
    %68 = arith.addf %62, %67 : vector<16x16xf32>
    %c0_60 = arith.constant 0 : index
    %c2_61 = arith.constant 2 : index
    %c0_62 = arith.constant 0 : index
    %69 = vector.load %arg30[%c0_60, %c2_61, %c0_62] : memref<2x12x32xf32, #tpu.memory_space<vmem>>, vector<2x8x16xf32>
    %70 = vector.shape_cast %69 : vector<2x8x16xf32> to vector<16x16xf32>
    %c1_63 = arith.constant 1 : index
    %c0_64 = arith.constant 0 : index
    %c0_65 = arith.constant 0 : index
    %71 = vector.load %arg5[%c1_63, %c0_64, %c0_65] : memref<2x16x16xf32, #tpu.memory_space<vmem>>, vector<1x16x16xf32>
    %72 = vector.shape_cast %71 : vector<1x16x16xf32> to vector<16x16xf32>
    %cst_66 = arith.constant dense<0.000000e+00> : vector<16x16xf32>
    %73 = tpu.matmul %70, %72, %cst_66 {dimension_numbers = #tpu.dot_dimension_numbers<[1], [0], [0], [1], [0, 0, 1, 1], [], []>} : vector<16x16xf32>, vector<16x16xf32>, vector<16x16xf32> -> vector<16x16xf32>
    %74 = arith.addf %68, %73 : vector<16x16xf32>
    %c0_67 = arith.constant 0 : index
    %c0_68 = arith.constant 0 : index
    %75 = vector.load %arg6[%c0_67, %c0_68] : memref<1x16xf32, #tpu.memory_space<vmem>>, vector<1x16xf32>
    %76 = vector.broadcast %75 : vector<1x16xf32> to vector<16x16xf32>
    %77 = arith.addf %74, %76 : vector<16x16xf32>
    %cst_69 = arith.constant dense<0.000000e+00> : vector<16xf32>
    %78 = vector.multi_reduction <add>, %77, %cst_69 [0] : vector<16x16xf32> to vector<16xf32>
    %79 = vector.shape_cast %78 : vector<16xf32> to vector<1x16xf32>
    %cst_70 = arith.constant 1.600000e+01 : f32
    %80 = vector.broadcast %cst_70 : f32 to vector<1x16xf32>
    %81 = arith.divf %79, %80 : vector<1x16xf32>
    %82 = vector.broadcast %81 : vector<1x16xf32> to vector<16x16xf32>
    %83 = arith.subf %77, %82 : vector<16x16xf32>
    %84 = arith.mulf %83, %83 : vector<16x16xf32>
    %cst_71 = arith.constant dense<0.000000e+00> : vector<16xf32>
    %85 = vector.multi_reduction <add>, %84, %cst_71 [0] : vector<16x16xf32> to vector<16xf32>
    %86 = vector.shape_cast %85 : vector<16xf32> to vector<1x16xf32>
    %cst_72 = arith.constant 1.600000e+01 : f32
    %87 = vector.broadcast %cst_72 : f32 to vector<1x16xf32>
    %88 = arith.divf %86, %87 : vector<1x16xf32>
    %89 = vector.broadcast %81 : vector<1x16xf32> to vector<16x16xf32>
    %90 = arith.subf %77, %89 : vector<16x16xf32>
    %cst_73 = arith.constant 9.99999974E-6 : f32
    %91 = vector.broadcast %cst_73 : f32 to vector<1x16xf32>
    %92 = arith.addf %88, %91 : vector<1x16xf32>
    %93 = math.rsqrt %92 : vector<1x16xf32>
    %94 = vector.broadcast %93 : vector<1x16xf32> to vector<16x16xf32>
    %95 = arith.mulf %90, %94 : vector<16x16xf32>
    %c0_74 = arith.constant 0 : index
    %c0_75 = arith.constant 0 : index
    %96 = vector.load %arg7[%c0_74, %c0_75] : memref<1x16xf32, #tpu.memory_space<vmem>>, vector<1x16xf32>
    %97 = vector.broadcast %96 : vector<1x16xf32> to vector<16x16xf32>
    %98 = arith.mulf %95, %97 : vector<16x16xf32>
    %c0_76 = arith.constant 0 : index
    %c0_77 = arith.constant 0 : index
    %99 = vector.load %arg8[%c0_76, %c0_77] : memref<1x16xf32, #tpu.memory_space<vmem>>, vector<1x16xf32>
    %100 = vector.broadcast %99 : vector<1x16xf32> to vector<16x16xf32>
    %101 = arith.addf %98, %100 : vector<16x16xf32>
    %cst_78 = arith.constant 0.000000e+00 : f32
    %102 = vector.broadcast %cst_78 : f32 to vector<16x16xf32>
    %103 = arith.maximumf %101, %102 : vector<16x16xf32>
    %104 = vector.shape_cast %103 : vector<16x16xf32> to vector<2x8x16xf32>
    %c0_79 = arith.constant 0 : index
    %c2_80 = arith.constant 2 : index
    %c0_81 = arith.constant 0 : index
    %105 = vector.load %arg30[%c0_79, %c2_80, %c0_81] : memref<2x12x32xf32, #tpu.memory_space<vmem>>, vector<2x8x16xf32>
    tpu.vector_store %arg30[%c0_79, %c2_80, %c0_81], %104 {strides = array<i32>} : memref<2x12x32xf32, #tpu.memory_space<vmem>>, vector<2x8x16xf32>,
    %c0_82 = arith.constant 0 : index
    %c1_83 = arith.constant 1 : index
    %c0_84 = arith.constant 0 : index
    %106 = vector.load %arg30[%c0_82, %c1_83, %c0_84] : memref<2x12x32xf32, #tpu.memory_space<vmem>>, vector<2x8x16xf32>
    %107 = arith.maximumf %104, %106 : vector<2x8x16xf32>
    %c0_85 = arith.constant 0 : index
    %c2_86 = arith.constant 2 : index
    %c0_87 = arith.constant 0 : index
    %108 = vector.load %arg30[%c0_85, %c2_86, %c0_87] : memref<2x12x32xf32, #tpu.memory_space<vmem>>, vector<2x8x16xf32>
    tpu.vector_store %arg30[%c0_85, %c2_86, %c0_87], %107 {strides = array<i32>} : memref<2x12x32xf32, #tpu.memory_space<vmem>>, vector<2x8x16xf32>,
    %c0_88 = arith.constant 0 : index
    %c1_89 = arith.constant 1 : index
    %c0_90 = arith.constant 0 : index
    %109 = vector.load %arg30[%c0_88, %c1_89, %c0_90] : memref<2x12x32xf32, #tpu.memory_space<vmem>>, vector<2x8x16xf32>
    %110 = vector.shape_cast %109 : vector<2x8x16xf32> to vector<16x16xf32>
    %c0_91 = arith.constant 0 : index
    %c16 = arith.constant 16 : index
    %c0_92 = arith.constant 0 : index
    %111 = vector.load %arg17[%c0_91, %c16, %c0_92] : memref<3x64x16xf32, #tpu.memory_space<vmem>>, vector<1x16x16xf32>
    %112 = vector.shape_cast %111 : vector<1x16x16xf32> to vector<16x16xf32>
    %cst_93 = arith.constant dense<0.000000e+00> : vector<16x16xf32>
    %113 = tpu.matmul %110, %112, %cst_93 {dimension_numbers = #tpu.dot_dimension_numbers<[1], [0], [0], [1], [0, 0, 1, 1], [], []>} : vector<16x16xf32>, vector<16x16xf32>, vector<16x16xf32> -> vector<16x16xf32>
    %114 = arith.addf %60, %113 : vector<16x16xf32>
    %c0_94 = arith.constant 0 : index
    %c2_95 = arith.constant 2 : index
    %c0_96 = arith.constant 0 : index
    %115 = vector.load %arg30[%c0_94, %c2_95, %c0_96] : memref<2x12x32xf32, #tpu.memory_space<vmem>>, vector<2x8x16xf32>
    %116 = vector.shape_cast %115 : vector<2x8x16xf32> to vector<16x16xf32>
    %c1_97 = arith.constant 1 : index
    %c16_98 = arith.constant 16 : index
    %c0_99 = arith.constant 0 : index
    %117 = vector.load %arg17[%c1_97, %c16_98, %c0_99] : memref<3x64x16xf32, #tpu.memory_space<vmem>>, vector<1x16x16xf32>
    %118 = vector.shape_cast %117 : vector<1x16x16xf32> to vector<16x16xf32>
    %cst_100 = arith.constant dense<0.000000e+00> : vector<16x16xf32>
    %119 = tpu.matmul %116, %118, %cst_100 {dimension_numbers = #tpu.dot_dimension_numbers<[1], [0], [0], [1], [0, 0, 1, 1], [], []>} : vector<16x16xf32>, vector<16x16xf32>, vector<16x16xf32> -> vector<16x16xf32>
    %120 = arith.addf %114, %119 : vector<16x16xf32>
    %c0_101 = arith.constant 0 : index
    %c3_102 = arith.constant 3 : index
    %c0_103 = arith.constant 0 : index
    %121 = vector.load %arg30[%c0_101, %c3_102, %c0_103] : memref<2x12x32xf32, #tpu.memory_space<vmem>>, vector<2x8x16xf32>
    %122 = vector.shape_cast %121 : vector<2x8x16xf32> to vector<16x16xf32>
    %c2_104 = arith.constant 2 : index
    %c16_105 = arith.constant 16 : index
    %c0_106 = arith.constant 0 : index
    %123 = vector.load %arg17[%c2_104, %c16_105, %c0_106] : memref<3x64x16xf32, #tpu.memory_space<vmem>>, vector<1x16x16xf32>
    %124 = vector.shape_cast %123 : vector<1x16x16xf32> to vector<16x16xf32>
    %cst_107 = arith.constant dense<0.000000e+00> : vector<16x16xf32>
    %125 = tpu.matmul %122, %124, %cst_107 {dimension_numbers = #tpu.dot_dimension_numbers<[1], [0], [0], [1], [0, 0, 1, 1], [], []>} : vector<16x16xf32>, vector<16x16xf32>, vector<16x16xf32> -> vector<16x16xf32>
    %126 = arith.addf %120, %125 : vector<16x16xf32>
    %c0_108 = arith.constant 0 : index
    %c2_109 = arith.constant 2 : index
    %c0_110 = arith.constant 0 : index
    %127 = vector.load %arg30[%c0_108, %c2_109, %c0_110] : memref<2x12x32xf32, #tpu.memory_space<vmem>>, vector<2x8x16xf32>
    tpu.vector_store %arg30[%c0_108, %c2_109, %c0_110], %104 {strides = array<i32>} : memref<2x12x32xf32, #tpu.memory_space<vmem>>, vector<2x8x16xf32>,
    %cst_111 = arith.constant 0.000000e+00 : f32
    %128 = vector.broadcast %cst_111 : f32 to vector<16x16xf32>
    %c0_112 = arith.constant 0 : index
    %c1_113 = arith.constant 1 : index
    %c0_114 = arith.constant 0 : index
    %129 = vector.load %arg30[%c0_112, %c1_113, %c0_114] : memref<2x12x32xf32, #tpu.memory_space<vmem>>, vector<2x8x16xf32>
    %130 = vector.shape_cast %129 : vector<2x8x16xf32> to vector<16x16xf32>
    %c0_115 = arith.constant 0 : index
    %c0_116 = arith.constant 0 : index
    %c0_117 = arith.constant 0 : index
    %131 = vector.load %arg9[%c0_115, %c0_116, %c0_117] : memref<3x16x16xf32, #tpu.memory_space<vmem>>, vector<1x16x16xf32>
    %132 = vector.shape_cast %131 : vector<1x16x16xf32> to vector<16x16xf32>
    %cst_118 = arith.constant dense<0.000000e+00> : vector<16x16xf32>
    %133 = tpu.matmul %130, %132, %cst_118 {dimension_numbers = #tpu.dot_dimension_numbers<[1], [0], [0], [1], [0, 0, 1, 1], [], []>} : vector<16x16xf32>, vector<16x16xf32>, vector<16x16xf32> -> vector<16x16xf32>
    %134 = arith.addf %128, %133 : vector<16x16xf32>
    %c0_119 = arith.constant 0 : index
    %c2_120 = arith.constant 2 : index
    %c0_121 = arith.constant 0 : index
    %135 = vector.load %arg30[%c0_119, %c2_120, %c0_121] : memref<2x12x32xf32, #tpu.memory_space<vmem>>, vector<2x8x16xf32>
    %136 = vector.shape_cast %135 : vector<2x8x16xf32> to vector<16x16xf32>
    %c1_122 = arith.constant 1 : index
    %c0_123 = arith.constant 0 : index
    %c0_124 = arith.constant 0 : index
    %137 = vector.load %arg9[%c1_122, %c0_123, %c0_124] : memref<3x16x16xf32, #tpu.memory_space<vmem>>, vector<1x16x16xf32>
    %138 = vector.shape_cast %137 : vector<1x16x16xf32> to vector<16x16xf32>
    %cst_125 = arith.constant dense<0.000000e+00> : vector<16x16xf32>
    %139 = tpu.matmul %136, %138, %cst_125 {dimension_numbers = #tpu.dot_dimension_numbers<[1], [0], [0], [1], [0, 0, 1, 1], [], []>} : vector<16x16xf32>, vector<16x16xf32>, vector<16x16xf32> -> vector<16x16xf32>
    %140 = arith.addf %134, %139 : vector<16x16xf32>
    %c0_126 = arith.constant 0 : index
    %c3_127 = arith.constant 3 : index
    %c0_128 = arith.constant 0 : index
    %141 = vector.load %arg30[%c0_126, %c3_127, %c0_128] : memref<2x12x32xf32, #tpu.memory_space<vmem>>, vector<2x8x16xf32>
    %142 = vector.shape_cast %141 : vector<2x8x16xf32> to vector<16x16xf32>
    %c2_129 = arith.constant 2 : index
    %c0_130 = arith.constant 0 : index
    %c0_131 = arith.constant 0 : index
    %143 = vector.load %arg9[%c2_129, %c0_130, %c0_131] : memref<3x16x16xf32, #tpu.memory_space<vmem>>, vector<1x16x16xf32>
    %144 = vector.shape_cast %143 : vector<1x16x16xf32> to vector<16x16xf32>
    %cst_132 = arith.constant dense<0.000000e+00> : vector<16x16xf32>
    %145 = tpu.matmul %142, %144, %cst_132 {dimension_numbers = #tpu.dot_dimension_numbers<[1], [0], [0], [1], [0, 0, 1, 1], [], []>} : vector<16x16xf32>, vector<16x16xf32>, vector<16x16xf32> -> vector<16x16xf32>
    %146 = arith.addf %140, %145 : vector<16x16xf32>
    %c0_133 = arith.constant 0 : index
    %c0_134 = arith.constant 0 : index
    %147 = vector.load %arg10[%c0_133, %c0_134] : memref<1x16xf32, #tpu.memory_space<vmem>>, vector<1x16xf32>
    %148 = vector.broadcast %147 : vector<1x16xf32> to vector<16x16xf32>
    %149 = arith.addf %146, %148 : vector<16x16xf32>
    %cst_135 = arith.constant dense<0.000000e+00> : vector<16xf32>
    %150 = vector.multi_reduction <add>, %149, %cst_135 [0] : vector<16x16xf32> to vector<16xf32>
    %151 = vector.shape_cast %150 : vector<16xf32> to vector<1x16xf32>
    %cst_136 = arith.constant 1.600000e+01 : f32
    %152 = vector.broadcast %cst_136 : f32 to vector<1x16xf32>
    %153 = arith.divf %151, %152 : vector<1x16xf32>
    %154 = vector.broadcast %153 : vector<1x16xf32> to vector<16x16xf32>
    %155 = arith.subf %149, %154 : vector<16x16xf32>
    %156 = arith.mulf %155, %155 : vector<16x16xf32>
    %cst_137 = arith.constant dense<0.000000e+00> : vector<16xf32>
    %157 = vector.multi_reduction <add>, %156, %cst_137 [0] : vector<16x16xf32> to vector<16xf32>
    %158 = vector.shape_cast %157 : vector<16xf32> to vector<1x16xf32>
    %cst_138 = arith.constant 1.600000e+01 : f32
    %159 = vector.broadcast %cst_138 : f32 to vector<1x16xf32>
    %160 = arith.divf %158, %159 : vector<1x16xf32>
    %161 = vector.broadcast %153 : vector<1x16xf32> to vector<16x16xf32>
    %162 = arith.subf %149, %161 : vector<16x16xf32>
    %cst_139 = arith.constant 9.99999974E-6 : f32
    %163 = vector.broadcast %cst_139 : f32 to vector<1x16xf32>
    %164 = arith.addf %160, %163 : vector<1x16xf32>
    %165 = math.rsqrt %164 : vector<1x16xf32>
    %166 = vector.broadcast %165 : vector<1x16xf32> to vector<16x16xf32>
    %167 = arith.mulf %162, %166 : vector<16x16xf32>
    %c0_140 = arith.constant 0 : index
    %c0_141 = arith.constant 0 : index
    %168 = vector.load %arg11[%c0_140, %c0_141] : memref<1x16xf32, #tpu.memory_space<vmem>>, vector<1x16xf32>
    %169 = vector.broadcast %168 : vector<1x16xf32> to vector<16x16xf32>
    %170 = arith.mulf %167, %169 : vector<16x16xf32>
    %c0_142 = arith.constant 0 : index
    %c0_143 = arith.constant 0 : index
    %171 = vector.load %arg12[%c0_142, %c0_143] : memref<1x16xf32, #tpu.memory_space<vmem>>, vector<1x16xf32>
    %172 = vector.broadcast %171 : vector<1x16xf32> to vector<16x16xf32>
    %173 = arith.addf %170, %172 : vector<16x16xf32>
    %cst_144 = arith.constant 0.000000e+00 : f32
    %174 = vector.broadcast %cst_144 : f32 to vector<16x16xf32>
    %175 = arith.maximumf %173, %174 : vector<16x16xf32>
    %176 = vector.shape_cast %175 : vector<16x16xf32> to vector<2x8x16xf32>
    %c0_145 = arith.constant 0 : index
    %c2_146 = arith.constant 2 : index
    %c0_147 = arith.constant 0 : index
    %177 = vector.load %arg30[%c0_145, %c2_146, %c0_147] : memref<2x12x32xf32, #tpu.memory_space<vmem>>, vector<2x8x16xf32>
    tpu.vector_store %arg30[%c0_145, %c2_146, %c0_147], %176 {strides = array<i32>} : memref<2x12x32xf32, #tpu.memory_space<vmem>>, vector<2x8x16xf32>,
    %c0_148 = arith.constant 0 : index
    %c1_149 = arith.constant 1 : index
    %c0_150 = arith.constant 0 : index
    %178 = vector.load %arg30[%c0_148, %c1_149, %c0_150] : memref<2x12x32xf32, #tpu.memory_space<vmem>>, vector<2x8x16xf32>
    %179 = arith.maximumf %176, %178 : vector<2x8x16xf32>
    %c0_151 = arith.constant 0 : index
    %c2_152 = arith.constant 2 : index
    %c0_153 = arith.constant 0 : index
    %180 = vector.load %arg30[%c0_151, %c2_152, %c0_153] : memref<2x12x32xf32, #tpu.memory_space<vmem>>, vector<2x8x16xf32>
    tpu.vector_store %arg30[%c0_151, %c2_152, %c0_153], %179 {strides = array<i32>} : memref<2x12x32xf32, #tpu.memory_space<vmem>>, vector<2x8x16xf32>,
    %c0_154 = arith.constant 0 : index
    %c1_155 = arith.constant 1 : index
    %c0_156 = arith.constant 0 : index
    %181 = vector.load %arg30[%c0_154, %c1_155, %c0_156] : memref<2x12x32xf32, #tpu.memory_space<vmem>>, vector<2x8x16xf32>
    %182 = vector.shape_cast %181 : vector<2x8x16xf32> to vector<16x16xf32>
    %c0_157 = arith.constant 0 : index
    %c32 = arith.constant 32 : index
    %c0_158 = arith.constant 0 : index
    %183 = vector.load %arg17[%c0_157, %c32, %c0_158] : memref<3x64x16xf32, #tpu.memory_space<vmem>>, vector<1x16x16xf32>
    %184 = vector.shape_cast %183 : vector<1x16x16xf32> to vector<16x16xf32>
    %cst_159 = arith.constant dense<0.000000e+00> : vector<16x16xf32>
    %185 = tpu.matmul %182, %184, %cst_159 {dimension_numbers = #tpu.dot_dimension_numbers<[1], [0], [0], [1], [0, 0, 1, 1], [], []>} : vector<16x16xf32>, vector<16x16xf32>, vector<16x16xf32> -> vector<16x16xf32>
    %186 = arith.addf %126, %185 : vector<16x16xf32>
    %c0_160 = arith.constant 0 : index
    %c2_161 = arith.constant 2 : index
    %c0_162 = arith.constant 0 : index
    %187 = vector.load %arg30[%c0_160, %c2_161, %c0_162] : memref<2x12x32xf32, #tpu.memory_space<vmem>>, vector<2x8x16xf32>
    %188 = vector.shape_cast %187 : vector<2x8x16xf32> to vector<16x16xf32>
    %c1_163 = arith.constant 1 : index
    %c32_164 = arith.constant 32 : index
    %c0_165 = arith.constant 0 : index
    %189 = vector.load %arg17[%c1_163, %c32_164, %c0_165] : memref<3x64x16xf32, #tpu.memory_space<vmem>>, vector<1x16x16xf32>
    %190 = vector.shape_cast %189 : vector<1x16x16xf32> to vector<16x16xf32>
    %cst_166 = arith.constant dense<0.000000e+00> : vector<16x16xf32>
    %191 = tpu.matmul %188, %190, %cst_166 {dimension_numbers = #tpu.dot_dimension_numbers<[1], [0], [0], [1], [0, 0, 1, 1], [], []>} : vector<16x16xf32>, vector<16x16xf32>, vector<16x16xf32> -> vector<16x16xf32>
    %192 = arith.addf %186, %191 : vector<16x16xf32>
    %c0_167 = arith.constant 0 : index
    %c3_168 = arith.constant 3 : index
    %c0_169 = arith.constant 0 : index
    %193 = vector.load %arg30[%c0_167, %c3_168, %c0_169] : memref<2x12x32xf32, #tpu.memory_space<vmem>>, vector<2x8x16xf32>
    %194 = vector.shape_cast %193 : vector<2x8x16xf32> to vector<16x16xf32>
    %c2_170 = arith.constant 2 : index
    %c32_171 = arith.constant 32 : index
    %c0_172 = arith.constant 0 : index
    %195 = vector.load %arg17[%c2_170, %c32_171, %c0_172] : memref<3x64x16xf32, #tpu.memory_space<vmem>>, vector<1x16x16xf32>
    %196 = vector.shape_cast %195 : vector<1x16x16xf32> to vector<16x16xf32>
    %cst_173 = arith.constant dense<0.000000e+00> : vector<16x16xf32>
    %197 = tpu.matmul %194, %196, %cst_173 {dimension_numbers = #tpu.dot_dimension_numbers<[1], [0], [0], [1], [0, 0, 1, 1], [], []>} : vector<16x16xf32>, vector<16x16xf32>, vector<16x16xf32> -> vector<16x16xf32>
    %198 = arith.addf %192, %197 : vector<16x16xf32>
    %c0_174 = arith.constant 0 : index
    %c2_175 = arith.constant 2 : index
    %c0_176 = arith.constant 0 : index
    %199 = vector.load %arg30[%c0_174, %c2_175, %c0_176] : memref<2x12x32xf32, #tpu.memory_space<vmem>>, vector<2x8x16xf32>
    tpu.vector_store %arg30[%c0_174, %c2_175, %c0_176], %176 {strides = array<i32>} : memref<2x12x32xf32, #tpu.memory_space<vmem>>, vector<2x8x16xf32>,
    %cst_177 = arith.constant 0.000000e+00 : f32
    %200 = vector.broadcast %cst_177 : f32 to vector<16x16xf32>
    %c0_178 = arith.constant 0 : index
    %c0_179 = arith.constant 0 : index
    %c0_180 = arith.constant 0 : index
    %201 = vector.load %arg30[%c0_178, %c0_179, %c0_180] : memref<2x12x32xf32, #tpu.memory_space<vmem>>, vector<2x8x16xf32>
    %202 = vector.shape_cast %201 : vector<2x8x16xf32> to vector<16x16xf32>
    %c0_181 = arith.constant 0 : index
    %c0_182 = arith.constant 0 : index
    %c0_183 = arith.constant 0 : index
    %203 = vector.load %arg13[%c0_181, %c0_182, %c0_183] : memref<4x16x16xf32, #tpu.memory_space<vmem>>, vector<1x16x16xf32>
    %204 = vector.shape_cast %203 : vector<1x16x16xf32> to vector<16x16xf32>
    %cst_184 = arith.constant dense<0.000000e+00> : vector<16x16xf32>
    %205 = tpu.matmul %202, %204, %cst_184 {dimension_numbers = #tpu.dot_dimension_numbers<[1], [0], [0], [1], [0, 0, 1, 1], [], []>} : vector<16x16xf32>, vector<16x16xf32>, vector<16x16xf32> -> vector<16x16xf32>
    %206 = arith.addf %200, %205 : vector<16x16xf32>
    %c0_185 = arith.constant 0 : index
    %c1_186 = arith.constant 1 : index
    %c0_187 = arith.constant 0 : index
    %207 = vector.load %arg30[%c0_185, %c1_186, %c0_187] : memref<2x12x32xf32, #tpu.memory_space<vmem>>, vector<2x8x16xf32>
    %208 = vector.shape_cast %207 : vector<2x8x16xf32> to vector<16x16xf32>
    %c1_188 = arith.constant 1 : index
    %c0_189 = arith.constant 0 : index
    %c0_190 = arith.constant 0 : index
    %209 = vector.load %arg13[%c1_188, %c0_189, %c0_190] : memref<4x16x16xf32, #tpu.memory_space<vmem>>, vector<1x16x16xf32>
    %210 = vector.shape_cast %209 : vector<1x16x16xf32> to vector<16x16xf32>
    %cst_191 = arith.constant dense<0.000000e+00> : vector<16x16xf32>
    %211 = tpu.matmul %208, %210, %cst_191 {dimension_numbers = #tpu.dot_dimension_numbers<[1], [0], [0], [1], [0, 0, 1, 1], [], []>} : vector<16x16xf32>, vector<16x16xf32>, vector<16x16xf32> -> vector<16x16xf32>
    %212 = arith.addf %206, %211 : vector<16x16xf32>
    %c0_192 = arith.constant 0 : index
    %c2_193 = arith.constant 2 : index
    %c0_194 = arith.constant 0 : index
    %213 = vector.load %arg30[%c0_192, %c2_193, %c0_194] : memref<2x12x32xf32, #tpu.memory_space<vmem>>, vector<2x8x16xf32>
    %214 = vector.shape_cast %213 : vector<2x8x16xf32> to vector<16x16xf32>
    %c2_195 = arith.constant 2 : index
    %c0_196 = arith.constant 0 : index
    %c0_197 = arith.constant 0 : index
    %215 = vector.load %arg13[%c2_195, %c0_196, %c0_197] : memref<4x16x16xf32, #tpu.memory_space<vmem>>, vector<1x16x16xf32>
    %216 = vector.shape_cast %215 : vector<1x16x16xf32> to vector<16x16xf32>
    %cst_198 = arith.constant dense<0.000000e+00> : vector<16x16xf32>
    %217 = tpu.matmul %214, %216, %cst_198 {dimension_numbers = #tpu.dot_dimension_numbers<[1], [0], [0], [1], [0, 0, 1, 1], [], []>} : vector<16x16xf32>, vector<16x16xf32>, vector<16x16xf32> -> vector<16x16xf32>
    %218 = arith.addf %212, %217 : vector<16x16xf32>
    %c0_199 = arith.constant 0 : index
    %c3_200 = arith.constant 3 : index
    %c0_201 = arith.constant 0 : index
    %219 = vector.load %arg30[%c0_199, %c3_200, %c0_201] : memref<2x12x32xf32, #tpu.memory_space<vmem>>, vector<2x8x16xf32>
    %220 = vector.shape_cast %219 : vector<2x8x16xf32> to vector<16x16xf32>
    %c3_202 = arith.constant 3 : index
    %c0_203 = arith.constant 0 : index
    %c0_204 = arith.constant 0 : index
    %221 = vector.load %arg13[%c3_202, %c0_203, %c0_204] : memref<4x16x16xf32, #tpu.memory_space<vmem>>, vector<1x16x16xf32>
    %222 = vector.shape_cast %221 : vector<1x16x16xf32> to vector<16x16xf32>
    %cst_205 = arith.constant dense<0.000000e+00> : vector<16x16xf32>
    %223 = tpu.matmul %220, %222, %cst_205 {dimension_numbers = #tpu.dot_dimension_numbers<[1], [0], [0], [1], [0, 0, 1, 1], [], []>} : vector<16x16xf32>, vector<16x16xf32>, vector<16x16xf32> -> vector<16x16xf32>
    %224 = arith.addf %218, %223 : vector<16x16xf32>
    %c0_206 = arith.constant 0 : index
    %c0_207 = arith.constant 0 : index
    %225 = vector.load %arg14[%c0_206, %c0_207] : memref<1x16xf32, #tpu.memory_space<vmem>>, vector<1x16xf32>
    %226 = vector.broadcast %225 : vector<1x16xf32> to vector<16x16xf32>
    %227 = arith.addf %224, %226 : vector<16x16xf32>
    %cst_208 = arith.constant dense<0.000000e+00> : vector<16xf32>
    %228 = vector.multi_reduction <add>, %227, %cst_208 [0] : vector<16x16xf32> to vector<16xf32>
    %229 = vector.shape_cast %228 : vector<16xf32> to vector<1x16xf32>
    %cst_209 = arith.constant 1.600000e+01 : f32
    %230 = vector.broadcast %cst_209 : f32 to vector<1x16xf32>
    %231 = arith.divf %229, %230 : vector<1x16xf32>
    %232 = vector.broadcast %231 : vector<1x16xf32> to vector<16x16xf32>
    %233 = arith.subf %227, %232 : vector<16x16xf32>
    %234 = arith.mulf %233, %233 : vector<16x16xf32>
    %cst_210 = arith.constant dense<0.000000e+00> : vector<16xf32>
    %235 = vector.multi_reduction <add>, %234, %cst_210 [0] : vector<16x16xf32> to vector<16xf32>
    %236 = vector.shape_cast %235 : vector<16xf32> to vector<1x16xf32>
    %cst_211 = arith.constant 1.600000e+01 : f32
    %237 = vector.broadcast %cst_211 : f32 to vector<1x16xf32>
    %238 = arith.divf %236, %237 : vector<1x16xf32>
    %239 = vector.broadcast %231 : vector<1x16xf32> to vector<16x16xf32>
    %240 = arith.subf %227, %239 : vector<16x16xf32>
    %cst_212 = arith.constant 9.99999974E-6 : f32
    %241 = vector.broadcast %cst_212 : f32 to vector<1x16xf32>
    %242 = arith.addf %238, %241 : vector<1x16xf32>
    %243 = math.rsqrt %242 : vector<1x16xf32>
    %244 = vector.broadcast %243 : vector<1x16xf32> to vector<16x16xf32>
    %245 = arith.mulf %240, %244 : vector<16x16xf32>
    %c0_213 = arith.constant 0 : index
    %c0_214 = arith.constant 0 : index
    %246 = vector.load %arg15[%c0_213, %c0_214] : memref<1x16xf32, #tpu.memory_space<vmem>>, vector<1x16xf32>
    %247 = vector.broadcast %246 : vector<1x16xf32> to vector<16x16xf32>
    %248 = arith.mulf %245, %247 : vector<16x16xf32>
    %c0_215 = arith.constant 0 : index
    %c0_216 = arith.constant 0 : index
    %249 = vector.load %arg16[%c0_215, %c0_216] : memref<1x16xf32, #tpu.memory_space<vmem>>, vector<1x16xf32>
    %250 = vector.broadcast %249 : vector<1x16xf32> to vector<16x16xf32>
    %251 = arith.addf %248, %250 : vector<16x16xf32>
    %cst_217 = arith.constant 0.000000e+00 : f32
    %252 = vector.broadcast %cst_217 : f32 to vector<16x16xf32>
    %253 = arith.maximumf %251, %252 : vector<16x16xf32>
    %254 = vector.shape_cast %253 : vector<16x16xf32> to vector<2x8x16xf32>
    %c0_218 = arith.constant 0 : index
    %c2_219 = arith.constant 2 : index
    %c0_220 = arith.constant 0 : index
    %255 = vector.load %arg30[%c0_218, %c2_219, %c0_220] : memref<2x12x32xf32, #tpu.memory_space<vmem>>, vector<2x8x16xf32>
    tpu.vector_store %arg30[%c0_218, %c2_219, %c0_220], %254 {strides = array<i32>} : memref<2x12x32xf32, #tpu.memory_space<vmem>>, vector<2x8x16xf32>,
    %c0_221 = arith.constant 0 : index
    %c1_222 = arith.constant 1 : index
    %c0_223 = arith.constant 0 : index
    %256 = vector.load %arg30[%c0_221, %c1_222, %c0_223] : memref<2x12x32xf32, #tpu.memory_space<vmem>>, vector<2x8x16xf32>
    %257 = arith.maximumf %254, %256 : vector<2x8x16xf32>
    %c0_224 = arith.constant 0 : index
    %c2_225 = arith.constant 2 : index
    %c0_226 = arith.constant 0 : index
    %258 = vector.load %arg30[%c0_224, %c2_225, %c0_226] : memref<2x12x32xf32, #tpu.memory_space<vmem>>, vector<2x8x16xf32>
    tpu.vector_store %arg30[%c0_224, %c2_225, %c0_226], %257 {strides = array<i32>} : memref<2x12x32xf32, #tpu.memory_space<vmem>>, vector<2x8x16xf32>,
    %c0_227 = arith.constant 0 : index
    %c1_228 = arith.constant 1 : index
    %c0_229 = arith.constant 0 : index
    %259 = vector.load %arg30[%c0_227, %c1_228, %c0_229] : memref<2x12x32xf32, #tpu.memory_space<vmem>>, vector<2x8x16xf32>
    %260 = vector.shape_cast %259 : vector<2x8x16xf32> to vector<16x16xf32>
    %c0_230 = arith.constant 0 : index
    %c48 = arith.constant 48 : index
    %c0_231 = arith.constant 0 : index
    %261 = vector.load %arg17[%c0_230, %c48, %c0_231] : memref<3x64x16xf32, #tpu.memory_space<vmem>>, vector<1x16x16xf32>
    %262 = vector.shape_cast %261 : vector<1x16x16xf32> to vector<16x16xf32>
    %cst_232 = arith.constant dense<0.000000e+00> : vector<16x16xf32>
    %263 = tpu.matmul %260, %262, %cst_232 {dimension_numbers = #tpu.dot_dimension_numbers<[1], [0], [0], [1], [0, 0, 1, 1], [], []>} : vector<16x16xf32>, vector<16x16xf32>, vector<16x16xf32> -> vector<16x16xf32>
    %264 = arith.addf %198, %263 : vector<16x16xf32>
    %c0_233 = arith.constant 0 : index
    %c2_234 = arith.constant 2 : index
    %c0_235 = arith.constant 0 : index
    %265 = vector.load %arg30[%c0_233, %c2_234, %c0_235] : memref<2x12x32xf32, #tpu.memory_space<vmem>>, vector<2x8x16xf32>
    %266 = vector.shape_cast %265 : vector<2x8x16xf32> to vector<16x16xf32>
    %c1_236 = arith.constant 1 : index
    %c48_237 = arith.constant 48 : index
    %c0_238 = arith.constant 0 : index
    %267 = vector.load %arg17[%c1_236, %c48_237, %c0_238] : memref<3x64x16xf32, #tpu.memory_space<vmem>>, vector<1x16x16xf32>
    %268 = vector.shape_cast %267 : vector<1x16x16xf32> to vector<16x16xf32>
    %cst_239 = arith.constant dense<0.000000e+00> : vector<16x16xf32>
    %269 = tpu.matmul %266, %268, %cst_239 {dimension_numbers = #tpu.dot_dimension_numbers<[1], [0], [0], [1], [0, 0, 1, 1], [], []>} : vector<16x16xf32>, vector<16x16xf32>, vector<16x16xf32> -> vector<16x16xf32>
    %270 = arith.addf %264, %269 : vector<16x16xf32>
    %c0_240 = arith.constant 0 : index
    %c3_241 = arith.constant 3 : index
    %c0_242 = arith.constant 0 : index
    %271 = vector.load %arg30[%c0_240, %c3_241, %c0_242] : memref<2x12x32xf32, #tpu.memory_space<vmem>>, vector<2x8x16xf32>
    %272 = vector.shape_cast %271 : vector<2x8x16xf32> to vector<16x16xf32>
    %c2_243 = arith.constant 2 : index
    %c48_244 = arith.constant 48 : index
    %c0_245 = arith.constant 0 : index
    %273 = vector.load %arg17[%c2_243, %c48_244, %c0_245] : memref<3x64x16xf32, #tpu.memory_space<vmem>>, vector<1x16x16xf32>
    %274 = vector.shape_cast %273 : vector<1x16x16xf32> to vector<16x16xf32>
    %cst_246 = arith.constant dense<0.000000e+00> : vector<16x16xf32>
    %275 = tpu.matmul %272, %274, %cst_246 {dimension_numbers = #tpu.dot_dimension_numbers<[1], [0], [0], [1], [0, 0, 1, 1], [], []>} : vector<16x16xf32>, vector<16x16xf32>, vector<16x16xf32> -> vector<16x16xf32>
    %276 = arith.addf %270, %275 : vector<16x16xf32>
    %c0_247 = arith.constant 0 : index
    %c0_248 = arith.constant 0 : index
    %277 = vector.load %arg18[%c0_247, %c0_248] : memref<1x16xf32, #tpu.memory_space<vmem>>, vector<1x16xf32>
    %278 = vector.broadcast %277 : vector<1x16xf32> to vector<16x16xf32>
    %279 = arith.addf %276, %278 : vector<16x16xf32>
    %cst_249 = arith.constant dense<0.000000e+00> : vector<16xf32>
    %280 = vector.multi_reduction <add>, %279, %cst_249 [0] : vector<16x16xf32> to vector<16xf32>
    %281 = vector.shape_cast %280 : vector<16xf32> to vector<1x16xf32>
    %cst_250 = arith.constant 1.600000e+01 : f32
    %282 = vector.broadcast %cst_250 : f32 to vector<1x16xf32>
    %283 = arith.divf %281, %282 : vector<1x16xf32>
    %284 = vector.broadcast %283 : vector<1x16xf32> to vector<16x16xf32>
    %285 = arith.subf %279, %284 : vector<16x16xf32>
    %286 = arith.mulf %285, %285 : vector<16x16xf32>
    %cst_251 = arith.constant dense<0.000000e+00> : vector<16xf32>
    %287 = vector.multi_reduction <add>, %286, %cst_251 [0] : vector<16x16xf32> to vector<16xf32>
    %288 = vector.shape_cast %287 : vector<16xf32> to vector<1x16xf32>
    %cst_252 = arith.constant 1.600000e+01 : f32
    %289 = vector.broadcast %cst_252 : f32 to vector<1x16xf32>
    %290 = arith.divf %288, %289 : vector<1x16xf32>
    %291 = vector.broadcast %283 : vector<1x16xf32> to vector<16x16xf32>
    %292 = arith.subf %279, %291 : vector<16x16xf32>
    %cst_253 = arith.constant 9.99999974E-6 : f32
    %293 = vector.broadcast %cst_253 : f32 to vector<1x16xf32>
    %294 = arith.addf %290, %293 : vector<1x16xf32>
    %295 = math.rsqrt %294 : vector<1x16xf32>
    %296 = vector.broadcast %295 : vector<1x16xf32> to vector<16x16xf32>
    %297 = arith.mulf %292, %296 : vector<16x16xf32>
    %c0_254 = arith.constant 0 : index
    %c0_255 = arith.constant 0 : index
    %298 = vector.load %arg19[%c0_254, %c0_255] : memref<1x16xf32, #tpu.memory_space<vmem>>, vector<1x16xf32>
    %299 = vector.broadcast %298 : vector<1x16xf32> to vector<16x16xf32>
    %300 = arith.mulf %297, %299 : vector<16x16xf32>
    %c0_256 = arith.constant 0 : index
    %c0_257 = arith.constant 0 : index
    %301 = vector.load %arg20[%c0_256, %c0_257] : memref<1x16xf32, #tpu.memory_space<vmem>>, vector<1x16xf32>
    %302 = vector.broadcast %301 : vector<1x16xf32> to vector<16x16xf32>
    %303 = arith.addf %300, %302 : vector<16x16xf32>
    %cst_258 = arith.constant 0.000000e+00 : f32
    %304 = vector.broadcast %cst_258 : f32 to vector<16x16xf32>
    %305 = arith.maximumf %303, %304 : vector<16x16xf32>
    %306 = vector.shape_cast %305 : vector<16x16xf32> to vector<2x8x16xf32>
    %c0_259 = arith.constant 0 : index
    %c2_260 = arith.constant 2 : index
    %c0_261 = arith.constant 0 : index
    %307 = vector.load %arg30[%c0_259, %c2_260, %c0_261] : memref<2x12x32xf32, #tpu.memory_space<vmem>>, vector<2x8x16xf32>
    tpu.vector_store %arg30[%c0_259, %c2_260, %c0_261], %306 {strides = array<i32>} : memref<2x12x32xf32, #tpu.memory_space<vmem>>, vector<2x8x16xf32>,
    %cst_262 = arith.constant 0.000000e+00 : f32
    %308 = vector.broadcast %cst_262 : f32 to vector<16x32xf32>
    %c0_263 = arith.constant 0 : index
    %c1_264 = arith.constant 1 : index
    %c0_265 = arith.constant 0 : index
    %309 = vector.load %arg30[%c0_263, %c1_264, %c0_265] : memref<2x12x32xf32, #tpu.memory_space<vmem>>, vector<2x8x16xf32>
    %310 = vector.shape_cast %309 : vector<2x8x16xf32> to vector<16x16xf32>
    %c0_266 = arith.constant 0 : index
    %c0_267 = arith.constant 0 : index
    %c0_268 = arith.constant 0 : index
    %311 = vector.load %arg21[%c0_266, %c0_267, %c0_268] : memref<3x16x32xf32, #tpu.memory_space<vmem>>, vector<1x16x32xf32>
    %312 = vector.shape_cast %311 : vector<1x16x32xf32> to vector<16x32xf32>
    %cst_269 = arith.constant dense<0.000000e+00> : vector<16x32xf32>
    %313 = tpu.matmul %310, %312, %cst_269 {dimension_numbers = #tpu.dot_dimension_numbers<[1], [0], [0], [1], [0, 0, 1, 1], [], []>} : vector<16x16xf32>, vector<16x32xf32>, vector<16x32xf32> -> vector<16x32xf32>
    %314 = arith.addf %308, %313 : vector<16x32xf32>
    %c0_270 = arith.constant 0 : index
    %c2_271 = arith.constant 2 : index
    %c0_272 = arith.constant 0 : index
    %315 = vector.load %arg30[%c0_270, %c2_271, %c0_272] : memref<2x12x32xf32, #tpu.memory_space<vmem>>, vector<2x8x16xf32>
    %316 = vector.shape_cast %315 : vector<2x8x16xf32> to vector<16x16xf32>
    %c1_273 = arith.constant 1 : index
    %c0_274 = arith.constant 0 : index
    %c0_275 = arith.constant 0 : index
    %317 = vector.load %arg21[%c1_273, %c0_274, %c0_275] : memref<3x16x32xf32, #tpu.memory_space<vmem>>, vector<1x16x32xf32>
    %318 = vector.shape_cast %317 : vector<1x16x32xf32> to vector<16x32xf32>
    %cst_276 = arith.constant dense<0.000000e+00> : vector<16x32xf32>
    %319 = tpu.matmul %316, %318, %cst_276 {dimension_numbers = #tpu.dot_dimension_numbers<[1], [0], [0], [1], [0, 0, 1, 1], [], []>} : vector<16x16xf32>, vector<16x32xf32>, vector<16x32xf32> -> vector<16x32xf32>
    %320 = arith.addf %314, %319 : vector<16x32xf32>
    %c0_277 = arith.constant 0 : index
    %c3_278 = arith.constant 3 : index
    %c0_279 = arith.constant 0 : index
    %321 = vector.load %arg30[%c0_277, %c3_278, %c0_279] : memref<2x12x32xf32, #tpu.memory_space<vmem>>, vector<2x8x16xf32>
    %322 = vector.shape_cast %321 : vector<2x8x16xf32> to vector<16x16xf32>
    %c2_280 = arith.constant 2 : index
    %c0_281 = arith.constant 0 : index
    %c0_282 = arith.constant 0 : index
    %323 = vector.load %arg21[%c2_280, %c0_281, %c0_282] : memref<3x16x32xf32, #tpu.memory_space<vmem>>, vector<1x16x32xf32>
    %324 = vector.shape_cast %323 : vector<1x16x32xf32> to vector<16x32xf32>
    %cst_283 = arith.constant dense<0.000000e+00> : vector<16x32xf32>
    %325 = tpu.matmul %322, %324, %cst_283 {dimension_numbers = #tpu.dot_dimension_numbers<[1], [0], [0], [1], [0, 0, 1, 1], [], []>} : vector<16x16xf32>, vector<16x32xf32>, vector<16x32xf32> -> vector<16x32xf32>
    %326 = arith.addf %320, %325 : vector<16x32xf32>
    %c0_284 = arith.constant 0 : index
    %c0_285 = arith.constant 0 : index
    %327 = vector.load %arg22[%c0_284, %c0_285] : memref<1x32xf32, #tpu.memory_space<vmem>>, vector<1x32xf32>
    %328 = vector.broadcast %327 : vector<1x32xf32> to vector<16x32xf32>
    %329 = arith.addf %326, %328 : vector<16x32xf32>
    %cst_286 = arith.constant dense<0.000000e+00> : vector<32xf32>
    %330 = vector.multi_reduction <add>, %329, %cst_286 [0] : vector<16x32xf32> to vector<32xf32>
    %331 = vector.shape_cast %330 : vector<32xf32> to vector<1x32xf32>
    %cst_287 = arith.constant 1.600000e+01 : f32
    %332 = vector.broadcast %cst_287 : f32 to vector<1x32xf32>
    %333 = arith.divf %331, %332 : vector<1x32xf32>
    %334 = vector.broadcast %333 : vector<1x32xf32> to vector<16x32xf32>
    %335 = arith.subf %329, %334 : vector<16x32xf32>
    %336 = arith.mulf %335, %335 : vector<16x32xf32>
    %cst_288 = arith.constant dense<0.000000e+00> : vector<32xf32>
    %337 = vector.multi_reduction <add>, %336, %cst_288 [0] : vector<16x32xf32> to vector<32xf32>
    %338 = vector.shape_cast %337 : vector<32xf32> to vector<1x32xf32>
    %cst_289 = arith.constant 1.600000e+01 : f32
    %339 = vector.broadcast %cst_289 : f32 to vector<1x32xf32>
    %340 = arith.divf %338, %339 : vector<1x32xf32>
    %341 = vector.broadcast %333 : vector<1x32xf32> to vector<16x32xf32>
    %342 = arith.subf %329, %341 : vector<16x32xf32>
    %cst_290 = arith.constant 9.99999974E-6 : f32
    %343 = vector.broadcast %cst_290 : f32 to vector<1x32xf32>
    %344 = arith.addf %340, %343 : vector<1x32xf32>
    %345 = math.rsqrt %344 : vector<1x32xf32>
    %346 = vector.broadcast %345 : vector<1x32xf32> to vector<16x32xf32>
    %347 = arith.mulf %342, %346 : vector<16x32xf32>
    %c0_291 = arith.constant 0 : index
    %c0_292 = arith.constant 0 : index
    %348 = vector.load %arg23[%c0_291, %c0_292] : memref<1x32xf32, #tpu.memory_space<vmem>>, vector<1x32xf32>
    %349 = vector.broadcast %348 : vector<1x32xf32> to vector<16x32xf32>
    %350 = arith.mulf %347, %349 : vector<16x32xf32>
    %c0_293 = arith.constant 0 : index
    %c0_294 = arith.constant 0 : index
    %351 = vector.load %arg24[%c0_293, %c0_294] : memref<1x32xf32, #tpu.memory_space<vmem>>, vector<1x32xf32>
    %352 = vector.broadcast %351 : vector<1x32xf32> to vector<16x32xf32>
    %353 = arith.addf %350, %352 : vector<16x32xf32>
    %354 = arith.addf %353, %3 : vector<16x32xf32>
    %c0_295 = arith.constant 0 : index
    %c0_296 = arith.constant 0 : index
    %c0_297 = arith.constant 0 : index
    %355 = vector.load %arg25[%c0_295, %c0_296, %c0_297] : memref<4x32x32xf32, #tpu.memory_space<vmem>>, vector<1x32x32xf32>
    %356 = vector.shape_cast %355 : vector<1x32x32xf32> to vector<32x32xf32>
    %cst_298 = arith.constant dense<0.000000e+00> : vector<16x32xf32>
    %357 = tpu.matmul %354, %356, %cst_298 {dimension_numbers = #tpu.dot_dimension_numbers<[1], [0], [0], [1], [0, 0, 1, 1], [], []>} : vector<16x32xf32>, vector<32x32xf32>, vector<16x32xf32> -> vector<16x32xf32>
    %c0_299 = arith.constant 0 : index
    %c0_300 = arith.constant 0 : index
    %c0_301 = arith.constant 0 : index
    %358 = vector.load %arg26[%c0_299, %c0_300, %c0_301] : memref<4x1x32xf32, #tpu.memory_space<vmem>>, vector<1x1x32xf32>
    %359 = vector.shape_cast %358 : vector<1x1x32xf32> to vector<1x32xf32>
    %360 = vector.broadcast %359 : vector<1x32xf32> to vector<16x32xf32>
    %361 = arith.addf %357, %360 : vector<16x32xf32>
    %cst_302 = arith.constant 0.000000e+00 : f32
    %362 = vector.broadcast %cst_302 : f32 to vector<16x32xf32>
    %363 = arith.maximumf %361, %362 : vector<16x32xf32>
    %c0_303 = arith.constant 0 : index
    %c0_304 = arith.constant 0 : index
    %c0_305 = arith.constant 0 : index
    %364 = vector.load %arg27[%c0_303, %c0_304, %c0_305] : memref<4x32x32xf32, #tpu.memory_space<vmem>>, vector<1x32x32xf32>
    %365 = vector.shape_cast %364 : vector<1x32x32xf32> to vector<32x32xf32>
    %cst_306 = arith.constant dense<0.000000e+00> : vector<16x32xf32>
    %366 = tpu.matmul %354, %365, %cst_306 {dimension_numbers = #tpu.dot_dimension_numbers<[1], [0], [0], [1], [0, 0, 1, 1], [], []>} : vector<16x32xf32>, vector<32x32xf32>, vector<16x32xf32> -> vector<16x32xf32>
    %c0_307 = arith.constant 0 : index
    %c0_308 = arith.constant 0 : index
    %c0_309 = arith.constant 0 : index
    %367 = vector.load %arg28[%c0_307, %c0_308, %c0_309] : memref<4x1x32xf32, #tpu.memory_space<vmem>>, vector<1x1x32xf32>
    %368 = vector.shape_cast %367 : vector<1x1x32xf32> to vector<1x32xf32>
    %369 = vector.broadcast %368 : vector<1x32xf32> to vector<16x32xf32>
    %370 = arith.addf %366, %369 : vector<16x32xf32>
    %371 = arith.negf %370 : vector<16x32xf32>
    %372 = math.exp %371 : vector<16x32xf32>
    %cst_310 = arith.constant 1.000000e+00 : f32
    %373 = vector.broadcast %cst_310 : f32 to vector<16x32xf32>
    %374 = arith.addf %373, %372 : vector<16x32xf32>
    %375 = arith.divf %373, %374 : vector<16x32xf32>
    %376 = arith.mulf %363, %375 : vector<16x32xf32>
    %cst_311 = arith.constant 1.000000e+00 : f32
    %377 = vector.broadcast %cst_311 : f32 to vector<16x32xf32>
    %378 = arith.subf %377, %375 : vector<16x32xf32>
    %379 = arith.mulf %354, %378 : vector<16x32xf32>
    %380 = arith.addf %376, %379 : vector<16x32xf32>
    %c1_312 = arith.constant 1 : index
    %c0_313 = arith.constant 0 : index
    %c0_314 = arith.constant 0 : index
    %381 = vector.load %arg25[%c1_312, %c0_313, %c0_314] : memref<4x32x32xf32, #tpu.memory_space<vmem>>, vector<1x32x32xf32>
    %382 = vector.shape_cast %381 : vector<1x32x32xf32> to vector<32x32xf32>
    %cst_315 = arith.constant dense<0.000000e+00> : vector<16x32xf32>
    %383 = tpu.matmul %380, %382, %cst_315 {dimension_numbers = #tpu.dot_dimension_numbers<[1], [0], [0], [1], [0, 0, 1, 1], [], []>} : vector<16x32xf32>, vector<32x32xf32>, vector<16x32xf32> -> vector<16x32xf32>
    %c1_316 = arith.constant 1 : index
    %c0_317 = arith.constant 0 : index
    %c0_318 = arith.constant 0 : index
    %384 = vector.load %arg26[%c1_316, %c0_317, %c0_318] : memref<4x1x32xf32, #tpu.memory_space<vmem>>, vector<1x1x32xf32>
    %385 = vector.shape_cast %384 : vector<1x1x32xf32> to vector<1x32xf32>
    %386 = vector.broadcast %385 : vector<1x32xf32> to vector<16x32xf32>
    %387 = arith.addf %383, %386 : vector<16x32xf32>
    %cst_319 = arith.constant 0.000000e+00 : f32
    %388 = vector.broadcast %cst_319 : f32 to vector<16x32xf32>
    %389 = arith.maximumf %387, %388 : vector<16x32xf32>
    %c1_320 = arith.constant 1 : index
    %c0_321 = arith.constant 0 : index
    %c0_322 = arith.constant 0 : index
    %390 = vector.load %arg27[%c1_320, %c0_321, %c0_322] : memref<4x32x32xf32, #tpu.memory_space<vmem>>, vector<1x32x32xf32>
    %391 = vector.shape_cast %390 : vector<1x32x32xf32> to vector<32x32xf32>
    %cst_323 = arith.constant dense<0.000000e+00> : vector<16x32xf32>
    %392 = tpu.matmul %380, %391, %cst_323 {dimension_numbers = #tpu.dot_dimension_numbers<[1], [0], [0], [1], [0, 0, 1, 1], [], []>} : vector<16x32xf32>, vector<32x32xf32>, vector<16x32xf32> -> vector<16x32xf32>
    %c1_324 = arith.constant 1 : index
    %c0_325 = arith.constant 0 : index
    %c0_326 = arith.constant 0 : index
    %393 = vector.load %arg28[%c1_324, %c0_325, %c0_326] : memref<4x1x32xf32, #tpu.memory_space<vmem>>, vector<1x1x32xf32>
    %394 = vector.shape_cast %393 : vector<1x1x32xf32> to vector<1x32xf32>
    %395 = vector.broadcast %394 : vector<1x32xf32> to vector<16x32xf32>
    %396 = arith.addf %392, %395 : vector<16x32xf32>
    %397 = arith.negf %396 : vector<16x32xf32>
    %398 = math.exp %397 : vector<16x32xf32>
    %cst_327 = arith.constant 1.000000e+00 : f32
    %399 = vector.broadcast %cst_327 : f32 to vector<16x32xf32>
    %400 = arith.addf %399, %398 : vector<16x32xf32>
    %401 = arith.divf %399, %400 : vector<16x32xf32>
    %402 = arith.mulf %389, %401 : vector<16x32xf32>
    %cst_328 = arith.constant 1.000000e+00 : f32
    %403 = vector.broadcast %cst_328 : f32 to vector<16x32xf32>
    %404 = arith.subf %403, %401 : vector<16x32xf32>
    %405 = arith.mulf %380, %404 : vector<16x32xf32>
    %406 = arith.addf %402, %405 : vector<16x32xf32>
    %c2_329 = arith.constant 2 : index
    %c0_330 = arith.constant 0 : index
    %c0_331 = arith.constant 0 : index
    %407 = vector.load %arg25[%c2_329, %c0_330, %c0_331] : memref<4x32x32xf32, #tpu.memory_space<vmem>>, vector<1x32x32xf32>
    %408 = vector.shape_cast %407 : vector<1x32x32xf32> to vector<32x32xf32>
    %cst_332 = arith.constant dense<0.000000e+00> : vector<16x32xf32>
    %409 = tpu.matmul %406, %408, %cst_332 {dimension_numbers = #tpu.dot_dimension_numbers<[1], [0], [0], [1], [0, 0, 1, 1], [], []>} : vector<16x32xf32>, vector<32x32xf32>, vector<16x32xf32> -> vector<16x32xf32>
    %c2_333 = arith.constant 2 : index
    %c0_334 = arith.constant 0 : index
    %c0_335 = arith.constant 0 : index
    %410 = vector.load %arg26[%c2_333, %c0_334, %c0_335] : memref<4x1x32xf32, #tpu.memory_space<vmem>>, vector<1x1x32xf32>
    %411 = vector.shape_cast %410 : vector<1x1x32xf32> to vector<1x32xf32>
    %412 = vector.broadcast %411 : vector<1x32xf32> to vector<16x32xf32>
    %413 = arith.addf %409, %412 : vector<16x32xf32>
    %cst_336 = arith.constant 0.000000e+00 : f32
    %414 = vector.broadcast %cst_336 : f32 to vector<16x32xf32>
    %415 = arith.maximumf %413, %414 : vector<16x32xf32>
    %c2_337 = arith.constant 2 : index
    %c0_338 = arith.constant 0 : index
    %c0_339 = arith.constant 0 : index
    %416 = vector.load %arg27[%c2_337, %c0_338, %c0_339] : memref<4x32x32xf32, #tpu.memory_space<vmem>>, vector<1x32x32xf32>
    %417 = vector.shape_cast %416 : vector<1x32x32xf32> to vector<32x32xf32>
    %cst_340 = arith.constant dense<0.000000e+00> : vector<16x32xf32>
    %418 = tpu.matmul %406, %417, %cst_340 {dimension_numbers = #tpu.dot_dimension_numbers<[1], [0], [0], [1], [0, 0, 1, 1], [], []>} : vector<16x32xf32>, vector<32x32xf32>, vector<16x32xf32> -> vector<16x32xf32>
    %c2_341 = arith.constant 2 : index
    %c0_342 = arith.constant 0 : index
    %c0_343 = arith.constant 0 : index
    %419 = vector.load %arg28[%c2_341, %c0_342, %c0_343] : memref<4x1x32xf32, #tpu.memory_space<vmem>>, vector<1x1x32xf32>
    %420 = vector.shape_cast %419 : vector<1x1x32xf32> to vector<1x32xf32>
    %421 = vector.broadcast %420 : vector<1x32xf32> to vector<16x32xf32>
    %422 = arith.addf %418, %421 : vector<16x32xf32>
    %423 = arith.negf %422 : vector<16x32xf32>
    %424 = math.exp %423 : vector<16x32xf32>
    %cst_344 = arith.constant 1.000000e+00 : f32
    %425 = vector.broadcast %cst_344 : f32 to vector<16x32xf32>
    %426 = arith.addf %425, %424 : vector<16x32xf32>
    %427 = arith.divf %425, %426 : vector<16x32xf32>
    %428 = arith.mulf %415, %427 : vector<16x32xf32>
    %cst_345 = arith.constant 1.000000e+00 : f32
    %429 = vector.broadcast %cst_345 : f32 to vector<16x32xf32>
    %430 = arith.subf %429, %427 : vector<16x32xf32>
    %431 = arith.mulf %406, %430 : vector<16x32xf32>
    %432 = arith.addf %428, %431 : vector<16x32xf32>
    %c3_346 = arith.constant 3 : index
    %c0_347 = arith.constant 0 : index
    %c0_348 = arith.constant 0 : index
    %433 = vector.load %arg25[%c3_346, %c0_347, %c0_348] : memref<4x32x32xf32, #tpu.memory_space<vmem>>, vector<1x32x32xf32>
    %434 = vector.shape_cast %433 : vector<1x32x32xf32> to vector<32x32xf32>
    %cst_349 = arith.constant dense<0.000000e+00> : vector<16x32xf32>
    %435 = tpu.matmul %432, %434, %cst_349 {dimension_numbers = #tpu.dot_dimension_numbers<[1], [0], [0], [1], [0, 0, 1, 1], [], []>} : vector<16x32xf32>, vector<32x32xf32>, vector<16x32xf32> -> vector<16x32xf32>
    %c3_350 = arith.constant 3 : index
    %c0_351 = arith.constant 0 : index
    %c0_352 = arith.constant 0 : index
    %436 = vector.load %arg26[%c3_350, %c0_351, %c0_352] : memref<4x1x32xf32, #tpu.memory_space<vmem>>, vector<1x1x32xf32>
    %437 = vector.shape_cast %436 : vector<1x1x32xf32> to vector<1x32xf32>
    %438 = vector.broadcast %437 : vector<1x32xf32> to vector<16x32xf32>
    %439 = arith.addf %435, %438 : vector<16x32xf32>
    %cst_353 = arith.constant 0.000000e+00 : f32
    %440 = vector.broadcast %cst_353 : f32 to vector<16x32xf32>
    %441 = arith.maximumf %439, %440 : vector<16x32xf32>
    %c3_354 = arith.constant 3 : index
    %c0_355 = arith.constant 0 : index
    %c0_356 = arith.constant 0 : index
    %442 = vector.load %arg27[%c3_354, %c0_355, %c0_356] : memref<4x32x32xf32, #tpu.memory_space<vmem>>, vector<1x32x32xf32>
    %443 = vector.shape_cast %442 : vector<1x32x32xf32> to vector<32x32xf32>
    %cst_357 = arith.constant dense<0.000000e+00> : vector<16x32xf32>
    %444 = tpu.matmul %432, %443, %cst_357 {dimension_numbers = #tpu.dot_dimension_numbers<[1], [0], [0], [1], [0, 0, 1, 1], [], []>} : vector<16x32xf32>, vector<32x32xf32>, vector<16x32xf32> -> vector<16x32xf32>
    %c3_358 = arith.constant 3 : index
    %c0_359 = arith.constant 0 : index
    %c0_360 = arith.constant 0 : index
    %445 = vector.load %arg28[%c3_358, %c0_359, %c0_360] : memref<4x1x32xf32, #tpu.memory_space<vmem>>, vector<1x1x32xf32>
    %446 = vector.shape_cast %445 : vector<1x1x32xf32> to vector<1x32xf32>
    %447 = vector.broadcast %446 : vector<1x32xf32> to vector<16x32xf32>
    %448 = arith.addf %444, %447 : vector<16x32xf32>
    %449 = arith.negf %448 : vector<16x32xf32>
    %450 = math.exp %449 : vector<16x32xf32>
    %cst_361 = arith.constant 1.000000e+00 : f32
    %451 = vector.broadcast %cst_361 : f32 to vector<16x32xf32>
    %452 = arith.addf %451, %450 : vector<16x32xf32>
    %453 = arith.divf %451, %452 : vector<16x32xf32>
    %454 = arith.mulf %441, %453 : vector<16x32xf32>
    %cst_362 = arith.constant 1.000000e+00 : f32
    %455 = vector.broadcast %cst_362 : f32 to vector<16x32xf32>
    %456 = arith.subf %455, %453 : vector<16x32xf32>
    %457 = arith.mulf %432, %456 : vector<16x32xf32>
    %458 = arith.addf %454, %457 : vector<16x32xf32>
    %c0_363 = arith.constant 0 : index
    %c0_364 = arith.constant 0 : index
    %459 = vector.load %arg29[%c0_363, %c0_364] : memref<16x32xf32, #tpu.memory_space<vmem>>, vector<16x32xf32>
    tpu.vector_store %arg29[%c0_363, %c0_364], %458 {strides = array<i32>} : memref<16x32xf32, #tpu.memory_space<vmem>>, vector<16x32xf32>,
    return
  }
}

module attributes {stable_mosaic.version = 11 : i64} {
  func.func @_bigru_layer_kernel(%arg0: i32, %arg1: memref<16x32xf32, #tpu.memory_space<vmem>>, %arg2: memref<1x32x48xf32, #tpu.memory_space<vmem>>, %arg3: memref<1x1x48xf32, #tpu.memory_space<vmem>>, %arg4: memref<1x16x48xf32, #tpu.memory_space<vmem>>, %arg5: memref<1x1x48xf32, #tpu.memory_space<vmem>>, %arg6: memref<1x8x2x16xf32, #tpu.memory_space<vmem>>, %arg7: memref<8x2x48xf32, #tpu.memory_space<vmem>>) attributes {dimension_semantics = [#tpu.dimension_semantics<parallel>], iteration_bounds = array<i64: 2>, scalar_prefetch = 0 : i64, scratch_operands = 1 : i64, tpu.core_type = #tpu.core_type<tc>, window_params = [{pipeline_mode = #tpu.pipeline_mode<synchronous>, transform_indices = @transform_0, window_bounds = array<i64: 16, 32>}, {transform_indices = @transform_1, window_bounds = array<i64: 1, 32, 48>}, {transform_indices = @transform_2, window_bounds = array<i64: 1, 1, 48>}, {transform_indices = @transform_3, window_bounds = array<i64: 1, 16, 48>}, {transform_indices = @transform_4, window_bounds = array<i64: 1, 1, 48>}, {transform_indices = @transform_5, window_bounds = array<i64: 1, 8, 2, 16>}]} {
    %c1_i32 = arith.constant 1 : i32
    %0 = arith.cmpi eq, %arg0, %c1_i32 : i32
    %c0 = arith.constant 0 : index
    %c0_0 = arith.constant 0 : index
    %1 = vector.load %arg1[%c0, %c0_0] : memref<16x32xf32, #tpu.memory_space<vmem>>, vector<16x32xf32>
    %c0_1 = arith.constant 0 : index
    %c0_2 = arith.constant 0 : index
    %c0_3 = arith.constant 0 : index
    %2 = vector.load %arg2[%c0_1, %c0_2, %c0_3] : memref<1x32x48xf32, #tpu.memory_space<vmem>>, vector<1x32x48xf32>
    %3 = vector.shape_cast %2 : vector<1x32x48xf32> to vector<32x48xf32>
    %cst = arith.constant dense<0.000000e+00> : vector<16x48xf32>
    %4 = tpu.matmul %1, %3, %cst {dimension_numbers = #tpu.dot_dimension_numbers<[1], [0], [0], [1], [0, 0, 1, 1], [], []>} : vector<16x32xf32>, vector<32x48xf32>, vector<16x48xf32> -> vector<16x48xf32>
    %c0_4 = arith.constant 0 : index
    %c0_5 = arith.constant 0 : index
    %c0_6 = arith.constant 0 : index
    %5 = vector.load %arg3[%c0_4, %c0_5, %c0_6] : memref<1x1x48xf32, #tpu.memory_space<vmem>>, vector<1x1x48xf32>
    %6 = vector.shape_cast %5 : vector<1x1x48xf32> to vector<1x48xf32>
    %7 = vector.broadcast %6 : vector<1x48xf32> to vector<16x48xf32>
    %8 = arith.addf %4, %7 : vector<16x48xf32>
    %9 = vector.extract_strided_slice %8 {offsets = [0, 0], sizes = [2, 48], strides = [1, 1]} : vector<16x48xf32> to vector<2x48xf32>
    %c0_7 = arith.constant 0 : index
    %c0_8 = arith.constant 0 : index
    %c0_9 = arith.constant 0 : index
    %10 = vector.load %arg7[%c0_7, %c0_8, %c0_9] : memref<8x2x48xf32, #tpu.memory_space<vmem>>, vector<1x2x48xf32>
    %11 = vector.shape_cast %10 : vector<1x2x48xf32> to vector<2x48xf32>
    %12 = vector.shape_cast %9 : vector<2x48xf32> to vector<1x2x48xf32>
    tpu.vector_store %arg7[%c0_7, %c0_8, %c0_9], %12 {strides = array<i32>} : memref<8x2x48xf32, #tpu.memory_space<vmem>>, vector<1x2x48xf32>,
    %13 = vector.extract_strided_slice %8 {offsets = [2, 0], sizes = [2, 48], strides = [1, 1]} : vector<16x48xf32> to vector<2x48xf32>
    %c1 = arith.constant 1 : index
    %c0_10 = arith.constant 0 : index
    %c0_11 = arith.constant 0 : index
    %14 = vector.load %arg7[%c1, %c0_10, %c0_11] : memref<8x2x48xf32, #tpu.memory_space<vmem>>, vector<1x2x48xf32>
    %15 = vector.shape_cast %14 : vector<1x2x48xf32> to vector<2x48xf32>
    %16 = vector.shape_cast %13 : vector<2x48xf32> to vector<1x2x48xf32>
    tpu.vector_store %arg7[%c1, %c0_10, %c0_11], %16 {strides = array<i32>} : memref<8x2x48xf32, #tpu.memory_space<vmem>>, vector<1x2x48xf32>,
    %17 = vector.extract_strided_slice %8 {offsets = [4, 0], sizes = [2, 48], strides = [1, 1]} : vector<16x48xf32> to vector<2x48xf32>
    %c2 = arith.constant 2 : index
    %c0_12 = arith.constant 0 : index
    %c0_13 = arith.constant 0 : index
    %18 = vector.load %arg7[%c2, %c0_12, %c0_13] : memref<8x2x48xf32, #tpu.memory_space<vmem>>, vector<1x2x48xf32>
    %19 = vector.shape_cast %18 : vector<1x2x48xf32> to vector<2x48xf32>
    %20 = vector.shape_cast %17 : vector<2x48xf32> to vector<1x2x48xf32>
    tpu.vector_store %arg7[%c2, %c0_12, %c0_13], %20 {strides = array<i32>} : memref<8x2x48xf32, #tpu.memory_space<vmem>>, vector<1x2x48xf32>,
    %21 = vector.extract_strided_slice %8 {offsets = [6, 0], sizes = [2, 48], strides = [1, 1]} : vector<16x48xf32> to vector<2x48xf32>
    %c3 = arith.constant 3 : index
    %c0_14 = arith.constant 0 : index
    %c0_15 = arith.constant 0 : index
    %22 = vector.load %arg7[%c3, %c0_14, %c0_15] : memref<8x2x48xf32, #tpu.memory_space<vmem>>, vector<1x2x48xf32>
    %23 = vector.shape_cast %22 : vector<1x2x48xf32> to vector<2x48xf32>
    %24 = vector.shape_cast %21 : vector<2x48xf32> to vector<1x2x48xf32>
    tpu.vector_store %arg7[%c3, %c0_14, %c0_15], %24 {strides = array<i32>} : memref<8x2x48xf32, #tpu.memory_space<vmem>>, vector<1x2x48xf32>,
    %25 = vector.extract_strided_slice %8 {offsets = [8, 0], sizes = [2, 48], strides = [1, 1]} : vector<16x48xf32> to vector<2x48xf32>
    %c4 = arith.constant 4 : index
    %c0_16 = arith.constant 0 : index
    %c0_17 = arith.constant 0 : index
    %26 = vector.load %arg7[%c4, %c0_16, %c0_17] : memref<8x2x48xf32, #tpu.memory_space<vmem>>, vector<1x2x48xf32>
    %27 = vector.shape_cast %26 : vector<1x2x48xf32> to vector<2x48xf32>
    %28 = vector.shape_cast %25 : vector<2x48xf32> to vector<1x2x48xf32>
    tpu.vector_store %arg7[%c4, %c0_16, %c0_17], %28 {strides = array<i32>} : memref<8x2x48xf32, #tpu.memory_space<vmem>>, vector<1x2x48xf32>,
    %29 = vector.extract_strided_slice %8 {offsets = [10, 0], sizes = [2, 48], strides = [1, 1]} : vector<16x48xf32> to vector<2x48xf32>
    %c5 = arith.constant 5 : index
    %c0_18 = arith.constant 0 : index
    %c0_19 = arith.constant 0 : index
    %30 = vector.load %arg7[%c5, %c0_18, %c0_19] : memref<8x2x48xf32, #tpu.memory_space<vmem>>, vector<1x2x48xf32>
    %31 = vector.shape_cast %30 : vector<1x2x48xf32> to vector<2x48xf32>
    %32 = vector.shape_cast %29 : vector<2x48xf32> to vector<1x2x48xf32>
    tpu.vector_store %arg7[%c5, %c0_18, %c0_19], %32 {strides = array<i32>} : memref<8x2x48xf32, #tpu.memory_space<vmem>>, vector<1x2x48xf32>,
    %33 = vector.extract_strided_slice %8 {offsets = [12, 0], sizes = [2, 48], strides = [1, 1]} : vector<16x48xf32> to vector<2x48xf32>
    %c6 = arith.constant 6 : index
    %c0_20 = arith.constant 0 : index
    %c0_21 = arith.constant 0 : index
    %34 = vector.load %arg7[%c6, %c0_20, %c0_21] : memref<8x2x48xf32, #tpu.memory_space<vmem>>, vector<1x2x48xf32>
    %35 = vector.shape_cast %34 : vector<1x2x48xf32> to vector<2x48xf32>
    %36 = vector.shape_cast %33 : vector<2x48xf32> to vector<1x2x48xf32>
    tpu.vector_store %arg7[%c6, %c0_20, %c0_21], %36 {strides = array<i32>} : memref<8x2x48xf32, #tpu.memory_space<vmem>>, vector<1x2x48xf32>,
    %37 = vector.extract_strided_slice %8 {offsets = [14, 0], sizes = [2, 48], strides = [1, 1]} : vector<16x48xf32> to vector<2x48xf32>
    %c7 = arith.constant 7 : index
    %c0_22 = arith.constant 0 : index
    %c0_23 = arith.constant 0 : index
    %38 = vector.load %arg7[%c7, %c0_22, %c0_23] : memref<8x2x48xf32, #tpu.memory_space<vmem>>, vector<1x2x48xf32>
    %39 = vector.shape_cast %38 : vector<1x2x48xf32> to vector<2x48xf32>
    %40 = vector.shape_cast %37 : vector<2x48xf32> to vector<1x2x48xf32>
    tpu.vector_store %arg7[%c7, %c0_22, %c0_23], %40 {strides = array<i32>} : memref<8x2x48xf32, #tpu.memory_space<vmem>>, vector<1x2x48xf32>,
    %cst_24 = arith.constant 0.000000e+00 : f32
    %41 = vector.broadcast %cst_24 : f32 to vector<2x16xf32>
    %c0_i32 = arith.constant 0 : i32
    %c8_i32 = arith.constant 8 : i32
    %42 = arith.addi %c0_i32, %c8_i32 : i32
    %c1_i32_25 = arith.constant 1 : i32
    %43 = scf.for %arg8 = %c0_i32 to %42 step %c1_i32_25 iter_args(%arg9 = %41) -> (vector<2x16xf32>)  : i32 {
      %c7_i32 = arith.constant 7 : i32
      %44 = arith.subi %c7_i32, %arg8 : i32
      %45 = arith.select %0, %44, %arg8 : i32
      %46 = arith.index_cast %45 : i32 to index
      %c0_27 = arith.constant 0 : index
      %c0_28 = arith.constant 0 : index
      %47 = vector.load %arg7[%46, %c0_27, %c0_28] : memref<8x2x48xf32, #tpu.memory_space<vmem>>, vector<1x2x48xf32>
      %48 = vector.shape_cast %47 : vector<1x2x48xf32> to vector<2x48xf32>
      %c0_29 = arith.constant 0 : index
      %c0_30 = arith.constant 0 : index
      %c0_31 = arith.constant 0 : index
      %49 = vector.load %arg4[%c0_29, %c0_30, %c0_31] : memref<1x16x48xf32, #tpu.memory_space<vmem>>, vector<1x16x48xf32>
      %50 = vector.shape_cast %49 : vector<1x16x48xf32> to vector<16x48xf32>
      %cst_32 = arith.constant dense<0.000000e+00> : vector<2x48xf32>
      %51 = tpu.matmul %arg9, %50, %cst_32 {dimension_numbers = #tpu.dot_dimension_numbers<[1], [0], [0], [1], [0, 0, 1, 1], [], []>} : vector<2x16xf32>, vector<16x48xf32>, vector<2x48xf32> -> vector<2x48xf32>
      %c0_33 = arith.constant 0 : index
      %c0_34 = arith.constant 0 : index
      %c0_35 = arith.constant 0 : index
      %52 = vector.load %arg5[%c0_33, %c0_34, %c0_35] : memref<1x1x48xf32, #tpu.memory_space<vmem>>, vector<1x1x48xf32>
      %53 = vector.shape_cast %52 : vector<1x1x48xf32> to vector<1x48xf32>
      %54 = vector.broadcast %53 : vector<1x48xf32> to vector<2x48xf32>
      %55 = arith.addf %51, %54 : vector<2x48xf32>
      %56 = vector.extract_strided_slice %48 {offsets = [0, 0], sizes = [2, 16], strides = [1, 1]} : vector<2x48xf32> to vector<2x16xf32>
      %57 = vector.extract_strided_slice %55 {offsets = [0, 0], sizes = [2, 16], strides = [1, 1]} : vector<2x48xf32> to vector<2x16xf32>
      %58 = arith.addf %56, %57 : vector<2x16xf32>
      %59 = arith.negf %58 : vector<2x16xf32>
      %60 = math.exp %59 : vector<2x16xf32>
      %cst_36 = arith.constant 1.000000e+00 : f32
      %61 = vector.broadcast %cst_36 : f32 to vector<2x16xf32>
      %62 = arith.addf %61, %60 : vector<2x16xf32>
      %63 = arith.divf %61, %62 : vector<2x16xf32>
      %64 = vector.extract_strided_slice %48 {offsets = [0, 16], sizes = [2, 16], strides = [1, 1]} : vector<2x48xf32> to vector<2x16xf32>
      %65 = vector.extract_strided_slice %55 {offsets = [0, 16], sizes = [2, 16], strides = [1, 1]} : vector<2x48xf32> to vector<2x16xf32>
      %66 = arith.addf %64, %65 : vector<2x16xf32>
      %67 = arith.negf %66 : vector<2x16xf32>
      %68 = math.exp %67 : vector<2x16xf32>
      %cst_37 = arith.constant 1.000000e+00 : f32
      %69 = vector.broadcast %cst_37 : f32 to vector<2x16xf32>
      %70 = arith.addf %69, %68 : vector<2x16xf32>
      %71 = arith.divf %69, %70 : vector<2x16xf32>
      %72 = vector.extract_strided_slice %48 {offsets = [0, 32], sizes = [2, 16], strides = [1, 1]} : vector<2x48xf32> to vector<2x16xf32>
      %73 = vector.extract_strided_slice %55 {offsets = [0, 32], sizes = [2, 16], strides = [1, 1]} : vector<2x48xf32> to vector<2x16xf32>
      %74 = arith.mulf %63, %73 : vector<2x16xf32>
      %75 = arith.addf %72, %74 : vector<2x16xf32>
      %76 = math.tanh %75 : vector<2x16xf32>
      %cst_38 = arith.constant 1.000000e+00 : f32
      %77 = vector.broadcast %cst_38 : f32 to vector<2x16xf32>
      %78 = arith.subf %77, %71 : vector<2x16xf32>
      %79 = arith.mulf %78, %76 : vector<2x16xf32>
      %80 = arith.mulf %71, %arg9 : vector<2x16xf32>
      %81 = arith.addf %79, %80 : vector<2x16xf32>
      %c0_39 = arith.constant 0 : index
      %82 = arith.index_cast %45 : i32 to index
      %c0_40 = arith.constant 0 : index
      %c0_41 = arith.constant 0 : index
      %83 = vector.load %arg6[%c0_39, %82, %c0_40, %c0_41] : memref<1x8x2x16xf32, #tpu.memory_space<vmem>>, vector<1x1x2x16xf32>
      %84 = vector.shape_cast %83 : vector<1x1x2x16xf32> to vector<2x16xf32>
      %85 = vector.shape_cast %81 : vector<2x16xf32> to vector<1x1x2x16xf32>
      tpu.vector_store %arg6[%c0_39, %82, %c0_40, %c0_41], %85 {strides = array<i32>} : memref<1x8x2x16xf32, #tpu.memory_space<vmem>>, vector<1x1x2x16xf32>,
      scf.yield %81 : vector<2x16xf32>
    }
    %c8_i32_26 = arith.constant 8 : i32
    return
  }
  func.func @transform_0(%arg0: i32) -> (i32, i32) {
    %c0_i32 = arith.constant 0 : i32
    %c0_i32_0 = arith.constant 0 : i32
    %c0_i32_1 = arith.constant 0 : i32
    return %c0_i32, %c0_i32_0 : i32, i32
  }
  func.func @transform_1(%arg0: i32) -> (i32, i32, i32) {
    %c0_i32 = arith.constant 0 : i32
    %c0_i32_0 = arith.constant 0 : i32
    %c0_i32_1 = arith.constant 0 : i32
    return %arg0, %c0_i32, %c0_i32_0 : i32, i32, i32
  }
  func.func @transform_2(%arg0: i32) -> (i32, i32, i32) {
    %c0_i32 = arith.constant 0 : i32
    %c0_i32_0 = arith.constant 0 : i32
    %c0_i32_1 = arith.constant 0 : i32
    return %arg0, %c0_i32, %c0_i32_0 : i32, i32, i32
  }
  func.func @transform_3(%arg0: i32) -> (i32, i32, i32) {
    %c0_i32 = arith.constant 0 : i32
    %c0_i32_0 = arith.constant 0 : i32
    %c0_i32_1 = arith.constant 0 : i32
    return %arg0, %c0_i32, %c0_i32_0 : i32, i32, i32
  }
  func.func @transform_4(%arg0: i32) -> (i32, i32, i32) {
    %c0_i32 = arith.constant 0 : i32
    %c0_i32_0 = arith.constant 0 : i32
    %c0_i32_1 = arith.constant 0 : i32
    return %arg0, %c0_i32, %c0_i32_0 : i32, i32, i32
  }
  func.func @transform_5(%arg0: i32) -> (i32, i32, i32, i32) {
    %c0_i32 = arith.constant 0 : i32
    %c0_i32_0 = arith.constant 0 : i32
    %c0_i32_1 = arith.constant 0 : i32
    %c0_i32_2 = arith.constant 0 : i32
    return %arg0, %c0_i32, %c0_i32_0, %c0_i32_1 : i32, i32, i32, i32
  }
}

</mosaic_0001>

<bundles_post_ra>
// kernel: cbhg_forward.4
= control target key start
LH: loop header
LB: loop body
LE: loop exit
PB: predicated region body
PF: predicated region fallthrough
CT: control target
= control target key end

     0   :  { %10 = vsyncpa [#allocation4], 0  ;;  %s1016_s0 = inlined_call_operand.vmem [shape: f32[16,32], index: 0, kind: input, shape index: {}]   ;;  %s1017_s1 = inlined_call_operand.hbm [shape: f32[2,32,48], index: 1, kind: input, shape index: {}]   ;;  %s1018_s2 = inlined_call_operand.vmem [shape: f32[2,1,48], index: 2, kind: input, shape index: {}]   ;;  %s1019_s3 = inlined_call_operand.vmem [shape: f32[2,16,48], index: 3, kind: input, shape index: {}]   ;;  %s1020_s4 = inlined_call_operand.hbm [shape: f32[2,1,48], index: 4, kind: input, shape index: {}]   ;;  %s1021_s5 = inlined_call_operand.vmem [shape: f32[2,8,2,16], index: 5, kind: output, shape index: {}]  }
   0x1   :  { %12 = vsyncpa [#allocation4 + $0x1], 0 }
   0x2   :  { %13 = vsyncpa [#allocation6], 0 }
   0x3   :  { %15 = vsyncpa [#allocation6 + $0x1], 0  ;;  %s835_s18 = smov 0   ;;  %s837_s19 = smov 0  }
   0x4   :  { %s839_s20 = smov 0   ;;  %s841_s21 = smov 0  }
   0x5 LB: > { %s854_s22 = sadd.s32 4294967295, %s790_s21   ;;  %s857_s23 = sadd.s32 1, %s790_s21   ;;  %s790_s21 = sphi %s841_s21, %s1029_s21   ;;  %s786_s20 = sphi %s839_s20, %s1028_s20   ;;  %s782_s19 = sphi %s837_s19, %s1027_s19   ;;  %s778_s18 = sphi %s835_s18, %s1026_s18  }
   0x6   : > { %s46_s24 = ssub.s32 %s790_s21, %s857_s23  ;;  %s49_s25 = sadd.s32 1, %s786_s20 }
   0x7   : > { %p47_p0 = scmp.eq.s32.totalorder %s46_s24, 0  ;;  %p56_p1 = scmp.ne.s32.totalorder %s786_s20, %s782_s19 }
   0x8   : > { %p57_p2 = scmp.eq.s32.totalorder %s790_s21, 0  ;;  %p62_p3 = scmp.ne.s32.totalorder %s782_s19, %s778_s18 }
   0x9   : > { %s867_s26 = scalar_select %p47_p0, %s786_s20, %s49_s25  }
   0xa   : > { %p869_p4 = por %p57_p2, %p56_p1  ;;  %p63_p5 = scmp.eq.s32.totalorder %s854_s22, 0 }
   0xb   : > { %p622_p6 = scmp.lt.s32.totalorder %s790_s21, 2  ;;  %s880_s29 = sand.u32 1, %s786_s20  }
   0xc   : > { %p875_p7 = por %p63_p5, %p62_p3  ;;  %s588_s30 = sshll.u32 %s880_s29, 5 }
   0xd   : > { %s604_s6 = sshll.u32 %s790_s21, 5  ;;  %s197_s10 = scalar_lea.vmem [#allocation3], %s588_s30 }
   0xe   : > { %s202_s9 = scalar_lea.hbm %s1017_s1, %s604_s6  ;;  %s205_s11 = sshll.u32 %s197_s10, 4  ;;  %s206_s11 = int_to_ptr.vmem [resolvable:$true] %s205_s11 }
   0xf   : > { %s203_s12 = sshll.u32 %s202_s9, 4  ;;  %p889_p8 = pnand %p622_p6, %p869_p4  ;;  %s204_s12 = int_to_ptr.hbm [resolvable:$true] %s203_s12 }
  0x10   : > { %p591_p9 = scmp.ge.s32.totalorder %s790_s21, 1  ;;  %s194_s14 = scalar_lea.sflag [#allocation4], %s880_s29 }
  0x11   : > { %s684_s15 = sshra.s32 %s204_s12, 4  ;;  %p688_p11 = pneg %p889_p8  ;;  %s685_s15 = int_to_ptr.hbm [resolvable:$true] %s684_s15 }
  0x12   : > { %s686_s16 = scalar_lea.hbm %s685_s15, 32  ;;  %s691_s24 = scalar_lea.hbm %s1017_s1, 64 }
  0x13   : > { %p687_p10 = scmp.ne.s32.totalorder %s685_s15, %s686_s16  ;;  %p692_p0 = scmp.lt.s32.totalorder %s685_s15, %s1017_s1 }
  0x14   : > { %p693_p1 = scmp.lt.s32.totalorder %s691_s24, %s686_s16 }
  0x15   : > { %p689_p12 = pnand %p688_p11, %p687_p10 }
  0x16   : > { %p694_p2 = por %p693_p1, %p692_p0 }
  0x17   : > { %p690_p13 = pneg %p689_p12 }
  0x19   : > { %p695_p3 = pnand %p694_p2, %p690_p13 }
  0x1b   : > { %698 = shalt.err (!%p695_p3)
}
  0x1c   : > { %s800_s30 = smov 128   ;;  %s801_s6 = smov 8  }
  0x1d   : > { %618 = dma.hbm_to_vmem [thread:$0]  (!%p889_p8), %s204_s12, 512, %s206_s11, %s194_s14, %s800_s30, %s800_s30, %s801_s6  }
  0x1e   : > { %p244_p4 = scmp.lt.s32.totalorder %s790_s21, 3  ;;  %s235_s9 = scalar_lea.hbm %s1020_s4, %s790_s21 }
  0x1f   : > { %s237_s15 = sshll.u32 %s235_s9, 4  ;;  %s232_s16 = scalar_lea.vmem [#allocation5], %s880_s29  ;;  %s238_s15 = int_to_ptr.hbm [resolvable:$true] %s237_s15 }
  0x20   : > { %p915_p5 = pnand %p591_p9, %p244_p4  ;;  %s239_s17 = sshll.u32 %s232_s16, 4  ;;  %s240_s17 = int_to_ptr.vmem [resolvable:$true] %s239_s17 }
  0x21   : > { %s230_s18 = scalar_lea.sflag [#allocation6], %s880_s29  ;;  %s714_s24 = sshra.s32 %s238_s15, 4  ;;  %s715_s24 = int_to_ptr.hbm [resolvable:$true] %s714_s24 }
  0x22   : > { %s716_s25 = scalar_lea.hbm %s715_s24, 1  ;;  %s721_s12 = scalar_lea.hbm %s1020_s4, 2 }
  0x23   : > { %p717_p6 = scmp.ne.s32.totalorder %s715_s24, %s716_s25  ;;  %p722_p9 = scmp.lt.s32.totalorder %s715_s24, %s1020_s4 }
  0x24   : > { %p723_p13 = scmp.lt.s32.totalorder %s721_s12, %s716_s25 }
  0x25   : > { %p719_p10 = pnand %p717_p6, %p688_p11 }
  0x26   : > { %p724_p0 = por %p723_p13, %p722_p9 }
  0x27   : > { %p720_p12 = pneg %p719_p10 }
  0x29   : > { %p725_p1 = pnand %p724_p0, %p720_p12 }
  0x2b   : > { %728 = shalt.err (!%p725_p1)
}
  0x2c   : > { %621 = dma.hbm_to_vmem [thread:$0]  (!%p889_p8), %s238_s15, 16, %s240_s17, %s230_s18  }
  0x2d   : > { %248 = sbr.rel (%p915_p5) target bundleno = 893 (0x37d), region = 40  ;;  %s935_s29 = sand.u32 (!%p915_p5), 1, %s782_s19  }
  0x2e   : > { %s592_s30 = sshll.u32 (!%p915_p5), %s935_s29, 5  ;;  %s251_s6 = scalar_lea.sflag (!%p915_p5), [#allocation4], %s935_s29 }
  0x2f   : > { %s254_s7 = scalar_lea.vmem (!%p915_p5), [#allocation3], %s592_s30 }
  0x32   : > { %769 = dma.done.wait (%p875_p7), %s251_s6, 512  }
  0x33   : > { %771 = vsyncadd (%p875_p7), %s251_s6, 4294966784  ;;  %s261_s13 = scalar_lea.sflag [#allocation6], %s935_s29  ;;  %s263_s8 = scalar_lea.vmem [#allocation5], %s935_s29 }
  0x34   : > { %773 = dma.done.wait (%p875_p7), %s261_s13, 16  }
  0x35   : > { %775 = vsyncadd (%p875_p7), %s261_s13, 4294967280  ;;  %p316_p8 = scmp.eq.s32.totalorder %s854_s22, 1  ;;  %p303_p11 = scmp.lt.s32.totalorder %s854_s22, 1  ;;  %v322_v0 = vld [vmem:[%s254_s7 + $0x18] sm:$0xff]  ;;  %v321_v1 = vld [vmem:[%s254_s7 + $0x10] sm:$0xff]  ;;  %vm327_vm0 = vcmask 261120  }
  0x36   : > { %346 = vmatpush.msra.mxu0 %v322_v0  ;;  %607 = vmatpush.msra.mxu1 %v322_v0  ;;  %v320_v2 = vld [vmem:[%s254_s7 + $0x8] sm:$0xff]  ;;  %v319_v3 = vld [vmem:[%s254_s7] sm:$0xff]  ;;  %v317_v4 = vld [vmem:[%s1016_s0] sm:$0xff]  ;;  %vm357_vm1 = vcmask 386048   ;;  %vm360_vm2 = vcmask 388098   ;;  %vm363_vm3 = vcmask 390148  }
  0x37   : > { %s304_s9 = scalar_select %p303_p11, %s854_s22, 1  ;;  %v318_v5 = vld [vmem:[%s1016_s0 + $0x8] sm:$0xff]  ;;  %vm366_vm4 = vcmask 392198   ;;  %v971_v11 = vmov 0.0  }
  0x38   : > { %347 = vmatpush.msra.mxu0 %v321_v1  ;;  %608 = vmatpush.msra.mxu1 %v321_v1  ;;  %s973_s6 = smov 0  }
  0x39   : > { %s605_s10 = sshll.u32 %s304_s9, 4  ;;  %s305_s21 = scalar_lea.vmem %s1018_s2, %s304_s9 }
  0x3a   : > { %s955_s17 = scalar_lea.vmem %s1019_s3, %s605_s10  ;;  %s960_s25 = scalar_lea.vmem %s1021_s5, %s605_s10  ;;  %348 = vmatpush.msra.mxu0 %v320_v2  ;;  %609 = vmatpush.msra.mxu1 %v320_v2  ;;  %v676_v6 = vld [vmem:[%s305_s21] ss:$0 sm:$0xff] }
  0x3c   : > { %349 = vmatpush.msra.mxu0 %v319_v3  ;;  %610 = vmatpush.msra.mxu1 %v319_v3 }
  0x3d   : > { %597 = vmatmul.msk.f32.vlgmr.msra.gmra.mxu0 %vm327_vm0, %v317_v4  ;;  %598 = vmatmul.msk.f32.vlgmr.msra.gmra.mxu1 %vm327_vm0, %v318_v5 }
  0xba   : > { %v351_v7 = vpop.f32.mrf.mxu0  ;;  %v354_v8 = vpop.f32.mrf.mxu1 }
  0xbb   : > { %v352_v9 = vadd.f32 %v676_v6, %v351_v7  ;;  %v355_v10 = vadd.f32 %v676_v6, %v354_v8 }
  0xbd   : > { %358 = vst.msk [vmem:[#allocation2] sm:$0x3] %vm357_vm1, %v352_v9 }
  0xbe   : > { %361 = vst.msk [vmem:[#allocation2] sm:$0xc] %vm360_vm2, %v352_v9 }
  0xbf   : > { %364 = vst.msk [vmem:[#allocation2] sm:$0x30] %vm363_vm3, %v352_v9 }
  0xc0   : > { %367 = vst.msk [vmem:[#allocation2] sm:$0xc0] %vm366_vm4, %v352_v9 }
  0xc1   : > { %369 = vst.msk [vmem:[#allocation2 + $0x8] sm:$0x3] %vm357_vm1, %v355_v10 }
  0xc2   : > { %371 = vst.msk [vmem:[#allocation2 + $0x8] sm:$0xc] %vm360_vm2, %v355_v10 }
  0xc3   : > { %373 = vst.msk [vmem:[#allocation2 + $0x8] sm:$0x30] %vm363_vm3, %v355_v10 }
  0xc4   : > { %375 = vst.msk [vmem:[#allocation2 + $0x8] sm:$0xc0] %vm366_vm4, %v355_v10 }
  0xc5 LB: >> { %v389_v12 = vld [vmem:[%s955_s17 + $0x8] sm:$0xff]  ;;  %v388_v13 = vld [vmem:[%s955_s17] sm:$0xff]  ;;  %s802_s7 = smov 112   ;;  %vm397_vm5 = vcmask 130048   ;;  %s803_s13 = smov 96   ;;  %vm464_vm10 = vcmask 123904   ;;  %s798_s6 = sphi %s973_s6, %s381_s6   ;;  %v794_v11 = vphi %v971_v11, %v458_v11  }
  0xc6   : >> { %414 = vmatpush.msra.mxu0 %v389_v12  ;;  %395 = vrot.lane.b32.xlu0 %v794_v11, %s802_s7  ;;  %v677_v15 = vld [vmem:[%s263_s8] ss:$0 sm:$0xff]  ;;  %s383_s9 = ssub.s32 7, %s798_s6  ;;  %s804_s16 = smov 32  }
  0xc7   : >> { %s1031_s9 = smov (!%p316_p8, %s383_s9), %s798_s6  ;;  %s381_s6 = sadd.s32 1, %s798_s6  }
  0xc8   : >> { %415 = vmatpush.msra.mxu0 %v388_v13  ;;  %s599_s10 = sshll.u32 %s1031_s9, 1  ;;  %p378_p7 = scmp.ge.s32.totalorder %s381_s6, 8  }
  0xc9   : >> { %s386_s15 = scalar_lea.vmem [#allocation2], %s599_s10  ;;  %s463_s18 = scalar_lea.vmem %s960_s25, %s599_s10 }
  0xcb   : >> { %v387_v18 = vld [vmem:[%s386_s15] sm:$0x3] }
 0x138   : >> { %v396_v14 = vpop.permute.xlu0 %395 }
 0x139   : >> { %600 = vmatmul.msk.f32.vlgmr.msra.gmra.mxu0 %vm397_vm5, %v396_v14 }
 0x1b6   : >> { %v417_v16 = vpop.f32.mrf.mxu0 }
 0x1b7   : >> { %v418_v17 = vadd.f32 %v677_v15, %v417_v16 }
 0x1b9   : >> { %441 = vrot.lane.b32.xlu0 %v418_v17, %s803_s13  ;;  %v420_v19 = vadd.f32 %v418_v17, %v387_v18 }
 0x1bb   : >> { %v601_v20 = vmul.f32 -1.442695, %v420_v19 }
 0x1bd   : >> { %678 = vpow2.f32 %v601_v20 }
 0x1c3   : >> { %v679_v21 = vpop.eup %678 }
 0x1c4   : >> { %v424_v22 = vadd.f32 1.0, %v679_v21 }
 0x1c6   : >> { %680 = vrcp.f32 %v424_v22  ;;  %v436_v28 = vand.u32 2147483648, %v424_v22  ;;  %vm430_vm7 = vweird.f32 %v424_v22  ;;  %v434_v29 = vand.u32 2147483647, %v424_v22 }
 0x1c8   : >> { %v437_v31 = vor.u32 1.1754944e-38, %v436_v28  ;;  %vm435_vm9 = vcmp.eq.f32.partialorder %v434_v29, 8.507059e+37 }
 0x1cc   : >> { %v681_v23 = vpop.eup %680 }
 0x1cd   : >> { %v426_v24 = vmul.f32 %v681_v23, %v424_v22  ;;  %vm431_vm6 = vweird.f32 %v681_v23 }
 0x1ce   : >> { %vm432_vm8 = vmor %vm430_vm7, %vm431_vm6 }
 0x1cf   : >> { %v427_v25 = vsub.f32 1.0, %v426_v24 }
 0x1d1   : >> { %v428_v26 = vmul.f32 %v681_v23, %v427_v25 }
 0x1d3   : >> { %v429_v27 = vadd.f32 %v681_v23, %v428_v26 }
 0x1d5   : >> { %v433_v30 = vsel %vm432_vm8, %v681_v23, %v429_v27 }
 0x1d6   : >> { %v438_v33 = vsel %vm435_vm9, %v437_v31, %v433_v30 }
 0x1d7   : >> { %v451_v38 = vsub.f32 1.0, %v438_v33  ;;  %v457_v41 = vmul.f32 %v794_v11, %v438_v33 }
 0x22b   : >> { %v442_v32 = vpop.permute.xlu0 %441 }
 0x22c   : >> { %v444_v34 = vmul.f32 %v442_v32, %v438_v33 }
 0x22e   : >> { %446 = vrot.lane.b32.xlu1 %v444_v34, %s804_s16 }
 0x2a0   : >> { %v447_v35 = vpop.permute.xlu1 %446 }
 0x2a1   : >> { %v449_v36 = vadd.f32 %v447_v35, %v387_v18 }
 0x2a3   : >> { %682 = vtanh.f32 %v449_v36 }
 0x2a9   : >> { %v683_v37 = vpop.eup %682 }
 0x2aa   : >> { %453 = vrot.lane.b32.xlu1 %v683_v37, %s802_s7 }
 0x31c   : >> { %v454_v39 = vpop.permute.xlu1 %453 }
 0x31d   : >> { %v456_v40 = vmul.f32 %v454_v39, %v451_v38 }
 0x31f   : >> { %v458_v11 = vadd.f32 %v457_v41, %v456_v40  }
 0x321   : >> { %460 = vrot.lane.b32.xlu2 %v458_v11, %s802_s7 }
 0x378   : > { %380 = sbr.rel (!%p378_p7) target bundleno = 197 (0xc5), region = 115 }
 0x37b   : >> { %v461_v42 = vpop.permute.xlu2 %460 }
 0x37c   : >> { %465 = vst.msk [vmem:[%s463_s18] sm:$0x3] %vm464_vm10, %v461_v42 }
 0x37d PF: > { %p18_p2 = scmp.ge.s32.totalorder %s857_s23, 4   ;;  %s1026_s18 = smov %s782_s19 }
 0x37e   : > { %s1027_s19 = smov %s786_s20  ;;  %s1028_s20 = smov %s867_s26 }
 0x37f   : > { %s1029_s21 = smov %s857_s23  ;;  %20 = sbr.rel (!%p18_p2) target bundleno = 5 (0x5), region = 126 }
 0x384   :  { %487 = vsyncpa [#allocation4], 1 }
 0x385   :  { %489 = vsyncpa [#allocation4 + $0x1], 1 }
 0x386   :  { %490 = vsyncpa [#allocation6], 1 }
 0x387   :  { %492 = vsyncpa [#allocation6 + $0x1], 1 }

// kernel: cbhg_forward.5
= control target key start
LH: loop header
LB: loop body
LE: loop exit
PB: predicated region body
PF: predicated region fallthrough
CT: control target
= control target key end

     0   :  { %s637_s18 = smov 0   ;;  %s719_s0 = inlined_call_operand.vmem [shape: f32[16,32], index: 0, kind: input, shape index: {}]   ;;  %s720_s1 = inlined_call_operand.vmem [shape: f32[2,32,48], index: 1, kind: input, shape index: {}]   ;;  %s721_s2 = inlined_call_operand.vmem [shape: f32[2,1,48], index: 2, kind: input, shape index: {}]   ;;  %s722_s3 = inlined_call_operand.vmem [shape: f32[2,16,48], index: 3, kind: input, shape index: {}]   ;;  %s723_s4 = inlined_call_operand.vmem [shape: f32[2,1,48], index: 4, kind: input, shape index: {}]   ;;  %s724_s5 = inlined_call_operand.vmem [shape: f32[2,8,2,16], index: 5, kind: output, shape index: {}]  }
   0x1 LB: > { %s643_s19 = sadd.s32 4294967295, %s594_s18   ;;  %p524_p0 = scmp.ge.s32.totalorder %s594_s18, 1  ;;  %s594_s18 = sphi %s637_s18, %s15_s18  }
   0x2   : > { %p213_p1 = scmp.lt.s32.totalorder %s594_s18, 3 }
   0x4   : > { %p214_p2 = pnand %p524_p0, %p213_p1 }
   0x5   : > { %p252_p3 = scmp.lt.s32.totalorder (!%p214_p2), %s643_s19, 1  ;;  %p273_p4 = scmp.eq.s32.totalorder (!%p214_p2), %s643_s19, 1 }
   0x6   : > { %217 = sbr.rel (%p214_p2) target bundleno = 855 (0x357), region = 40  ;;  %s683_s17 = smov (!%p214_p2), 0  }
   0xb   : > { %s650_s20 = scalar_select %p252_p3, %s643_s19, 1  ;;  %v274_v4 = vld [vmem:[%s719_s0] sm:$0xff]  ;;  %vm284_vm0 = vcmask 261120   ;;  %v275_v5 = vld [vmem:[%s719_s0 + $0x8] sm:$0xff]  ;;  %vm314_vm1 = vcmask 386048   ;;  %vm317_vm2 = vcmask 388098  }
   0xc   : > { %vm320_vm3 = vcmask 390148   ;;  %vm323_vm4 = vcmask 392198   ;;  %v681_v11 = vmov 0.0  }
   0xd   : > { %s538_s21 = sshll.u32 %s650_s20, 5  ;;  %s539_s22 = sshll.u32 %s650_s20, 4 }
   0xe   : > { %s256_s25 = scalar_lea.vmem %s720_s1, %s538_s21  ;;  %s660_s28 = scalar_lea.vmem %s722_s3, %s539_s22 }
   0xf   : > { %s267_s6 = scalar_lea.vmem %s723_s4, %s650_s20  ;;  %s669_s9 = scalar_lea.vmem %s724_s5, %s539_s22  ;;  %v279_v0 = vld [vmem:[%s256_s25 + $0x18] sm:$0xff]  ;;  %v278_v1 = vld [vmem:[%s256_s25 + $0x10] sm:$0xff]  ;;  %v277_v2 = vld [vmem:[%s256_s25 + $0x8] sm:$0xff] }
  0x10   : > { %303 = vmatpush.msra.mxu0 %v279_v0  ;;  %541 = vmatpush.msra.mxu1 %v279_v0  ;;  %s259_s12 = scalar_lea.vmem %s721_s2, %s650_s20  ;;  %v276_v3 = vld [vmem:[%s256_s25] sm:$0xff] }
  0x11   : > { %v572_v6 = vld [vmem:[%s259_s12] ss:$0 sm:$0xff] }
  0x12   : > { %304 = vmatpush.msra.mxu0 %v278_v1  ;;  %542 = vmatpush.msra.mxu1 %v278_v1 }
  0x14   : > { %305 = vmatpush.msra.mxu0 %v277_v2  ;;  %543 = vmatpush.msra.mxu1 %v277_v2 }
  0x16   : > { %306 = vmatpush.msra.mxu0 %v276_v3  ;;  %544 = vmatpush.msra.mxu1 %v276_v3 }
  0x17   : > { %531 = vmatmul.msk.f32.vlgmr.msra.gmra.mxu0 %vm284_vm0, %v274_v4  ;;  %532 = vmatmul.msk.f32.vlgmr.msra.gmra.mxu1 %vm284_vm0, %v275_v5 }
  0x94   : > { %v308_v7 = vpop.f32.mrf.mxu0  ;;  %v311_v8 = vpop.f32.mrf.mxu1 }
  0x95   : > { %v309_v9 = vadd.f32 %v572_v6, %v308_v7  ;;  %v312_v10 = vadd.f32 %v572_v6, %v311_v8 }
  0x97   : > { %315 = vst.msk [vmem:[#allocation2] sm:$0x3] %vm314_vm1, %v309_v9 }
  0x98   : > { %318 = vst.msk [vmem:[#allocation2] sm:$0xc] %vm317_vm2, %v309_v9 }
  0x99   : > { %321 = vst.msk [vmem:[#allocation2] sm:$0x30] %vm320_vm3, %v309_v9 }
  0x9a   : > { %324 = vst.msk [vmem:[#allocation2] sm:$0xc0] %vm323_vm4, %v309_v9 }
  0x9b   : > { %326 = vst.msk [vmem:[#allocation2 + $0x8] sm:$0x3] %vm314_vm1, %v312_v10 }
  0x9c   : > { %328 = vst.msk [vmem:[#allocation2 + $0x8] sm:$0xc] %vm317_vm2, %v312_v10 }
  0x9d   : > { %330 = vst.msk [vmem:[#allocation2 + $0x8] sm:$0x30] %vm320_vm3, %v312_v10 }
  0x9e   : > { %332 = vst.msk [vmem:[#allocation2 + $0x8] sm:$0xc0] %vm323_vm4, %v312_v10 }
  0x9f LB: >> { %v346_v12 = vld [vmem:[%s660_s28 + $0x8] sm:$0xff]  ;;  %v345_v13 = vld [vmem:[%s660_s28] sm:$0xff]  ;;  %s604_s21 = smov 112   ;;  %vm354_vm5 = vcmask 130048   ;;  %s605_s24 = smov 96   ;;  %vm421_vm10 = vcmask 123904   ;;  %s602_s17 = sphi %s683_s17, %s338_s17   ;;  %v598_v11 = vphi %v681_v11, %v415_v11  }
  0xa0   : >> { %371 = vmatpush.msra.mxu0 %v346_v12  ;;  %352 = vrot.lane.b32.xlu0 %v598_v11, %s604_s21  ;;  %v573_v15 = vld [vmem:[%s267_s6] ss:$0 sm:$0xff]  ;;  %s340_s25 = ssub.s32 7, %s602_s17  ;;  %s606_s29 = smov 32  }
  0xa1   : >> { %s726_s25 = smov (!%p273_p4, %s340_s25), %s602_s17  ;;  %s338_s17 = sadd.s32 1, %s602_s17  }
  0xa2   : >> { %372 = vmatpush.msra.mxu0 %v345_v13  ;;  %s533_s26 = sshll.u32 %s726_s25, 1  ;;  %p335_p5 = scmp.ge.s32.totalorder %s338_s17, 8  }
  0xa3   : >> { %s343_s27 = scalar_lea.vmem [#allocation2], %s533_s26  ;;  %s420_s30 = scalar_lea.vmem %s669_s9, %s533_s26 }
  0xa5   : >> { %v344_v18 = vld [vmem:[%s343_s27] sm:$0x3] }
 0x112   : >> { %v353_v14 = vpop.permute.xlu0 %352 }
 0x113   : >> { %534 = vmatmul.msk.f32.vlgmr.msra.gmra.mxu0 %vm354_vm5, %v353_v14 }
 0x190   : >> { %v374_v16 = vpop.f32.mrf.mxu0 }
 0x191   : >> { %v375_v17 = vadd.f32 %v573_v15, %v374_v16 }
 0x193   : >> { %398 = vrot.lane.b32.xlu0 %v375_v17, %s605_s24  ;;  %v377_v19 = vadd.f32 %v375_v17, %v344_v18 }
 0x195   : >> { %v535_v20 = vmul.f32 -1.442695, %v377_v19 }
 0x197   : >> { %574 = vpow2.f32 %v535_v20 }
 0x19d   : >> { %v575_v21 = vpop.eup %574 }
 0x19e   : >> { %v381_v22 = vadd.f32 1.0, %v575_v21 }
 0x1a0   : >> { %576 = vrcp.f32 %v381_v22  ;;  %v393_v28 = vand.u32 2147483648, %v381_v22  ;;  %vm387_vm7 = vweird.f32 %v381_v22  ;;  %v391_v29 = vand.u32 2147483647, %v381_v22 }
 0x1a2   : >> { %v394_v31 = vor.u32 1.1754944e-38, %v393_v28  ;;  %vm392_vm9 = vcmp.eq.f32.partialorder %v391_v29, 8.507059e+37 }
 0x1a6   : >> { %v577_v23 = vpop.eup %576 }
 0x1a7   : >> { %v383_v24 = vmul.f32 %v577_v23, %v381_v22  ;;  %vm388_vm6 = vweird.f32 %v577_v23 }
 0x1a8   : >> { %vm389_vm8 = vmor %vm387_vm7, %vm388_vm6 }
 0x1a9   : >> { %v384_v25 = vsub.f32 1.0, %v383_v24 }
 0x1ab   : >> { %v385_v26 = vmul.f32 %v577_v23, %v384_v25 }
 0x1ad   : >> { %v386_v27 = vadd.f32 %v577_v23, %v385_v26 }
 0x1af   : >> { %v390_v30 = vsel %vm389_vm8, %v577_v23, %v386_v27 }
 0x1b0   : >> { %v395_v33 = vsel %vm392_vm9, %v394_v31, %v390_v30 }
 0x1b1   : >> { %v408_v38 = vsub.f32 1.0, %v395_v33  ;;  %v414_v41 = vmul.f32 %v598_v11, %v395_v33 }
 0x205   : >> { %v399_v32 = vpop.permute.xlu0 %398 }
 0x206   : >> { %v401_v34 = vmul.f32 %v399_v32, %v395_v33 }
 0x208   : >> { %403 = vrot.lane.b32.xlu1 %v401_v34, %s606_s29 }
 0x27a   : >> { %v404_v35 = vpop.permute.xlu1 %403 }
 0x27b   : >> { %v406_v36 = vadd.f32 %v404_v35, %v344_v18 }
 0x27d   : >> { %578 = vtanh.f32 %v406_v36 }
 0x283   : >> { %v579_v37 = vpop.eup %578 }
 0x284   : >> { %410 = vrot.lane.b32.xlu1 %v579_v37, %s604_s21 }
 0x2f6   : >> { %v411_v39 = vpop.permute.xlu1 %410 }
 0x2f7   : >> { %v413_v40 = vmul.f32 %v411_v39, %v408_v38 }
 0x2f9   : >> { %v415_v11 = vadd.f32 %v414_v41, %v413_v40  }
 0x2fb   : >> { %417 = vrot.lane.b32.xlu2 %v415_v11, %s604_s21 }
 0x352   : > { %337 = sbr.rel (!%p335_p5) target bundleno = 159 (0x9f), region = 95 }
 0x355   : >> { %v418_v42 = vpop.permute.xlu2 %417 }
 0x356   : >> { %422 = vst.msk [vmem:[%s420_s30] sm:$0x3] %vm421_vm10, %v418_v42 }
 0x357 PF: > { %s15_s18 = sadd.s32 1, %s594_s18  }
 0x358   : > { %p12_p6 = scmp.ge.s32.totalorder %s15_s18, 4  }
 0x35a   :  { %14 = sbr.rel (!%p12_p6) target bundleno = 1 (0x1), region = 106 }

// kernel: cbhg_forward.3
= control target key start
LH: loop header
LB: loop body
LE: loop exit
PB: predicated region body
PF: predicated region fallthrough
CT: control target
= control target key end

     0   :  { %s2781_s6 = smov 1   ;;  %s2782_s10 = smov 2   ;;  %s3288_s0 = inlined_call_operand.smem [shape: u32[30], index: -1, kind: input, shape index: {}] }
   0x1   :  { %s2839_s5 = sld [smem:[%s3288_s0]]   ;;  %s2783_s14 = smov 3  }
   0x2   :  { %s2844_s9 = sld [smem:[%s3288_s0 + %s2781_s6]]   ;;  %s2784_s18 = smov 4  }
   0x3   :  { %s2849_s13 = sld [smem:[%s3288_s0 + %s2782_s10]]   ;;  %s2785_s22 = smov 5  }
   0x4   :  { %s2854_s17 = sld [smem:[%s3288_s0 + %s2783_s14]]   ;;  %s2786_s26 = smov 6  }
   0x5   :  { %s2859_s21 = sld [smem:[%s3288_s0 + %s2784_s18]]   ;;  %s2787_s30 = smov 7  }
   0x6   :  { %s2864_s25 = sld [smem:[%s3288_s0 + %s2785_s22]]   ;;  %s2788_s4 = smov 8  }
   0x7   :  { %s2869_s29 = sld [smem:[%s3288_s0 + %s2786_s26]]   ;;  %s2789_s10 = smov 9  }
   0x8   :  { %s2874_s3 = sld [smem:[%s3288_s0 + %s2787_s30]]   ;;  %s2790_s15 = smov 10  }
   0x9   :  { %3291 = sst [smem:[#allocation38_spill]] %s2849_s13  ;;  %s2791_s20 = smov 11  }
   0xa   :  { %3292 = sst [smem:[#allocation39_spill]] %s2854_s17  ;;  %s2792_s26 = smov 12  }
   0xb   :  { %3293 = sst [smem:[#allocation40_spill]] %s2859_s21  ;;  %s2793_s1 = smov 13  }
   0xc   :  { %s2879_s8 = sld [smem:[%s3288_s0 + %s2788_s4]]   ;;  %s2794_s7 = smov 14  }
   0xd   :  { %3294 = sst [smem:[#allocation41_spill]] %s2869_s29  ;;  %s2796_s22 = smov 16  }
   0xe   :  { %3295 = sst [smem:[#allocation42_spill]] %s2874_s3  ;;  %s2797_s28 = smov 17  }
   0xf   :  { %s2884_s14 = sld [smem:[%s3288_s0 + %s2789_s10]]  }
  0x10   :  { %s2889_s19 = sld [smem:[%s3288_s0 + %s2790_s15]]   ;;  %s2795_s15 = smov 15  }
  0x11   :  { %s2894_s24 = sld [smem:[%s3288_s0 + %s2791_s20]]  }
  0x12   :  { %3296 = sst [smem:[#allocation43_spill]] %s2879_s8 }
  0x13   :  { %s2899_s30 = sld [smem:[%s3288_s0 + %s2792_s26]]  }
  0x14   :  { %s2904_s6 = sld [smem:[%s3288_s0 + %s2793_s1]]  }
  0x15   :  { %s2909_s12 = sld [smem:[%s3288_s0 + %s2794_s7]]   ;;  %s2798_s7 = smov 18  }
  0x16   :  { %3297 = sst [smem:[#allocation44_spill]] %s2889_s19 }
  0x17   :  { %3298 = sst [smem:[#allocation45_spill]] %s2894_s24 }
  0x18   :  { %s2914_s20 = sld [smem:[%s3288_s0 + %s2795_s15]]   ;;  %s2799_s15 = smov 19  }
  0x19   :  { %3299 = sst [smem:[#allocation46_spill]] %s2899_s30 }
  0x1a   :  { %s2919_s27 = sld [smem:[%s3288_s0 + %s2796_s22]]   ;;  %s2800_s22 = smov 20  }
  0x1b   :  { %3300 = sst [smem:[#allocation47_spill]] %s2909_s12 }
  0x1c   :  { %s2924_s4 = sld [smem:[%s3288_s0 + %s2797_s28]]   ;;  %s2801_s28 = smov 21  }
  0x1d   :  { %s2929_s12 = sld [smem:[%s3288_s0 + %s2798_s7]]   ;;  %s2802_s7 = smov 22  }
  0x1e   :  { %s2934_s30 = sld [smem:[%s3288_s0 + %s2799_s15]]   ;;  %s2803_s15 = smov 23  }
  0x1f   :  { %s2939_s24 = sld [smem:[%s3288_s0 + %s2800_s22]]   ;;  %s2804_s22 = smov 24  }
  0x20   :  { %s2944_s19 = sld [smem:[%s3288_s0 + %s2801_s28]]   ;;  %s2805_s28 = smov 25  }
  0x21   :  { %s2949_s8 = sld [smem:[%s3288_s0 + %s2802_s7]]   ;;  %s2806_s7 = smov 26  }
  0x22   :  { %s2954_s3 = sld [smem:[%s3288_s0 + %s2803_s15]]   ;;  %s2807_s15 = smov 27  }
  0x23   :  { %s2959_s29 = sld [smem:[%s3288_s0 + %s2804_s22]]   ;;  %s2808_s22 = smov 28  }
  0x24   :  { %s2964_s21 = sld [smem:[%s3288_s0 + %s2805_s28]]   ;;  %s2809_s28 = smov 29  }
  0x25   :  { %s2969_s17 = sld [smem:[%s3288_s0 + %s2806_s7]]  }
  0x26   :  { %s2974_s13 = sld [smem:[%s3288_s0 + %s2807_s15]]  }
  0x27   :  { %3301 = sst [smem:[#allocation48_spill]] %s2949_s8 }
  0x28   :  { %s2984_s8 = sld [smem:[%s3288_s0 + %s2809_s28]]  }
  0x29   :  { %3302 = sst [smem:[#allocation49_spill]] %s2959_s29 }
  0x2a   :  { %s2979_s29 = sld [smem:[%s3288_s0 + %s2808_s22]]  }
  0x2b   :  { %64 = vsyncpa [#allocation4], 0 }
  0x2c   :  { %65 = vsyncpa [#allocation6], 0 }
  0x2d   :  { %66 = vsyncpa [#allocation9], 0 }
  0x2e   :  { %67 = vsyncpa [#allocation12], 0 }
  0x2f   :  { %68 = vsyncpa [#allocation15], 0 }
  0x30   :  { %69 = vsyncpa [#allocation18], 0 }
  0x31   :  { %70 = vsyncpa [#allocation21], 0 }
  0x32   :  { %71 = vsyncpa [#allocation24], 0 }
  0x33   :  { %72 = vsyncpa [#allocation27], 0  ;;  %s90_s7 = sshll.u32 %s2844_s9, 4  ;;  %s2810_s10 = smov [#allocation5]   ;;  %s91_s7 = int_to_ptr.hbm [resolvable:$true] %s90_s7 }
  0x34   :  { %s92_s11 = sshll.u32 %s2810_s10, 4  ;;  %s128_s0 = sshll.u32 %s2884_s14, 4  ;;  %s93_s11 = int_to_ptr.vmem [resolvable:$true] %s92_s11  ;;  %s129_s0 = int_to_ptr.hbm [resolvable:$true] %s128_s0 }
  0x35   :  { %s2355_s15 = sshra.s32 %s91_s7, 4  ;;  %s2359_s18 = scalar_lea.hbm %s2844_s9, 32  ;;  %s2356_s15 = int_to_ptr.hbm [resolvable:$true] %s2355_s15 }
  0x36   :  { %s2357_s16 = scalar_lea.hbm %s2356_s15, 32  ;;  %p2360_p1 = scmp.lt.s32.totalorder %s2356_s15, %s2844_s9 }
  0x37   :  { %p2358_p0 = scmp.ne.s32.totalorder %s2356_s15, %s2357_s16  ;;  %p2361_p2 = scmp.lt.s32.totalorder %s2359_s18, %s2357_s16 }
  0x39   :  { %p2362_p3 = por %p2361_p2, %p2360_p1 }
  0x3b   :  { %p2363_p4 = pnand %p2362_p3, %p2358_p0 }
  0x3d   :  { %2366 = shalt.err (!%p2363_p4)
}
  0x3e   :  { %s2811_s22 = smov 128   ;;  %s2812_s23 = smov 8  }
  0x3f   :  { %98 = dma.hbm_to_vmem [thread:$0]  %s91_s7, 512, %s93_s11, [#allocation6], %s2811_s22, %s2811_s22, %s2812_s23  }
  0x40   :  { %s2813_s26 = smov [#allocation8]   ;;  %s163_s1 = sshll.u32 %s2914_s20, 4  ;;  %s164_s1 = int_to_ptr.hbm [resolvable:$true] %s163_s1 }
  0x41   :  { %s130_s28 = sshll.u32 %s2813_s26, 4  ;;  %s2379_s9 = sshra.s32 %s129_s0, 4  ;;  %s131_s28 = int_to_ptr.vmem [resolvable:$true] %s130_s28  ;;  %s2380_s9 = int_to_ptr.hbm [resolvable:$true] %s2379_s9 }
  0x42   :  { %s2381_s2 = scalar_lea.hbm %s2380_s9, 48  ;;  %s2383_s10 = scalar_lea.hbm %s2884_s14, 48 }
  0x43   :  { %p2382_p5 = scmp.ne.s32.totalorder %s2380_s9, %s2381_s2  ;;  %p2384_p6 = scmp.lt.s32.totalorder %s2380_s9, %s2884_s14 }
  0x44   :  { %p2385_p7 = scmp.lt.s32.totalorder %s2383_s10, %s2381_s2 }
  0x46   :  { %p2386_p8 = por %p2385_p7, %p2384_p6 }
  0x48   :  { %p2387_p9 = pnand %p2386_p8, %p2382_p5 }
  0x4a   :  { %2390 = shalt.err (!%p2387_p9)
}
  0x4b   :  { %136 = dma.hbm_to_vmem [thread:$0]  %s129_s0, 768, %s131_s28, [#allocation9], %s2811_s22, %s2811_s22, %s2812_s23  }
  0x4c   :  { %s184_s7 = sshll.u32 %s2924_s4, 4  ;;  %s2814_s11 = smov [#allocation11]   ;;  %s3000_s7 = int_to_ptr.hbm [resolvable:$true] %s184_s7 }
  0x4d   :  { %s165_s15 = sshll.u32 %s2814_s11, 4  ;;  %s2403_s16 = sshra.s32 %s164_s1, 4  ;;  %s166_s15 = int_to_ptr.vmem [resolvable:$true] %s165_s15  ;;  %s2404_s16 = int_to_ptr.hbm [resolvable:$true] %s2403_s16 }
  0x4e   :  { %s2405_s14 = scalar_lea.hbm %s2404_s16, 1  ;;  %s2407_s18 = scalar_lea.hbm %s2914_s20, 1 }
  0x4f   :  { %p2406_p10 = scmp.ne.s32.totalorder %s2404_s16, %s2405_s14  ;;  %p2408_p11 = scmp.lt.s32.totalorder %s2404_s16, %s2914_s20 }
  0x50   :  { %p2409_p12 = scmp.lt.s32.totalorder %s2407_s18, %s2405_s14 }
  0x52   :  { %p2410_p13 = por %p2409_p12, %p2408_p11 }
  0x54   :  { %p2411_p0 = pnand %p2410_p13, %p2406_p10 }
  0x56   :  { %2414 = shalt.err (!%p2411_p0)
}
  0x57   :  { %168 = dma.hbm_to_vmem [thread:$0]  %s164_s1, 16, %s166_s15, [#allocation12]  }
  0x58   :  { %s2815_s0 = smov [#allocation14]   ;;  %s209_s28 = sshll.u32 %s2934_s30, 4  ;;  %s210_s28 = int_to_ptr.hbm [resolvable:$true] %s209_s28 }
  0x59   :  { %s186_s26 = sshll.u32 %s2815_s0, 4  ;;  %s2427_s9 = sshra.s32 %s3000_s7, 4  ;;  %s187_s26 = int_to_ptr.vmem [resolvable:$true] %s186_s26  ;;  %s2428_s9 = int_to_ptr.hbm [resolvable:$true] %s2427_s9 }
  0x5a   :  { %s2429_s2 = scalar_lea.hbm %s2428_s9, 192  ;;  %s2431_s10 = scalar_lea.hbm %s2924_s4, 192 }
  0x5b   :  { %p2430_p1 = scmp.ne.s32.totalorder %s2428_s9, %s2429_s2  ;;  %p2432_p2 = scmp.lt.s32.totalorder %s2428_s9, %s2924_s4 }
  0x5c   :  { %p2433_p3 = scmp.lt.s32.totalorder %s2431_s10, %s2429_s2 }
  0x5e   :  { %p2434_p4 = por %p2433_p3, %p2432_p2 }
  0x60   :  { %p2435_p5 = pnand %p2434_p4, %p2430_p1 }
  0x62   :  { %2438 = shalt.err (!%p2435_p5)
}
  0x63   :  { %192 = dma.hbm_to_vmem [thread:$0]  %s3000_s7, 3072, %s187_s26, [#allocation15], %s2811_s22, %s2811_s22, %s2812_s23  }
  0x64   :  { %s230_s20 = sshll.u32 %s2944_s19, 4  ;;  %s2816_s1 = smov [#allocation17]   ;;  %s3013_s20 = int_to_ptr.hbm [resolvable:$true] %s230_s20 }
  0x65   :  { %s211_s11 = sshll.u32 %s2816_s1, 4  ;;  %s2451_s15 = sshra.s32 %s210_s28, 4  ;;  %s212_s11 = int_to_ptr.vmem [resolvable:$true] %s211_s11  ;;  %s2452_s15 = int_to_ptr.hbm [resolvable:$true] %s2451_s15 }
  0x66   :  { %s2453_s4 = scalar_lea.hbm %s2452_s15, 1  ;;  %s2455_s16 = scalar_lea.hbm %s2934_s30, 1 }
  0x67   :  { %p2454_p6 = scmp.ne.s32.totalorder %s2452_s15, %s2453_s4  ;;  %p2456_p7 = scmp.lt.s32.totalorder %s2452_s15, %s2934_s30 }
  0x68   :  { %p2457_p8 = scmp.lt.s32.totalorder %s2455_s16, %s2453_s4 }
  0x6a   :  { %p2458_p9 = por %p2457_p8, %p2456_p7 }
  0x6c   :  { %p2459_p10 = pnand %p2458_p9, %p2454_p6 }
  0x6e   :  { %2462 = shalt.err (!%p2459_p10)
}
  0x6f   :  { %214 = dma.hbm_to_vmem [thread:$0]  %s210_s28, 16, %s212_s11, [#allocation18]  }
  0x70   :  { %s2817_s7 = smov [#allocation20]   ;;  %s255_s18 = sshll.u32 %s2954_s3, 4  ;;  %s256_s18 = int_to_ptr.hbm [resolvable:$true] %s255_s18 }
  0x71   :  { %s232_s14 = sshll.u32 %s2817_s7, 4  ;;  %s2475_s0 = sshra.s32 %s3013_s20, 4  ;;  %s233_s14 = int_to_ptr.vmem [resolvable:$true] %s232_s14  ;;  %s2476_s0 = int_to_ptr.hbm [resolvable:$true] %s2475_s0 }
  0x72   :  { %s2477_s26 = scalar_lea.hbm %s2476_s0, 48  ;;  %s2479_s9 = scalar_lea.hbm %s2944_s19, 48 }
  0x73   :  { %p2478_p11 = scmp.ne.s32.totalorder %s2476_s0, %s2477_s26  ;;  %p2480_p12 = scmp.lt.s32.totalorder %s2476_s0, %s2944_s19 }
  0x74   :  { %p2481_p13 = scmp.lt.s32.totalorder %s2479_s9, %s2477_s26 }
  0x76   :  { %p2482_p0 = por %p2481_p13, %p2480_p12 }
  0x78   :  { %p2483_p1 = pnand %p2482_p0, %p2478_p11 }
  0x7a   :  { %2486 = shalt.err (!%p2483_p1)
}
  0x7b   :  { %238 = dma.hbm_to_vmem [thread:$0]  %s3013_s20, 768, %s233_s14, [#allocation21], %s2811_s22, %s2811_s22, %s2812_s23  }
  0x7c   :  { %s276_s30 = sshll.u32 %s2964_s21, 4  ;;  %s2818_s28 = smov [#allocation23]   ;;  %s3026_s30 = int_to_ptr.hbm [resolvable:$true] %s276_s30 }
  0x7d   :  { %s257_s2 = sshll.u32 %s2818_s28, 4  ;;  %s2499_s10 = sshra.s32 %s256_s18, 4  ;;  %s258_s2 = int_to_ptr.vmem [resolvable:$true] %s257_s2  ;;  %s2500_s10 = int_to_ptr.hbm [resolvable:$true] %s2499_s10 }
  0x7e   :  { %s2501_s19 = scalar_lea.hbm %s2500_s10, 1  ;;  %s2503_s1 = scalar_lea.hbm %s2954_s3, 1 }
  0x7f   :  { %p2502_p2 = scmp.ne.s32.totalorder %s2500_s10, %s2501_s19  ;;  %p2504_p3 = scmp.lt.s32.totalorder %s2500_s10, %s2954_s3 }
  0x80   :  { %p2505_p4 = scmp.lt.s32.totalorder %s2503_s1, %s2501_s19 }
  0x82   :  { %p2506_p5 = por %p2505_p4, %p2504_p3 }
  0x84   :  { %p2507_p6 = pnand %p2506_p5, %p2502_p2 }
  0x86   :  { %2510 = shalt.err (!%p2507_p6)
}
  0x87   :  { %260 = dma.hbm_to_vmem [thread:$0]  %s256_s18, 16, %s258_s2, [#allocation24]  }
  0x88   :  { %s2819_s20 = smov [#allocation26]   ;;  %s77_s15 = sshll.u32 %s2839_s5, 4  ;;  %s3031_s15 = int_to_ptr.hbm [resolvable:$true] %s77_s15 }
  0x89   :  { %s278_s11 = sshll.u32 %s2819_s20, 4  ;;  %s2523_s4 = sshra.s32 %s3026_s30, 4  ;;  %s279_s11 = int_to_ptr.vmem [resolvable:$true] %s278_s11  ;;  %s2524_s4 = int_to_ptr.hbm [resolvable:$true] %s2523_s4 }
  0x8a   :  { %s2525_s16 = scalar_lea.hbm %s2524_s4, 128  ;;  %s2527_s3 = scalar_lea.hbm %s2964_s21, 128 }
  0x8b   :  { %p2526_p7 = scmp.ne.s32.totalorder %s2524_s4, %s2525_s16  ;;  %p2528_p8 = scmp.lt.s32.totalorder %s2524_s4, %s2964_s21 }
  0x8c   :  { %p2529_p9 = scmp.lt.s32.totalorder %s2527_s3, %s2525_s16 }
  0x8e   :  { %p2530_p10 = por %p2529_p9, %p2528_p8 }
  0x90   :  { %p2531_p11 = pnand %p2530_p10, %p2526_p7 }
  0x92   :  { %2534 = shalt.err (!%p2531_p11)
}
  0x93   :  { %284 = dma.hbm_to_vmem [thread:$0]  %s3026_s30, 2048, %s279_s11, [#allocation27], %s2811_s22, %s2811_s22, %s2812_s23  }
  0x94   :  { %s109_s7 = sshll.u32 %s2864_s25, 4  ;;  %s2820_s14 = smov [#allocation3]   ;;  %s3041_s7 = int_to_ptr.hbm [resolvable:$true] %s109_s7 }
  0x95   :  { %s79_s18 = sshll.u32 %s2820_s14, 4  ;;  %s2547_s21 = sshra.s32 %s3031_s15, 4  ;;  %s80_s18 = int_to_ptr.vmem [resolvable:$true] %s79_s18  ;;  %s2548_s21 = int_to_ptr.hbm [resolvable:$true] %s2547_s21 }
  0x96   :  { %s2549_s0 = scalar_lea.hbm %s2548_s21, 16  ;;  %s2551_s26 = scalar_lea.hbm %s2839_s5, 16 }
  0x97   :  { %p2550_p12 = scmp.ne.s32.totalorder %s2548_s21, %s2549_s0  ;;  %p2552_p13 = scmp.lt.s32.totalorder %s2548_s21, %s2839_s5 }
  0x98   :  { %p2553_p0 = scmp.lt.s32.totalorder %s2551_s26, %s2549_s0 }
  0x9a   :  { %p2554_p1 = por %p2553_p0, %p2552_p13 }
  0x9c   :  { %p2555_p2 = pnand %p2554_p1, %p2550_p12 }
  0x9e   :  { %2558 = shalt.err (!%p2555_p2)
}
  0x9f   :  { %85 = dma.hbm_to_vmem [thread:$0]  %s3031_s15, 256, %s80_s18, [#allocation4], %s2811_s22, %s2811_s22, %s2812_s23  }
  0xa0   :  { %s2821_s9 = smov [#allocation7]   ;;  %s147_s28 = sshll.u32 %s2904_s6, 4  ;;  %s3051_s28 = int_to_ptr.hbm [resolvable:$true] %s147_s28 }
  0xa1   :  { %s111_s30 = sshll.u32 %s2821_s9, 4  ;;  %s2571_s5 = sshra.s32 %s3041_s7, 4  ;;  %s112_s30 = int_to_ptr.vmem [resolvable:$true] %s111_s30  ;;  %s2572_s5 = int_to_ptr.hbm [resolvable:$true] %s2571_s5 }
  0xa2   :  { %s2573_s2 = scalar_lea.hbm %s2572_s5, 32  ;;  %s2575_s10 = scalar_lea.hbm %s2864_s25, 32 }
  0xa3   :  { %p2574_p3 = scmp.ne.s32.totalorder %s2572_s5, %s2573_s2  ;;  %p2576_p4 = scmp.lt.s32.totalorder %s2572_s5, %s2864_s25 }
  0xa4   :  { %p2577_p5 = scmp.lt.s32.totalorder %s2575_s10, %s2573_s2 }
  0xa6   :  { %p2578_p6 = por %p2577_p5, %p2576_p4 }
  0xa8   :  { %p2579_p7 = pnand %p2578_p6, %p2574_p3 }
  0xaa   :  { %2582 = shalt.err (!%p2579_p7)
}
  0xab   :  { %117 = dma.hbm_to_vmem [thread:$0]  %s3041_s7, 512, %s112_s30, [#allocation6], %s2811_s22, %s2811_s22, %s2812_s23  }
  0xac   :  { %s174_s19 = sshll.u32 %s2919_s27, 4  ;;  %s2822_s1 = smov [#allocation10]   ;;  %s175_s19 = int_to_ptr.hbm [resolvable:$true] %s174_s19 }
  0xad   :  { %s149_s20 = sshll.u32 %s2822_s1, 4  ;;  %s2595_s11 = sshra.s32 %s3051_s28, 4  ;;  %s150_s20 = int_to_ptr.vmem [resolvable:$true] %s149_s20  ;;  %s2596_s11 = int_to_ptr.hbm [resolvable:$true] %s2595_s11 }
  0xae   :  { %s2597_s25 = scalar_lea.hbm %s2596_s11, 64  ;;  %s2599_s15 = scalar_lea.hbm %s2904_s6, 64 }
  0xaf   :  { %p2598_p8 = scmp.ne.s32.totalorder %s2596_s11, %s2597_s25  ;;  %p2600_p9 = scmp.lt.s32.totalorder %s2596_s11, %s2904_s6 }
  0xb0   :  { %p2601_p10 = scmp.lt.s32.totalorder %s2599_s15, %s2597_s25 }
  0xb2   :  { %p2602_p11 = por %p2601_p10, %p2600_p9 }
  0xb4   :  { %p2603_p12 = pnand %p2602_p11, %p2598_p8 }
  0xb6   :  { %2606 = shalt.err (!%p2603_p12)
}
  0xb7   :  { %155 = dma.hbm_to_vmem [thread:$0]  %s3051_s28, 1024, %s150_s20, [#allocation9], %s2811_s22, %s2811_s22, %s2812_s23  }
  0xb8   :  { %s2823_s4 = smov [#allocation13]   ;;  %s198_s3 = sshll.u32 %s2929_s12, 4  ;;  %s199_s3 = int_to_ptr.hbm [resolvable:$true] %s198_s3 }
  0xb9   :  { %s176_s16 = sshll.u32 %s2823_s4, 4  ;;  %s2619_s7 = sshra.s32 %s175_s19, 4  ;;  %s177_s16 = int_to_ptr.vmem [resolvable:$true] %s176_s16  ;;  %s2620_s7 = int_to_ptr.hbm [resolvable:$true] %s2619_s7 }
  0xba   :  { %s2621_s6 = scalar_lea.hbm %s2620_s7, 1  ;;  %s2623_s14 = scalar_lea.hbm %s2919_s27, 1 }
  0xbb   :  { %p2622_p13 = scmp.ne.s32.totalorder %s2620_s7, %s2621_s6  ;;  %p2624_p0 = scmp.lt.s32.totalorder %s2620_s7, %s2919_s27 }
  0xbc   :  { %p2625_p1 = scmp.lt.s32.totalorder %s2623_s14, %s2621_s6 }
  0xbe   :  { %p2626_p2 = por %p2625_p1, %p2624_p0 }
  0xc0   :  { %p2627_p3 = pnand %p2626_p2, %p2622_p13 }
  0xc2   :  { %2630 = shalt.err (!%p2627_p3)
}
  0xc3   :  { %179 = dma.hbm_to_vmem [thread:$0]  %s175_s19, 16, %s177_s16, [#allocation12]  }
  0xc4   :  { %s220_s18 = sshll.u32 %s2939_s24, 4  ;;  %s2824_s21 = smov [#allocation16]   ;;  %s221_s18 = int_to_ptr.hbm [resolvable:$true] %s220_s18 }
  0xc5   :  { %s200_s0 = sshll.u32 %s2824_s21, 4  ;;  %s2643_s26 = sshra.s32 %s199_s3, 4  ;;  %s201_s0 = int_to_ptr.vmem [resolvable:$true] %s200_s0  ;;  %s2644_s26 = int_to_ptr.hbm [resolvable:$true] %s2643_s26 }
  0xc6   :  { %s2645_s9 = scalar_lea.hbm %s2644_s26, 1  ;;  %s2647_s30 = scalar_lea.hbm %s2929_s12, 1 }
  0xc7   :  { %p2646_p4 = scmp.ne.s32.totalorder %s2644_s26, %s2645_s9  ;;  %p2648_p5 = scmp.lt.s32.totalorder %s2644_s26, %s2929_s12 }
  0xc8   :  { %p2649_p6 = scmp.lt.s32.totalorder %s2647_s30, %s2645_s9 }
  0xca   :  { %p2650_p7 = por %p2649_p6, %p2648_p5 }
  0xcc   :  { %p2651_p8 = pnand %p2650_p7, %p2646_p4 }
  0xce   :  { %2654 = shalt.err (!%p2651_p8)
}
  0xcf   :  { %203 = dma.hbm_to_vmem [thread:$0]  %s199_s3, 16, %s201_s0, [#allocation15]  }
  0xd0   :  { %s3303_s27 = sld [smem:[#allocation48_spill]]  ;;  %s2825_s28 = smov [#allocation19]  }
  0xd1   :  { %s222_s5 = sshll.u32 %s2825_s28, 4  ;;  %s2667_s10 = sshra.s32 %s221_s18, 4  ;;  %s223_s5 = int_to_ptr.vmem [resolvable:$true] %s222_s5  ;;  %s2668_s10 = int_to_ptr.hbm [resolvable:$true] %s2667_s10 }
  0xd2   :  { %s2669_s19 = scalar_lea.hbm %s2668_s10, 1  ;;  %s2671_s1 = scalar_lea.hbm %s2939_s24, 1 }
  0xd3   :  { %p2670_p9 = scmp.ne.s32.totalorder %s2668_s10, %s2669_s19  ;;  %p2672_p10 = scmp.lt.s32.totalorder %s2668_s10, %s2939_s24 }
  0xd4   :  { %p2673_p11 = scmp.lt.s32.totalorder %s2671_s1, %s2669_s19 }
  0xd6   :  { %s244_s2 = sshll.u32 %s3303_s27, 4  ;;  %p2674_p12 = por %p2673_p11, %p2672_p10  ;;  %s245_s2 = int_to_ptr.hbm [resolvable:$true] %s244_s2 }
  0xd8   :  { %p2675_p13 = pnand %p2674_p12, %p2670_p9 }
  0xda   :  { %2678 = shalt.err (!%p2675_p13)
}
  0xdb   :  { %225 = dma.hbm_to_vmem [thread:$0]  %s221_s18, 16, %s223_s5, [#allocation18]  }
  0xdc   :  { %s3304_s12 = sld [smem:[#allocation49_spill]]  ;;  %s2826_s11 = smov [#allocation22]  }
  0xdd   :  { %s246_s25 = sshll.u32 %s2826_s11, 4  ;;  %s2691_s15 = sshra.s32 %s245_s2, 4  ;;  %s247_s25 = int_to_ptr.vmem [resolvable:$true] %s246_s25  ;;  %s2692_s15 = int_to_ptr.hbm [resolvable:$true] %s2691_s15 }
  0xde   :  { %s2693_s4 = scalar_lea.hbm %s2692_s15, 1  ;;  %s2695_s16 = scalar_lea.hbm %s3303_s27, 1 }
  0xdf   :  { %p2694_p0 = scmp.ne.s32.totalorder %s2692_s15, %s2693_s4  ;;  %p2696_p1 = scmp.lt.s32.totalorder %s2692_s15, %s3303_s27 }
  0xe0   :  { %p2697_p2 = scmp.lt.s32.totalorder %s2695_s16, %s2693_s4 }
  0xe2   :  { %s266_s20 = sshll.u32 %s3304_s12, 4  ;;  %p2698_p3 = por %p2697_p2, %p2696_p1  ;;  %s267_s20 = int_to_ptr.hbm [resolvable:$true] %s266_s20 }
  0xe4   :  { %p2699_p4 = pnand %p2698_p3, %p2694_p0 }
  0xe6   :  { %2702 = shalt.err (!%p2699_p4)
}
  0xe7   :  { %249 = dma.hbm_to_vmem [thread:$0]  %s245_s2, 16, %s247_s25, [#allocation21]  }
  0xe8   :  { %s2827_s24 = smov [#allocation25]   ;;  %s291_s7 = sshll.u32 %s2974_s13, 4  ;;  %s292_s7 = int_to_ptr.hbm [resolvable:$true] %s291_s7 }
  0xe9   :  { %s268_s3 = sshll.u32 %s2827_s24, 4  ;;  %s2715_s6 = sshra.s32 %s267_s20, 4  ;;  %s269_s3 = int_to_ptr.vmem [resolvable:$true] %s268_s3  ;;  %s2716_s6 = int_to_ptr.hbm [resolvable:$true] %s2715_s6 }
  0xea   :  { %s2717_s14 = scalar_lea.hbm %s2716_s6, 1  ;;  %s2719_s18 = scalar_lea.hbm %s3304_s12, 1 }
  0xeb   :  { %p2718_p5 = scmp.ne.s32.totalorder %s2716_s6, %s2717_s14  ;;  %p2720_p6 = scmp.lt.s32.totalorder %s2716_s6, %s3304_s12 }
  0xec   :  { %p2721_p7 = scmp.lt.s32.totalorder %s2719_s18, %s2717_s14 }
  0xee   :  { %p2722_p8 = por %p2721_p7, %p2720_p6 }
  0xf0   :  { %p2723_p9 = pnand %p2722_p8, %p2718_p5 }
  0xf2   :  { %2726 = shalt.err (!%p2723_p9)
}
  0xf3   :  { %271 = dma.hbm_to_vmem [thread:$0]  %s267_s20, 16, %s269_s3, [#allocation24]  }
  0xf4   :  { %s2828_s21 = smov [#allocation28]   ;;  %s2739_s26 = sshra.s32 %s292_s7, 4  ;;  %s2740_s26 = int_to_ptr.hbm [resolvable:$true] %s2739_s26 }
  0xf5   :  { %s293_s0 = sshll.u32 %s2828_s21, 4  ;;  %s2741_s9 = scalar_lea.hbm %s2740_s26, 128  ;;  %s294_s0 = int_to_ptr.vmem [resolvable:$true] %s293_s0 }
  0xf6   :  { %p2742_p10 = scmp.ne.s32.totalorder %s2740_s26, %s2741_s9  ;;  %s2743_s30 = scalar_lea.hbm %s2974_s13, 128 }
  0xf7   :  { %p2744_p11 = scmp.lt.s32.totalorder %s2740_s26, %s2974_s13  ;;  %p2745_p12 = scmp.lt.s32.totalorder %s2743_s30, %s2741_s9 }
  0xf9   :  { %p2746_p13 = por %p2745_p12, %p2744_p11 }
  0xfb   :  { %p2747_p0 = pnand %p2746_p13, %p2742_p10 }
  0xfd   :  { %2750 = shalt.err (!%p2747_p0)
}
  0xfe   :  { %299 = dma.hbm_to_vmem [thread:$0]  %s292_s7, 2048, %s294_s0, [#allocation27], %s2811_s22, %s2811_s22, %s2812_s23  }
  0xff   :  { %2763 = dma.done.wait [#allocation4], 256  }
 0x100   :  { %2764 = vsyncadd [#allocation4], 4294967040 }
 0x101   :  { %2765 = dma.done.wait [#allocation6], 1024  }
 0x102   :  { %2766 = vsyncadd [#allocation6], 4294966272 }
 0x103   :  { %2767 = dma.done.wait [#allocation9], 1792  }
 0x104   :  { %2768 = vsyncadd [#allocation9], 4294965504 }
 0x105   :  { %2769 = dma.done.wait [#allocation12], 32  }
 0x106   :  { %2770 = vsyncadd [#allocation12], 4294967264 }
 0x107   :  { %2771 = dma.done.wait [#allocation15], 3088  }
 0x108   :  { %2772 = vsyncadd [#allocation15], 4294964208 }
 0x109   :  { %2773 = dma.done.wait [#allocation18], 32  }
 0x10a   :  { %2774 = vsyncadd [#allocation18], 4294967264 }
 0x10b   :  { %2775 = dma.done.wait [#allocation21], 784  }
 0x10c   :  { %2776 = vsyncadd [#allocation21], 4294966512 }
 0x10d   :  { %2777 = dma.done.wait [#allocation24], 32  }
 0x10e   :  { %2778 = vsyncadd [#allocation24], 4294967264 }
 0x10f   :  { %2779 = dma.done.wait [#allocation27], 4096  }
 0x110   :  { %2780 = vsyncadd [#allocation27], 4294963200  ;;  %v381_v0 = vld [vmem:[#allocation5 + $0x18] sm:$0xff]  ;;  %v380_v1 = vld [vmem:[#allocation5 + $0x10] sm:$0xff]  ;;  %vm370_vm0 = vcmask 261120   ;;  %s3305_s13 = sld [smem:[#allocation38_spill]] }
 0x111   :  { %404 = vmatpush.msra.mxu0 %v381_v0  ;;  %v379_v2 = vld [vmem:[#allocation5 + $0x8] sm:$0xff]  ;;  %v378_v3 = vld [vmem:[#allocation5] sm:$0xff]  ;;  %v376_v4 = vld [vmem:[#allocation3] sm:$0xff]  ;;  %vm372_vm1 = vcmask 257024   ;;  %v2829_v6 = vmov 0.0   ;;  %v2830_v7 = vmov 16.0  }
 0x112   :  { %v377_v5 = vld [vmem:[#allocation3 + $0x8] sm:$0xff]  ;;  %371 = vst.msk [vmem:[#allocation2] sm:$0xff] %vm370_vm0, %v2829_v6  ;;  %2307 = vrcp.f32 %v2830_v7  ;;  %vm415_vm2 = vcmask 130048   ;;  %s3306_s22 = sld [smem:[#allocation39_spill]]  ;;  %v594_v56 = vld [vmem:[#allocation7 + $0x10] sm:$0xff] }
 0x113   :  { %405 = vmatpush.msra.mxu0 %v380_v1  ;;  %373 = vst.msk [vmem:[#allocation2 + $0x8] sm:$0xf] %vm372_vm1, %v2829_v6  ;;  %v490_v44 = vld [vmem:[#allocation14 + $0x48] sm:$0xff]  ;;  %v489_v46 = vld [vmem:[#allocation14 + $0x40] sm:$0xff]  ;;  %s3307_s23 = sld [smem:[#allocation40_spill]] }
 0x114   :  { %374 = vst.msk [vmem:[#allocation2 + $0x10] sm:$0xff] %vm370_vm0, %v2829_v6  ;;  %v553_v45 = vld [vmem:[#allocation14 + $0x88] sm:$0xff]  ;;  %511 = vmatpush.msra.mxu1 %v490_v44  ;;  %2229 = vmatpush.msra.mxu2 %v490_v44  ;;  %v552_v48 = vld [vmem:[#allocation14 + $0x80] sm:$0xff]  ;;  %s3308_s27 = sld [smem:[#allocation41_spill]] }
 0x115   :  { %406 = vmatpush.msra.mxu0 %v379_v2  ;;  %375 = vst.msk [vmem:[#allocation2 + $0x18] sm:$0xf] %vm372_vm1, %v2829_v6  ;;  %574 = vmatpush.msra.mxu3 %v553_v45  ;;  %v485_v53 = vld [vmem:[#allocation14 + $0x8] sm:$0xff]  ;;  %v484_v54 = vld [vmem:[#allocation14] sm:$0xff]  ;;  %s3309_s28 = sld [smem:[#allocation42_spill]] }
 0x116   :  { %v2281_v9 = vld [vmem:[%s3305_s13] ss:$0 sm:$0xff]  ;;  %512 = vmatpush.msra.mxu1 %v489_v46  ;;  %2230 = vmatpush.msra.mxu2 %v489_v46  ;;  %v595_v55 = vld [vmem:[#allocation7 + $0x18] sm:$0xff]  ;;  %s3310_s5 = sld [smem:[#allocation43_spill]] }
 0x117   :  { %407 = vmatpush.msra.mxu0 %v378_v3  ;;  %575 = vmatpush.msra.mxu3 %v552_v48  ;;  %s3311_s2 = sld [smem:[#allocation44_spill]] }
 0x118   :  { %2149 = vmatmul.msk.f32.vlgmr.msra.gmra.mxu0 %vm370_vm0, %v376_v4  ;;  %v2308_v10 = vpop.eup %2307  ;;  %540 = vmatpush.msrb.mxu2 %v485_v53  ;;  %v2282_v58 = vld [vmem:[%s3306_s22] ss:$0 sm:$0xff]  ;;  %s3312_s10 = sld [smem:[#allocation45_spill]] }
 0x119   :  { %v426_v12 = vmul.f32 16.0, %v2308_v10  ;;  %vm430_vm3 = vweird.f32 %v2308_v10  ;;  %616 = vmatpush.msrb.mxu1 %v595_v55  ;;  %v2283_v62 = vld [vmem:[%s3307_s23] ss:$0 sm:$0xff]  ;;  %s3313_s19 = sld [smem:[#allocation46_spill]] }
 0x11a   :  { %541 = vmatpush.msrb.mxu2 %v484_v54  ;;  %s3314_s1 = sld [smem:[#allocation47_spill]] }
 0x11b   :  { %v427_v17 = vsub.f32 1.0, %v426_v12  ;;  %617 = vmatpush.msrb.mxu1 %v594_v56 }
 0x11d   :  { %v428_v20 = vmul.f32 %v2308_v10, %v427_v17 }
 0x11f   :  { %v429_v23 = vadd.f32 %v2308_v10, %v428_v20 }
 0x120   :  { %2150 = vmatmul.msk.f32.gmra.mxu0 %vm370_vm0, %v377_v5 }
 0x121   :  { %v3095_v26 = vsel %vm430_vm3, %v2308_v10, %v429_v23 }
 0x195   :  { %v409_v8 = vpop.f32.mrf.mxu0 }
 0x196   :  { %v410_v11 = vadd.f32 %v2281_v9, %v409_v8 }
 0x198   :  { %v416_v15 = vsel %vm415_vm2, %v410_v11, 0.0 }
 0x19d   :  { %v412_v13 = vpop.f32.mrf.mxu0 }
 0x19e   :  { %v413_v14 = vadd.f32 %v2281_v9, %v412_v13  ;;  %v590_v9 = vld [vmem:[#allocation7 + $0x8] sm:$0xff] }
 0x1a0   :  { %v417_v16 = vsel %vm415_vm2, %v413_v14, 0.0 }
 0x1a1   :  { %v418_v18 = vadd.f32 %v417_v16, %v416_v15  ;;  %v589_v16 = vld [vmem:[#allocation7] sm:$0xff] }
 0x1a3   :  { %v419_v19 = vrot.slane %v418_v18, 4 }
 0x1a5   :  { %v420_v21 = vadd.f32 %v419_v19, %v418_v18 }
 0x1a7   :  { %v421_v22 = vrot.slane %v420_v21, 2 }
 0x1a9   :  { %v422_v24 = vadd.f32 %v421_v22, %v420_v21 }
 0x1ab   :  { %v423_v25 = vrot.slane %v422_v24, 1 }
 0x1ad   :  { %v424_v27 = vadd.f32 %v423_v25, %v422_v24 }
 0x1af   :  { %v432_v28 = vmul.f32 %v3095_v26, %v424_v27 }
 0x1b1   :  { %v433_v29 = vsub.f32 %v410_v11, %v432_v28  ;;  %v434_v30 = vsub.f32 %v413_v14, %v432_v28 }
 0x1b3   :  { %v435_v31 = vmul.f32 %v433_v29, %v433_v29  ;;  %v436_v32 = vmul.f32 %v434_v30, %v434_v30 }
 0x1b5   :  { %v437_v33 = vsel %vm415_vm2, %v435_v31, 0.0  ;;  %v438_v34 = vsel %vm415_vm2, %v436_v32, 0.0 }
 0x1b6   :  { %v439_v35 = vadd.f32 %v438_v34, %v437_v33  ;;  %v2284_v33 = vld [vmem:[%s3308_s27] ss:$0 sm:$0xff] }
 0x1b8   :  { %v440_v36 = vrot.slane %v439_v35, 4 }
 0x1ba   :  { %v441_v37 = vadd.f32 %v440_v36, %v439_v35 }
 0x1bc   :  { %v442_v38 = vrot.slane %v441_v37, 2 }
 0x1be   :  { %v443_v39 = vadd.f32 %v442_v38, %v441_v37 }
 0x1c0   :  { %v444_v40 = vrot.slane %v443_v39, 1 }
 0x1c2   :  { %v445_v41 = vadd.f32 %v444_v40, %v443_v39 }
 0x1c4   :  { %v446_v42 = vmul.f32 %v445_v41, %v3095_v26 }
 0x1c6   :  { %v447_v43 = vadd.f32 1e-05, %v446_v42 }
 0x1c8   :  { %2309 = vrsqrt.f32 %v447_v43  ;;  %vm454_vm5 = vweird.f32 %v447_v43 }
 0x1ce   :  { %v2310_v47 = vpop.eup %2309 }
 0x1cf   :  { %v449_v49 = vmul.f32 %v2310_v47, %v447_v43  ;;  %vm455_vm4 = vweird.f32 %v2310_v47 }
 0x1d0   :  { %vm456_vm6 = vmor %vm454_vm5, %vm455_vm4 }
 0x1d1   :  { %v450_v50 = vmul.f32 %v2310_v47, %v449_v49 }
 0x1d3   :  { %v451_v51 = vmul.f32 0.5, %v450_v50 }
 0x1d5   :  { %v452_v52 = vsub.f32 1.5, %v451_v51 }
 0x1d7   :  { %v453_v57 = vmul.f32 %v2310_v47, %v452_v52 }
 0x1d9   :  { %v457_v59 = vsel %vm456_vm6, %v2310_v47, %v453_v57 }
 0x1da   :  { %v458_v60 = vmul.f32 %v457_v59, %v433_v29  ;;  %v459_v61 = vmul.f32 %v457_v59, %v434_v30 }
 0x1dc   :  { %v464_v63 = vmul.f32 %v2282_v58, %v458_v60  ;;  %v465_v0 = vmul.f32 %v2282_v58, %v459_v61 }
 0x1de   :  { %v470_v1 = vadd.f32 %v2283_v62, %v464_v63  ;;  %v471_v2 = vadd.f32 %v2283_v62, %v465_v0  ;;  %v722_v0 = vld [vmem:[#allocation14 + $0x18] sm:$0xff] }
 0x1df   :  { %743 = vmatpush.msrb.mxu3 %v722_v0 }
 0x1e0   :  { %v472_v3 = vmax.f32 %v470_v1, 0.0  ;;  %v473_v4 = vmax.f32 %v471_v2, 0.0  ;;  %v721_v1 = vld [vmem:[#allocation14 + $0x10] sm:$0xff]  ;;  %v757_v2 = vld [vmem:[#allocation14 + $0x58] sm:$0xff] }
 0x1e1   :  { %778 = vmatpush.msrb.mxu0 %v757_v2  ;;  %744 = vmatpush.msrb.mxu3 %v721_v1  ;;  %v2287_v1 = vld [vmem:[%s3311_s2] ss:$0 sm:$0xff] }
 0x1e2   :  { %474 = vst.msk [vmem:[#allocation2 + $0x2] sm:$0xff] %vm415_vm2, %v472_v3 }
 0x1e3   :  { %475 = vst.msk [vmem:[#allocation2 + $0x12] sm:$0xff] %vm415_vm2, %v473_v4 }
 0x1e9   :  { %v476_v5 = vld [vmem:[#allocation2 + $0x1] sm:$0xff] }
 0x1ea   :  { %v477_v6 = vld [vmem:[#allocation2 + $0x11] sm:$0xff]  ;;  %v478_v7 = vmax.f32 %v472_v3, %v476_v5 }
 0x1eb   :  { %v479_v8 = vmax.f32 %v473_v4, %v477_v6  ;;  %v756_v5 = vld [vmem:[#allocation14 + $0x50] sm:$0xff] }
 0x1ec   :  { %480 = vst.msk [vmem:[#allocation2 + $0x2] sm:$0xff] %vm415_vm2, %v478_v7  ;;  %v791_v6 = vld [vmem:[#allocation14 + $0x90] sm:$0xff]  ;;  %779 = vmatpush.msrb.mxu0 %v756_v5 }
 0x1ed   :  { %481 = vst.msk [vmem:[#allocation2 + $0x12] sm:$0xff] %vm415_vm2, %v479_v8 }
 0x1f3   :  { %v482_v10 = vld [vmem:[#allocation2 + $0x1] sm:$0xff] }
 0x1f4   :  { %v486_v11 = vld [vmem:[#allocation2 + $0x2] sm:$0xff]  ;;  %v483_v13 = vld [vmem:[#allocation2 + $0x11] sm:$0xff] }
 0x1f5   :  { %v549_v12 = vld [vmem:[#allocation2 + $0x3] sm:$0xff]  ;;  %2151 = vmatmul.msk.f32.vlgmr.msra.gmra.mxu1 %vm415_vm2, %v486_v11  ;;  %v487_v14 = vld [vmem:[#allocation2 + $0x12] sm:$0xff] }
 0x1f6   :  { %585 = vst.msk [vmem:[#allocation2 + $0x2] sm:$0xff] %vm415_vm2, %v472_v3  ;;  %v550_v15 = vld [vmem:[#allocation2 + $0x13] sm:$0xff]  ;;  %2155 = vmatmul.msk.f32.vlgmr.msra.gmra.mxu3 %vm415_vm2, %v549_v12  ;;  %2152 = vmatmul.msk.f32.vlgmr.msra.gmra.mxu2 %vm415_vm2, %v487_v14  ;;  %v834_v11 = vld [vmem:[#allocation8 + $0x18] sm:$0xff] }
 0x1f7   :  { %586 = vst.msk [vmem:[#allocation2 + $0x12] sm:$0xff] %vm415_vm2, %v473_v4  ;;  %645 = vmatpush.msra.mxu2 %v590_v9  ;;  %v792_v4 = vld [vmem:[#allocation14 + $0x98] sm:$0xff] }
 0x1f8   :  { %813 = vmatpush.msra.mxu1 %v792_v4  ;;  %v829_v12 = vld [vmem:[#allocation8 + $0x8] sm:$0xff] }
 0x1f9   :  { %646 = vmatpush.msra.mxu2 %v589_v16  ;;  %884 = vmatpush.msra.mxu3 %v829_v12 }
 0x1fa   :  { %814 = vmatpush.msra.mxu1 %v791_v6 }
 0x1fd   :  { %v591_v17 = vld [vmem:[#allocation2 + $0x2] sm:$0xff] }
 0x1fe   :  { %2156 = vmatmul.msk.f32.gmra.mxu3 %vm415_vm2, %v550_v15  ;;  %2157 = vmatmul.msk.f32.vlgmr.msrb.gmra.mxu1 %vm415_vm2, %v591_v17  ;;  %v592_v18 = vld [vmem:[#allocation2 + $0x12] sm:$0xff]  ;;  %v587_v19 = vld [vmem:[#allocation2 + $0x1] sm:$0xff]  ;;  %v2285_v15 = vld [vmem:[%s3309_s28] ss:$0 sm:$0xff] }
 0x1ff   :  { %2153 = vmatmul.msk.f32.vlgmr.msrb.gmra.mxu2 %vm415_vm2, %v482_v10  ;;  %v588_v20 = vld [vmem:[#allocation2 + $0x11] sm:$0xff] }
 0x200   :  { %855 = vmatpush.msrb.mxu2 %v834_v11 }
 0x206   :  { %2158 = vmatmul.msk.f32.gmra.mxu1 %vm415_vm2, %v592_v18 }
 0x207   :  { %2154 = vmatmul.msk.f32.gmra.mxu2 %vm415_vm2, %v483_v13  ;;  %v833_v13 = vld [vmem:[#allocation8 + $0x10] sm:$0xff] }
 0x208   :  { %856 = vmatpush.msrb.mxu2 %v833_v13 }
 0x20f   :  { %2159 = vmatmul.msk.f32.vlgmr.msra.gmra.mxu2 %vm415_vm2, %v587_v19  ;;  %v2286_v19 = vld [vmem:[%s3310_s5] ss:$0 sm:$0xff] }
 0x217   :  { %2160 = vmatmul.msk.f32.gmra.mxu2 %vm415_vm2, %v588_v20 }
 0x272   :  { %v514_v22 = vpop.f32.mrf.mxu1 }
 0x279   :  { %v517_v21 = vpop.f32.mrf.mxu2  ;;  %v577_v25 = vpop.f32.mrf.mxu3 }
 0x27b   :  { %v619_v30 = vpop.f32.mrf.mxu1 }
 0x282   :  { %v543_v23 = vpop.f32.mrf.mxu2 }
 0x283   :  { %v544_v24 = vadd.f32 %v543_v23, %v514_v22  ;;  %v622_v34 = vpop.f32.mrf.mxu1  ;;  %v828_v22 = vld [vmem:[#allocation8] sm:$0xff]  ;;  %v897_v23 = vld [vmem:[#allocation8 + $0x28] sm:$0xff] }
 0x284   :  { %885 = vmatpush.msra.mxu3 %v828_v22  ;;  %918 = vmatpush.msra.mxu0 %v897_v23 }
 0x285   :  { %v3119_v27 = vadd.f32 %v577_v25, %v544_v24  ;;  %v896_v24 = vld [vmem:[#allocation8 + $0x20] sm:$0xff] }
 0x286   :  { %919 = vmatpush.msra.mxu0 %v896_v24 }
 0x28a   :  { %v546_v28 = vpop.f32.mrf.mxu2 }
 0x28b   :  { %v3121_v29 = vadd.f32 %v546_v28, %v517_v21 }
 0x292   :  { %v648_v31 = vpop.f32.mrf.mxu2 }
 0x293   :  { %v649_v32 = vadd.f32 %v648_v31, %v619_v30 }
 0x295   :  { %v658_v36 = vadd.f32 %v2284_v33, %v649_v32 }
 0x297   :  { %v660_v39 = vsel %vm415_vm2, %v658_v36, 0.0 }
 0x29a   :  { %v651_v35 = vpop.f32.mrf.mxu2 }
 0x29b   :  { %v652_v37 = vadd.f32 %v651_v35, %v622_v34 }
 0x29d   :  { %v659_v38 = vadd.f32 %v2284_v33, %v652_v37 }
 0x29f   :  { %v661_v40 = vsel %vm415_vm2, %v659_v38, 0.0 }
 0x2a0   :  { %v662_v41 = vadd.f32 %v661_v40, %v660_v39 }
 0x2a2   :  { %v663_v42 = vrot.slane %v662_v41, 4 }
 0x2a4   :  { %v664_v43 = vadd.f32 %v663_v42, %v662_v41 }
 0x2a6   :  { %v665_v44 = vrot.slane %v664_v43, 2 }
 0x2a8   :  { %v666_v45 = vadd.f32 %v665_v44, %v664_v43 }
 0x2aa   :  { %v667_v46 = vrot.slane %v666_v45, 1 }
 0x2ac   :  { %v668_v47 = vadd.f32 %v667_v46, %v666_v45 }
 0x2ae   :  { %v669_v48 = vmul.f32 %v668_v47, %v3095_v26 }
 0x2b0   :  { %v670_v49 = vsub.f32 %v658_v36, %v669_v48  ;;  %v671_v50 = vsub.f32 %v659_v38, %v669_v48  ;;  %v580_v48 = vpop.f32.mrf.mxu3 }
 0x2b2   :  { %v672_v51 = vmul.f32 %v670_v49, %v670_v49  ;;  %v673_v52 = vmul.f32 %v671_v50, %v671_v50 }
 0x2b4   :  { %v674_v53 = vsel %vm415_vm2, %v672_v51, 0.0  ;;  %v675_v54 = vsel %vm415_vm2, %v673_v52, 0.0 }
 0x2b5   :  { %v676_v55 = vadd.f32 %v675_v54, %v674_v53 }
 0x2b7   :  { %v677_v56 = vrot.slane %v676_v55, 4 }
 0x2b9   :  { %v678_v57 = vadd.f32 %v677_v56, %v676_v55  ;;  %v584_v56 = vadd.f32 %v580_v48, %v3121_v29  ;;  %v1109_v48 = vld [vmem:[#allocation10 + $0x18] sm:$0xff] }
 0x2bb   :  { %v679_v58 = vrot.slane %v678_v57, 2 }
 0x2bd   :  { %v680_v59 = vadd.f32 %v679_v58, %v678_v57 }
 0x2bf   :  { %v681_v60 = vrot.slane %v680_v59, 1 }
 0x2c1   :  { %v682_v61 = vadd.f32 %v681_v60, %v680_v59 }
 0x2c3   :  { %v683_v62 = vmul.f32 %v682_v61, %v3095_v26 }
 0x2c5   :  { %v684_v63 = vadd.f32 1e-05, %v683_v62 }
 0x2c7   :  { %2311 = vrsqrt.f32 %v684_v63  ;;  %vm691_vm8 = vweird.f32 %v684_v63 }
 0x2cd   :  { %v2312_v3 = vpop.eup %2311 }
 0x2ce   :  { %v686_v7 = vmul.f32 %v2312_v3, %v684_v63  ;;  %vm692_vm7 = vweird.f32 %v2312_v3 }
 0x2cf   :  { %vm693_vm9 = vmor %vm691_vm8, %vm692_vm7 }
 0x2d0   :  { %v687_v8 = vmul.f32 %v2312_v3, %v686_v7 }
 0x2d2   :  { %v688_v9 = vmul.f32 0.5, %v687_v8 }
 0x2d4   :  { %v689_v10 = vsub.f32 1.5, %v688_v9 }
 0x2d6   :  { %v690_v14 = vmul.f32 %v2312_v3, %v689_v10 }
 0x2d8   :  { %v694_v16 = vsel %vm693_vm9, %v2312_v3, %v690_v14 }
 0x2d9   :  { %v695_v17 = vmul.f32 %v694_v16, %v670_v49  ;;  %v696_v18 = vmul.f32 %v694_v16, %v671_v50 }
 0x2db   :  { %v701_v20 = vmul.f32 %v2285_v15, %v695_v17  ;;  %v702_v21 = vmul.f32 %v2285_v15, %v696_v18 }
 0x2dd   :  { %v707_v25 = vadd.f32 %v2286_v19, %v701_v20  ;;  %v708_v28 = vadd.f32 %v2286_v19, %v702_v21 }
 0x2df   :  { %v709_v30 = vmax.f32 %v707_v25, 0.0  ;;  %v710_v31 = vmax.f32 %v708_v28, 0.0 }
 0x2e1   :  { %711 = vst.msk [vmem:[#allocation2 + $0x2] sm:$0xff] %vm415_vm2, %v709_v30 }
 0x2e2   :  { %712 = vst.msk [vmem:[#allocation2 + $0x12] sm:$0xff] %vm415_vm2, %v710_v31 }
 0x2e8   :  { %v713_v32 = vld [vmem:[#allocation2 + $0x1] sm:$0xff] }
 0x2e9   :  { %v714_v33 = vld [vmem:[#allocation2 + $0x11] sm:$0xff]  ;;  %v715_v34 = vmax.f32 %v709_v30, %v713_v32 }
 0x2ea   :  { %v716_v35 = vmax.f32 %v710_v31, %v714_v33 }
 0x2eb   :  { %717 = vst.msk [vmem:[#allocation2 + $0x2] sm:$0xff] %vm415_vm2, %v715_v34 }
 0x2ec   :  { %718 = vst.msk [vmem:[#allocation2 + $0x12] sm:$0xff] %vm415_vm2, %v716_v35  ;;  %v1032_v35 = vld [vmem:[#allocation14 + $0x68] sm:$0xff] }
 0x2ed   :  { %1053 = vmatpush.msra.mxu2 %v1032_v35 }
 0x2f2   :  { %v719_v36 = vld [vmem:[#allocation2 + $0x1] sm:$0xff] }
 0x2f3   :  { %v754_v37 = vld [vmem:[#allocation2 + $0x2] sm:$0xff]  ;;  %2161 = vmatmul.msk.f32.vlgmr.msrb.gmra.mxu3 %vm415_vm2, %v719_v36  ;;  %v720_v39 = vld [vmem:[#allocation2 + $0x11] sm:$0xff] }
 0x2f4   :  { %v789_v38 = vld [vmem:[#allocation2 + $0x3] sm:$0xff]  ;;  %2163 = vmatmul.msk.f32.vlgmr.msrb.gmra.mxu0 %vm415_vm2, %v754_v37  ;;  %v755_v40 = vld [vmem:[#allocation2 + $0x12] sm:$0xff] }
 0x2f5   :  { %824 = vst.msk [vmem:[#allocation2 + $0x2] sm:$0xff] %vm415_vm2, %v709_v30  ;;  %v790_v41 = vld [vmem:[#allocation2 + $0x13] sm:$0xff]  ;;  %2165 = vmatmul.msk.f32.vlgmr.msra.gmra.mxu1 %vm415_vm2, %v789_v38  ;;  %1130 = vmatpush.msrb.mxu0 %v1109_v48 }
 0x2f6   :  { %825 = vst.msk [vmem:[#allocation2 + $0x12] sm:$0xff] %vm415_vm2, %v710_v31  ;;  %v1067_v36 = vld [vmem:[#allocation14 + $0xa8] sm:$0xff] }
 0x2f7   :  { %v997_v37 = vld [vmem:[#allocation14 + $0x28] sm:$0xff]  ;;  %1088 = vmatpush.msrb.mxu3 %v1067_v36 }
 0x2f8   :  { %1018 = vmatpush.msrb.mxu1 %v997_v37 }
 0x2fb   :  { %2162 = vmatmul.msk.f32.gmra.mxu3 %vm415_vm2, %v720_v39  ;;  %v1031_v39 = vld [vmem:[#allocation14 + $0x60] sm:$0xff] }
 0x2fc   :  { %v830_v42 = vld [vmem:[#allocation2 + $0x2] sm:$0xff]  ;;  %2164 = vmatmul.msk.f32.gmra.mxu0 %vm415_vm2, %v755_v40  ;;  %1054 = vmatpush.msra.mxu2 %v1031_v39 }
 0x2fd   :  { %2166 = vmatmul.msk.f32.gmra.mxu1 %vm415_vm2, %v790_v41  ;;  %2167 = vmatmul.msk.f32.vlgmr.msrb.gmra.mxu2 %vm415_vm2, %v830_v42  ;;  %v826_v43 = vld [vmem:[#allocation2 + $0x1] sm:$0xff]  ;;  %v831_v45 = vld [vmem:[#allocation2 + $0x12] sm:$0xff] }
 0x2fe   :  { %v893_v44 = vld [vmem:[#allocation2 + $0x3] sm:$0xff]  ;;  %v827_v46 = vld [vmem:[#allocation2 + $0x11] sm:$0xff] }
 0x2ff   :  { %v894_v47 = vld [vmem:[#allocation2 + $0x13] sm:$0xff]  ;;  %v1066_v40 = vld [vmem:[#allocation14 + $0xa0] sm:$0xff] }
 0x300   :  { %v996_v41 = vld [vmem:[#allocation14 + $0x20] sm:$0xff]  ;;  %1089 = vmatpush.msrb.mxu3 %v1066_v40 }
 0x301   :  { %1019 = vmatpush.msrb.mxu1 %v996_v41 }
 0x303   :  { %2169 = vmatmul.msk.f32.vlgmr.msra.gmra.mxu3 %vm415_vm2, %v826_v43 }
 0x304   :  { %2171 = vmatmul.msk.f32.vlgmr.msra.gmra.mxu0 %vm415_vm2, %v893_v44 }
 0x305   :  { %2168 = vmatmul.msk.f32.gmra.mxu2 %vm415_vm2, %v831_v45 }
 0x30b   :  { %2170 = vmatmul.msk.f32.gmra.mxu3 %vm415_vm2, %v827_v46  ;;  %v1172_v46 = vld [vmem:[#allocation10 + $0x28] sm:$0xff] }
 0x30c   :  { %2172 = vmatmul.msk.f32.gmra.mxu0 %vm415_vm2, %v894_v47  ;;  %v1208_v47 = vld [vmem:[#allocation10 + $0x38] sm:$0xff]  ;;  %1193 = vmatpush.msrb.mxu2 %v1172_v46 }
 0x30d   :  { %1229 = vmatpush.msra.mxu3 %v1208_v47 }
 0x371   :  { %v781_v49 = vpop.f32.mrf.mxu0 }
 0x372   :  { %v816_v53 = vpop.f32.mrf.mxu1 }
 0x376   :  { %v746_v50 = vpop.f32.mrf.mxu3 }
 0x377   :  { %v752_v51 = vadd.f32 %v746_v50, %v3119_v27  ;;  %v1108_v50 = vld [vmem:[#allocation10 + $0x10] sm:$0xff] }
 0x378   :  { %1131 = vmatpush.msrb.mxu0 %v1108_v50 }
 0x379   :  { %v787_v52 = vadd.f32 %v781_v49, %v752_v51  ;;  %v784_v55 = vpop.f32.mrf.mxu0  ;;  %v1104_v49 = vld [vmem:[#allocation10 + $0x8] sm:$0xff] }
 0x37a   :  { %1159 = vmatpush.msra.mxu1 %v1104_v49 }
 0x37b   :  { %v3151_v54 = vadd.f32 %v816_v53, %v787_v52  ;;  %v2288_v52 = vld [vmem:[%s3312_s10] ss:$0 sm:$0xff] }
 0x37e   :  { %v749_v57 = vpop.f32.mrf.mxu3 }
 0x37f   :  { %v753_v58 = vadd.f32 %v749_v57, %v584_v56  ;;  %v2289_v57 = vld [vmem:[%s3313_s19] ss:$0 sm:$0xff] }
 0x380   :  { %v858_v60 = vpop.f32.mrf.mxu2 }
 0x381   :  { %v3154_v59 = vadd.f32 %v784_v55, %v753_v58  ;;  %v921_v61 = vpop.f32.mrf.mxu0 }
 0x386   :  { %v887_v62 = vpop.f32.mrf.mxu3 }
 0x387   :  { %v888_v63 = vadd.f32 %v887_v62, %v858_v60  ;;  %v1207_v62 = vld [vmem:[#allocation10 + $0x30] sm:$0xff] }
 0x388   :  { %v861_v2 = vpop.f32.mrf.mxu2  ;;  %1230 = vmatpush.msra.mxu3 %v1207_v62 }
 0x389   :  { %v927_v0 = vadd.f32 %v921_v61, %v888_v63  ;;  %v924_v4 = vpop.f32.mrf.mxu0  ;;  %v1171_v61 = vld [vmem:[#allocation10 + $0x20] sm:$0xff] }
 0x38a   :  { %v1103_v63 = vld [vmem:[#allocation10] sm:$0xff]  ;;  %1194 = vmatpush.msrb.mxu2 %v1171_v61 }
 0x38b   :  { %v933_v5 = vadd.f32 %v2287_v1, %v927_v0  ;;  %1160 = vmatpush.msra.mxu1 %v1103_v63 }
 0x38d   :  { %v935_v8 = vsel %vm415_vm2, %v933_v5, 0.0 }
 0x38e   :  { %v890_v3 = vpop.f32.mrf.mxu3 }
 0x38f   :  { %v891_v27 = vadd.f32 %v890_v3, %v861_v2 }
 0x391   :  { %v928_v6 = vadd.f32 %v924_v4, %v891_v27 }
 0x393   :  { %v934_v7 = vadd.f32 %v2287_v1, %v928_v6 }
 0x395   :  { %v936_v29 = vsel %vm415_vm2, %v934_v7, 0.0 }
 0x396   :  { %v937_v9 = vadd.f32 %v936_v29, %v935_v8 }
 0x398   :  { %v938_v10 = vrot.slane %v937_v9, 4 }
 0x39a   :  { %v939_v11 = vadd.f32 %v938_v10, %v937_v9 }
 0x39c   :  { %v940_v12 = vrot.slane %v939_v11, 2 }
 0x39e   :  { %v941_v13 = vadd.f32 %v940_v12, %v939_v11 }
 0x3a0   :  { %v942_v14 = vrot.slane %v941_v13, 1 }
 0x3a2   :  { %v943_v15 = vadd.f32 %v942_v14, %v941_v13 }
 0x3a4   :  { %v944_v16 = vmul.f32 %v943_v15, %v3095_v26 }
 0x3a6   :  { %v945_v17 = vsub.f32 %v933_v5, %v944_v16  ;;  %v946_v18 = vsub.f32 %v934_v7, %v944_v16 }
 0x3a8   :  { %v947_v19 = vmul.f32 %v945_v17, %v945_v17  ;;  %v948_v20 = vmul.f32 %v946_v18, %v946_v18 }
 0x3aa   :  { %v949_v21 = vsel %vm415_vm2, %v947_v19, 0.0  ;;  %v950_v22 = vsel %vm415_vm2, %v948_v20, 0.0  ;;  %v819_v20 = vpop.f32.mrf.mxu1 }
 0x3ab   :  { %v951_v23 = vadd.f32 %v950_v22, %v949_v21 }
 0x3ad   :  { %v952_v24 = vrot.slane %v951_v23, 4 }
 0x3af   :  { %v953_v25 = vadd.f32 %v952_v24, %v951_v23 }
 0x3b1   :  { %v954_v28 = vrot.slane %v953_v25, 2 }
 0x3b3   :  { %v955_v30 = vadd.f32 %v954_v28, %v953_v25  ;;  %v823_v28 = vadd.f32 %v819_v20, %v3154_v59  ;;  %v2290_v59 = vld [vmem:[%s3314_s1] ss:$0 sm:$0xff] }
 0x3b5   :  { %v956_v31 = vrot.slane %v955_v30, 1 }
 0x3b7   :  { %v957_v32 = vadd.f32 %v956_v31, %v955_v30 }
 0x3b9   :  { %v958_v33 = vmul.f32 %v957_v32, %v3095_v26 }
 0x3bb   :  { %v959_v34 = vadd.f32 1e-05, %v958_v33 }
 0x3bd   :  { %2313 = vrsqrt.f32 %v959_v34  ;;  %vm966_vm11 = vweird.f32 %v959_v34 }
 0x3c3   :  { %v2314_v38 = vpop.eup %2313 }
 0x3c4   :  { %v961_v42 = vmul.f32 %v2314_v38, %v959_v34  ;;  %vm967_vm10 = vweird.f32 %v2314_v38 }
 0x3c5   :  { %vm968_vm12 = vmor %vm966_vm11, %vm967_vm10 }
 0x3c6   :  { %v962_v43 = vmul.f32 %v2314_v38, %v961_v42 }
 0x3c8   :  { %v963_v44 = vmul.f32 0.5, %v962_v43 }
 0x3ca   :  { %v964_v45 = vsub.f32 1.5, %v963_v44 }
 0x3cc   :  { %v965_v51 = vmul.f32 %v2314_v38, %v964_v45 }
 0x3ce   :  { %v969_v53 = vsel %vm968_vm12, %v2314_v38, %v965_v51 }
 0x3cf   :  { %v970_v55 = vmul.f32 %v969_v53, %v945_v17  ;;  %v971_v56 = vmul.f32 %v969_v53, %v946_v18 }
 0x3d1   :  { %v976_v58 = vmul.f32 %v2288_v52, %v970_v55  ;;  %v977_v60 = vmul.f32 %v2288_v52, %v971_v56 }
 0x3d3   :  { %v982_v0 = vadd.f32 %v2289_v57, %v976_v58  ;;  %v983_v1 = vadd.f32 %v2289_v57, %v977_v60 }
 0x3d5   :  { %v984_v2 = vmax.f32 %v982_v0, 0.0  ;;  %v985_v3 = vmax.f32 %v983_v1, 0.0 }
 0x3d7   :  { %986 = vst.msk [vmem:[#allocation2 + $0x2] sm:$0xff] %vm415_vm2, %v984_v2 }
 0x3d8   :  { %987 = vst.msk [vmem:[#allocation2 + $0x12] sm:$0xff] %vm415_vm2, %v985_v3 }
 0x3de   :  { %v988_v27 = vld [vmem:[#allocation2 + $0x1] sm:$0xff] }
 0x3df   :  { %v989_v4 = vld [vmem:[#allocation2 + $0x11] sm:$0xff]  ;;  %v990_v5 = vmax.f32 %v984_v2, %v988_v27 }
 0x3e0   :  { %v991_v6 = vmax.f32 %v985_v3, %v989_v4 }
 0x3e1   :  { %992 = vst.msk [vmem:[#allocation2 + $0x2] sm:$0xff] %vm415_vm2, %v990_v5 }
 0x3e2   :  { %993 = vst.msk [vmem:[#allocation2 + $0x12] sm:$0xff] %vm415_vm2, %v991_v6 }
 0x3e8   :  { %v994_v7 = vld [vmem:[#allocation2 + $0x1] sm:$0xff] }
 0x3e9   :  { %v1029_v8 = vld [vmem:[#allocation2 + $0x2] sm:$0xff]  ;;  %2173 = vmatmul.msk.f32.vlgmr.msrb.gmra.mxu1 %vm415_vm2, %v994_v7  ;;  %v995_v9 = vld [vmem:[#allocation2 + $0x11] sm:$0xff] }
 0x3ea   :  { %v1064_v29 = vld [vmem:[#allocation2 + $0x3] sm:$0xff]  ;;  %2175 = vmatmul.msk.f32.vlgmr.msra.gmra.mxu2 %vm415_vm2, %v1029_v8  ;;  %v1030_v10 = vld [vmem:[#allocation2 + $0x12] sm:$0xff] }
 0x3eb   :  { %1099 = vst.msk [vmem:[#allocation2 + $0x2] sm:$0xff] %vm415_vm2, %v984_v2  ;;  %v1065_v11 = vld [vmem:[#allocation2 + $0x13] sm:$0xff]  ;;  %2177 = vmatmul.msk.f32.vlgmr.msrb.gmra.mxu3 %vm415_vm2, %v1064_v29 }
 0x3ec   :  { %1100 = vst.msk [vmem:[#allocation2 + $0x12] sm:$0xff] %vm415_vm2, %v985_v3 }
 0x3f1   :  { %2174 = vmatmul.msk.f32.gmra.mxu1 %vm415_vm2, %v995_v9 }
 0x3f2   :  { %v1105_v12 = vld [vmem:[#allocation2 + $0x1] sm:$0xff]  ;;  %2176 = vmatmul.msk.f32.gmra.mxu2 %vm415_vm2, %v1030_v10 }
 0x3f3   :  { %2178 = vmatmul.msk.f32.gmra.mxu3 %vm415_vm2, %v1065_v11  ;;  %2179 = vmatmul.msk.f32.vlgmr.msrb.gmra.mxu0 %vm415_vm2, %v1105_v12  ;;  %v1101_v13 = vld [vmem:[#allocation2] sm:$0xff]  ;;  %v1106_v15 = vld [vmem:[#allocation2 + $0x11] sm:$0xff] }
 0x3f4   :  { %v1168_v14 = vld [vmem:[#allocation2 + $0x2] sm:$0xff]  ;;  %v1102_v17 = vld [vmem:[#allocation2 + $0x10] sm:$0xff] }
 0x3f5   :  { %v1204_v16 = vld [vmem:[#allocation2 + $0x3] sm:$0xff]  ;;  %v1169_v18 = vld [vmem:[#allocation2 + $0x12] sm:$0xff] }
 0x3f6   :  { %v1205_v19 = vld [vmem:[#allocation2 + $0x13] sm:$0xff] }
 0x3f9   :  { %2181 = vmatmul.msk.f32.vlgmr.msra.gmra.mxu1 %vm415_vm2, %v1101_v13  ;;  %v1378_v13 = vld [vmem:[#allocation14 + $0xb8] sm:$0xff] }
 0x3fa   :  { %2183 = vmatmul.msk.f32.vlgmr.msrb.gmra.mxu2 %vm415_vm2, %v1168_v14  ;;  %v1308_v14 = vld [vmem:[#allocation14 + $0x38] sm:$0xff] }
 0x3fb   :  { %2180 = vmatmul.msk.f32.gmra.mxu0 %vm415_vm2, %v1106_v15  ;;  %2185 = vmatmul.msk.f32.vlgmr.msra.gmra.mxu3 %vm415_vm2, %v1204_v16  ;;  %v1343_v15 = vld [vmem:[#allocation14 + $0x78] sm:$0xff] }
 0x3fc   :  { %1399 = vmatpush.msra.mxu2 %v1378_v13  ;;  %1329 = vmatpush.msra.mxu0 %v1308_v14 }
 0x3fd   :  { %1364 = vmatpush.msrb.mxu1 %v1343_v15 }
 0x401   :  { %2182 = vmatmul.msk.f32.gmra.mxu1 %vm415_vm2, %v1102_v17  ;;  %v1377_v17 = vld [vmem:[#allocation14 + $0xb0] sm:$0xff] }
 0x402   :  { %2184 = vmatmul.msk.f32.gmra.mxu2 %vm415_vm2, %v1169_v18  ;;  %v1307_v18 = vld [vmem:[#allocation14 + $0x30] sm:$0xff] }
 0x403   :  { %2186 = vmatmul.msk.f32.gmra.mxu3 %vm415_vm2, %v1205_v19  ;;  %v1342_v19 = vld [vmem:[#allocation14 + $0x70] sm:$0xff]  ;;  %1400 = vmatpush.msra.mxu2 %v1377_v17 }
 0x404   :  { %1330 = vmatpush.msra.mxu0 %v1307_v18  ;;  %1365 = vmatpush.msrb.mxu1 %v1342_v19 }
 0x466   :  { %v1021_v21 = vpop.f32.mrf.mxu1 }
 0x467   :  { %v1027_v22 = vadd.f32 %v1021_v21, %v3151_v54 }
 0x46d   :  { %v1056_v23 = vpop.f32.mrf.mxu2 }
 0x46e   :  { %v1062_v24 = vadd.f32 %v1056_v23, %v1027_v22  ;;  %v1091_v25 = vpop.f32.mrf.mxu3  ;;  %v1024_v30 = vpop.f32.mrf.mxu1 }
 0x46f   :  { %v1028_v32 = vadd.f32 %v1024_v30, %v823_v28 }
 0x470   :  { %v3187_v31 = vadd.f32 %v1091_v25, %v1062_v24  ;;  %v1133_v38 = vpop.f32.mrf.mxu0  ;;  %v2291_v25 = vld [vmem:[#allocation11] ss:$0 sm:$0xff] }
 0x475   :  { %v1059_v33 = vpop.f32.mrf.mxu2 }
 0x476   :  { %v1063_v34 = vadd.f32 %v1059_v33, %v1028_v32  ;;  %v1094_v35 = vpop.f32.mrf.mxu3  ;;  %v1162_v36 = vpop.f32.mrf.mxu1  ;;  %v2292_v33 = vld [vmem:[#allocation13] ss:$0 sm:$0xff] }
 0x477   :  { %v1163_v40 = vadd.f32 %v1162_v36, %v1133_v38 }
 0x478   :  { %v3189_v37 = vadd.f32 %v1094_v35, %v1063_v34  ;;  %v1136_v43 = vpop.f32.mrf.mxu0 }
 0x47d   :  { %v1196_v39 = vpop.f32.mrf.mxu2 }
 0x47e   :  { %v1232_v54 = vpop.f32.mrf.mxu3  ;;  %v1202_v41 = vadd.f32 %v1196_v39, %v1163_v40  ;;  %v1165_v42 = vpop.f32.mrf.mxu1 }
 0x47f   :  { %v1166_v45 = vadd.f32 %v1165_v42, %v1136_v43 }
 0x480   :  { %v1238_v44 = vadd.f32 %v1232_v54, %v1202_v41 }
 0x482   :  { %v1244_v49 = vadd.f32 %v2290_v59, %v1238_v44 }
 0x484   :  { %v1246_v52 = vsel %vm415_vm2, %v1244_v49, 0.0 }
 0x485   :  { %v1199_v46 = vpop.f32.mrf.mxu2 }
 0x486   :  { %v1203_v47 = vadd.f32 %v1199_v46, %v1166_v45  ;;  %v1235_v48 = vpop.f32.mrf.mxu3 }
 0x488   :  { %v1239_v50 = vadd.f32 %v1235_v48, %v1203_v47 }
 0x48a   :  { %v1245_v51 = vadd.f32 %v2290_v59, %v1239_v50 }
 0x48c   :  { %v1247_v53 = vsel %vm415_vm2, %v1245_v51, 0.0 }
 0x48d   :  { %v1248_v55 = vadd.f32 %v1247_v53, %v1246_v52 }
 0x48f   :  { %v1249_v56 = vrot.slane %v1248_v55, 4 }
 0x491   :  { %v1250_v57 = vadd.f32 %v1249_v56, %v1248_v55 }
 0x493   :  { %v1251_v58 = vrot.slane %v1250_v57, 2 }
 0x495   :  { %v1252_v60 = vadd.f32 %v1251_v58, %v1250_v57  ;;  %v2293_v58 = vld [vmem:[#allocation16] ss:$0 sm:$0xff] }
 0x497   :  { %v1253_v61 = vrot.slane %v1252_v60, 1 }
 0x499   :  { %v1254_v62 = vadd.f32 %v1253_v61, %v1252_v60 }
 0x49b   :  { %v1255_v63 = vmul.f32 %v1254_v62, %v3095_v26 }
 0x49d   :  { %v1256_v0 = vsub.f32 %v1244_v49, %v1255_v63  ;;  %v1257_v1 = vsub.f32 %v1245_v51, %v1255_v63 }
 0x49f   :  { %v1258_v2 = vmul.f32 %v1256_v0, %v1256_v0  ;;  %v1259_v3 = vmul.f32 %v1257_v1, %v1257_v1 }
 0x4a1   :  { %v1260_v27 = vsel %vm415_vm2, %v1258_v2, 0.0  ;;  %v1261_v4 = vsel %vm415_vm2, %v1259_v3, 0.0 }
 0x4a2   :  { %v1262_v5 = vadd.f32 %v1261_v4, %v1260_v27 }
 0x4a4   :  { %v1263_v6 = vrot.slane %v1262_v5, 4 }
 0x4a6   :  { %v1264_v7 = vadd.f32 %v1263_v6, %v1262_v5 }
 0x4a8   :  { %v1265_v8 = vrot.slane %v1264_v7, 2 }
 0x4aa   :  { %v1266_v29 = vadd.f32 %v1265_v8, %v1264_v7 }
 0x4ac   :  { %v1267_v9 = vrot.slane %v1266_v29, 1 }
 0x4ae   :  { %v1268_v10 = vadd.f32 %v1267_v9, %v1266_v29 }
 0x4b0   :  { %v1269_v11 = vmul.f32 %v1268_v10, %v3095_v26 }
 0x4b2   :  { %v1270_v12 = vadd.f32 1e-05, %v1269_v11 }
 0x4b4   :  { %2315 = vrsqrt.f32 %v1270_v12  ;;  %vm1277_vm14 = vweird.f32 %v1270_v12 }
 0x4ba   :  { %v2316_v16 = vpop.eup %2315 }
 0x4bb   :  { %v1272_v20 = vmul.f32 %v2316_v16, %v1270_v12  ;;  %vm1278_vm13 = vweird.f32 %v2316_v16 }
 0x4bc   :  { %vm1279_vm15 = vmor %vm1277_vm14, %vm1278_vm13 }
 0x4bd   :  { %v1273_v21 = vmul.f32 %v2316_v16, %v1272_v20 }
 0x4bf   :  { %v1274_v22 = vmul.f32 0.5, %v1273_v21  ;;  %v1477_v21 = vld [vmem:[#allocation20 + $0x18] sm:$0xff] }
 0x4c0   :  { %1498 = vmatpush.msrb.mxu3 %v1477_v21  ;;  %v1671_v21 = vld [vmem:[#allocation28 + $0x18] sm:$0xff] }
 0x4c1   :  { %v1275_v23 = vsub.f32 1.5, %v1274_v22  ;;  %v1472_v22 = vld [vmem:[#allocation20 + $0x8] sm:$0xff] }
 0x4c2   :  { %1527 = vmatpush.msrb.mxu0 %v1472_v22  ;;  %v1632_v22 = vld [vmem:[#allocation26 + $0x18] sm:$0xff] }
 0x4c3   :  { %v1276_v24 = vmul.f32 %v2316_v16, %v1275_v23  ;;  %v1476_v23 = vld [vmem:[#allocation20 + $0x10] sm:$0xff]  ;;  %1655 = vmatpush.msrb.mxu2 %v1632_v22 }
 0x4c4   :  { %1499 = vmatpush.msrb.mxu3 %v1476_v23 }
 0x4c5   :  { %v1280_v28 = vsel %vm1279_vm15, %v2316_v16, %v1276_v24 }
 0x4c6   :  { %v1281_v30 = vmul.f32 %v1280_v28, %v1256_v0  ;;  %v1282_v32 = vmul.f32 %v1280_v28, %v1257_v1  ;;  %v1471_v28 = vld [vmem:[#allocation20] sm:$0xff]  ;;  %1688 = vmatpush.msra.mxu3 %v1671_v21 }
 0x4c7   :  { %1528 = vmatpush.msrb.mxu0 %v1471_v28  ;;  %v1669_v28 = vld [vmem:[#allocation28 + $0x8] sm:$0xff] }
 0x4c8   :  { %v1287_v34 = vmul.f32 %v2291_v25, %v1281_v30  ;;  %v1288_v35 = vmul.f32 %v2291_v25, %v1282_v32  ;;  %v1540_v25 = vld [vmem:[#allocation20 + $0x28] sm:$0xff]  ;;  %v1539_v30 = vld [vmem:[#allocation20 + $0x20] sm:$0xff] }
 0x4c9   :  { %1561 = vmatpush.msra.mxu1 %v1540_v25  ;;  %v1631_v25 = vld [vmem:[#allocation26 + $0x10] sm:$0xff] }
 0x4ca   :  { %v1293_v36 = vadd.f32 %v2292_v33, %v1287_v34  ;;  %v1294_v38 = vadd.f32 %v2292_v33, %v1288_v35  ;;  %1656 = vmatpush.msrb.mxu2 %v1631_v25 }
 0x4cb   :  { %1562 = vmatpush.msra.mxu1 %v1539_v30  ;;  %v1630_v30 = vld [vmem:[#allocation26 + $0x8] sm:$0xff] }
 0x4cc   :  { %v1295_v39 = vmax.f32 %v1293_v36, 0.0  ;;  %v1296_v40 = vmax.f32 %v1294_v38, 0.0  ;;  %1657 = vmatpush.msrb.mxu2 %v1630_v30 }
 0x4ce   :  { %1297 = vst.msk [vmem:[#allocation2 + $0x2] sm:$0xff] %vm415_vm2, %v1295_v39 }
 0x4cf   :  { %1298 = vst.msk [vmem:[#allocation2 + $0x12] sm:$0xff] %vm415_vm2, %v1296_v40 }
 0x4d5   :  { %v1299_v54 = vld [vmem:[#allocation2 + $0x1] sm:$0xff] }
 0x4d6   :  { %v1300_v41 = vld [vmem:[#allocation2 + $0x11] sm:$0xff]  ;;  %v1301_v42 = vmax.f32 %v1295_v39, %v1299_v54 }
 0x4d7   :  { %v1302_v43 = vmax.f32 %v1296_v40, %v1300_v41  ;;  %v2294_v40 = vld [vmem:[#allocation17] ss:$0 sm:$0xff] }
 0x4d8   :  { %1303 = vst.msk [vmem:[#allocation2 + $0x2] sm:$0xff] %vm415_vm2, %v1301_v42 }
 0x4d9   :  { %1304 = vst.msk [vmem:[#allocation2 + $0x12] sm:$0xff] %vm415_vm2, %v1302_v43  ;;  %v2295_v43 = vld [vmem:[#allocation19] ss:$0 sm:$0xff] }
 0x4df   :  { %v1305_v44 = vld [vmem:[#allocation2 + $0x1] sm:$0xff] }
 0x4e0   :  { %v1340_v59 = vld [vmem:[#allocation2 + $0x2] sm:$0xff]  ;;  %2187 = vmatmul.msk.f32.vlgmr.msra.gmra.mxu0 %vm415_vm2, %v1305_v44  ;;  %v1306_v46 = vld [vmem:[#allocation2 + $0x11] sm:$0xff] }
 0x4e1   :  { %v1375_v45 = vld [vmem:[#allocation2 + $0x3] sm:$0xff]  ;;  %2189 = vmatmul.msk.f32.vlgmr.msrb.gmra.mxu1 %vm415_vm2, %v1340_v59  ;;  %v1341_v47 = vld [vmem:[#allocation2 + $0x12] sm:$0xff] }
 0x4e2   :  { %2191 = vmatmul.msk.f32.vlgmr.msra.gmra.mxu2 %vm415_vm2, %v1375_v45  ;;  %v1376_v48 = vld [vmem:[#allocation2 + $0x13] sm:$0xff] }
 0x4e8   :  { %2188 = vmatmul.msk.f32.gmra.mxu0 %vm415_vm2, %v1306_v46 }
 0x4e9   :  { %2190 = vmatmul.msk.f32.gmra.mxu1 %vm415_vm2, %v1341_v47 }
 0x4ea   :  { %2192 = vmatmul.msk.f32.gmra.mxu2 %vm415_vm2, %v1376_v48 }
 0x55d   :  { %v1332_v49 = vpop.f32.mrf.mxu0 }
 0x55e   :  { %v1367_v50 = vpop.f32.mrf.mxu1  ;;  %v1338_v51 = vadd.f32 %v1332_v49, %v3187_v31 }
 0x560   :  { %v1373_v55 = vadd.f32 %v1367_v50, %v1338_v51 }
 0x565   :  { %v1402_v52 = vpop.f32.mrf.mxu2  ;;  %v1335_v53 = vpop.f32.mrf.mxu0 }
 0x566   :  { %v1339_v56 = vadd.f32 %v1335_v53, %v3189_v37  ;;  %v1408_v57 = vadd.f32 %v1402_v52, %v1373_v55  ;;  %v1370_v60 = vpop.f32.mrf.mxu1 }
 0x568   :  { %v1374_v61 = vadd.f32 %v1370_v60, %v1339_v56  ;;  %v1414_v63 = vadd.f32 %v2293_v58, %v1408_v57 }
 0x56a   :  { %v1416_v2 = vsel %vm415_vm2, %v1414_v63, 0.0 }
 0x56d   :  { %v1405_v62 = vpop.f32.mrf.mxu2 }
 0x56e   :  { %v1409_v0 = vadd.f32 %v1405_v62, %v1374_v61  ;;  %v2296_v62 = vld [vmem:[#allocation22] ss:$0 sm:$0xff] }
 0x570   :  { %v1415_v1 = vadd.f32 %v2293_v58, %v1409_v0 }
 0x572   :  { %v1417_v3 = vsel %vm415_vm2, %v1415_v1, 0.0 }
 0x573   :  { %v1418_v27 = vadd.f32 %v1417_v3, %v1416_v2 }
 0x575   :  { %v1419_v4 = vrot.slane %v1418_v27, 4 }
 0x577   :  { %v1420_v31 = vadd.f32 %v1419_v4, %v1418_v27 }
 0x579   :  { %v1421_v5 = vrot.slane %v1420_v31, 2 }
 0x57b   :  { %v1422_v6 = vadd.f32 %v1421_v5, %v1420_v31 }
 0x57d   :  { %v1423_v7 = vrot.slane %v1422_v6, 1 }
 0x57f   :  { %v1424_v8 = vadd.f32 %v1423_v7, %v1422_v6 }
 0x581   :  { %v1425_v37 = vmul.f32 %v1424_v8, %v3095_v26 }
 0x583   :  { %v1426_v29 = vsub.f32 %v1414_v63, %v1425_v37  ;;  %v1427_v9 = vsub.f32 %v1415_v1, %v1425_v37 }
 0x585   :  { %v1428_v10 = vmul.f32 %v1426_v29, %v1426_v29  ;;  %v1429_v11 = vmul.f32 %v1427_v9, %v1427_v9 }
 0x587   :  { %v1430_v12 = vsel %vm415_vm2, %v1428_v10, 0.0  ;;  %v1431_v13 = vsel %vm415_vm2, %v1429_v11, 0.0 }
 0x588   :  { %v1432_v14 = vadd.f32 %v1431_v13, %v1430_v12 }
 0x58a   :  { %v1433_v15 = vrot.slane %v1432_v14, 4 }
 0x58c   :  { %v1434_v16 = vadd.f32 %v1433_v15, %v1432_v14 }
 0x58e   :  { %v1435_v17 = vrot.slane %v1434_v16, 2 }
 0x590   :  { %v1436_v18 = vadd.f32 %v1435_v17, %v1434_v16 }
 0x592   :  { %v1437_v19 = vrot.slane %v1436_v18, 1 }
 0x594   :  { %v1438_v20 = vadd.f32 %v1437_v19, %v1436_v18 }
 0x596   :  { %v1439_v24 = vmul.f32 %v1438_v20, %v3095_v26 }
 0x598   :  { %v1440_v32 = vadd.f32 1e-05, %v1439_v24  ;;  %v1670_v24 = vld [vmem:[#allocation28 + $0x10] sm:$0xff] }
 0x599   :  { %1689 = vmatpush.msra.mxu3 %v1670_v24 }
 0x59a   :  { %2317 = vrsqrt.f32 %v1440_v32  ;;  %vm1447_vm3 = vweird.f32 %v1440_v32 }
 0x59b   :  { %1690 = vmatpush.msra.mxu3 %v1669_v28 }
 0x5a0   :  { %v2318_v33 = vpop.eup %2317 }
 0x5a1   :  { %v1442_v34 = vmul.f32 %v2318_v33, %v1440_v32  ;;  %vm1448_vm1 = vweird.f32 %v2318_v33 }
 0x5a2   :  { %vm1449_vm4 = vmor %vm1447_vm3, %vm1448_vm1 }
 0x5a3   :  { %v1443_v35 = vmul.f32 %v2318_v33, %v1442_v34  ;;  %v1629_v34 = vld [vmem:[#allocation26] sm:$0xff] }
 0x5a4   :  { %1658 = vmatpush.msrb.mxu2 %v1629_v34 }
 0x5a5   :  { %v1444_v36 = vmul.f32 0.5, %v1443_v35 }
 0x5a7   :  { %v1445_v38 = vsub.f32 1.5, %v1444_v36 }
 0x5a9   :  { %v1446_v39 = vmul.f32 %v2318_v33, %v1445_v38 }
 0x5ab   :  { %v1450_v54 = vsel %vm1449_vm4, %v2318_v33, %v1446_v39  ;;  %v1668_v33 = vld [vmem:[#allocation28] sm:$0xff] }
 0x5ac   :  { %v1451_v41 = vmul.f32 %v1450_v54, %v1426_v29  ;;  %v1452_v42 = vmul.f32 %v1450_v54, %v1427_v9  ;;  %1691 = vmatpush.msra.mxu3 %v1668_v33 }
 0x5ae   :  { %v1457_v44 = vmul.f32 %v2294_v40, %v1451_v41  ;;  %v1458_v59 = vmul.f32 %v2294_v40, %v1452_v42 }
 0x5b0   :  { %v1463_v45 = vadd.f32 %v2295_v43, %v1457_v44  ;;  %v1464_v46 = vadd.f32 %v2295_v43, %v1458_v59  ;;  %v2297_v59 = vld [vmem:[#allocation23] ss:$0 sm:$0xff] }
 0x5b2   :  { %v1465_v47 = vmax.f32 %v1463_v45, 0.0  ;;  %v1466_v48 = vmax.f32 %v1464_v46, 0.0 }
 0x5b4   :  { %1467 = vst.msk [vmem:[#allocation2 + $0x2] sm:$0xff] %vm415_vm2, %v1465_v47  ;;  %v2298_v47 = vld [vmem:[#allocation25] ss:$0 sm:$0xff] }
 0x5b5   :  { %1468 = vst.msk [vmem:[#allocation2 + $0x12] sm:$0xff] %vm415_vm2, %v1466_v48 }
 0x5bb   :  { %v1473_v49 = vld [vmem:[#allocation2 + $0x2] sm:$0xff] }
 0x5bc   :  { %v1469_v50 = vld [vmem:[#allocation2 + $0x1] sm:$0xff]  ;;  %2193 = vmatmul.msk.f32.vlgmr.msrb.gmra.mxu3 %vm415_vm2, %v1473_v49  ;;  %v1474_v52 = vld [vmem:[#allocation2 + $0x12] sm:$0xff] }
 0x5bd   :  { %v1536_v51 = vld [vmem:[#allocation2 + $0x3] sm:$0xff]  ;;  %2195 = vmatmul.msk.f32.vlgmr.msrb.gmra.mxu0 %vm415_vm2, %v1469_v50  ;;  %v1470_v53 = vld [vmem:[#allocation2 + $0x11] sm:$0xff] }
 0x5be   :  { %2197 = vmatmul.msk.f32.vlgmr.msra.gmra.mxu1 %vm415_vm2, %v1536_v51  ;;  %v1537_v55 = vld [vmem:[#allocation2 + $0x13] sm:$0xff] }
 0x5c4   :  { %2194 = vmatmul.msk.f32.gmra.mxu3 %vm415_vm2, %v1474_v52 }
 0x5c5   :  { %2196 = vmatmul.msk.f32.gmra.mxu0 %vm415_vm2, %v1470_v53 }
 0x5c6   :  { %2198 = vmatmul.msk.f32.gmra.mxu1 %vm415_vm2, %v1537_v55  ;;  %v2354_v55 = vld [vmem:[#allocation3 + $0x8] sm:$0xff] }
 0x63a   :  { %v1530_v56 = vpop.f32.mrf.mxu0 }
 0x63b   :  { %v1564_v57 = vpop.f32.mrf.mxu1 }
 0x63f   :  { %v1501_v58 = vpop.f32.mrf.mxu3 }
 0x640   :  { %v1531_v60 = vadd.f32 %v1530_v56, %v1501_v58  ;;  %v1790_v58 = vld [vmem:[#allocation28 + $0x38] sm:$0xff] }
 0x641   :  { %1808 = vmatpush.msrb.mxu1 %v1790_v58 }
 0x642   :  { %v1570_v61 = vadd.f32 %v1564_v57, %v1531_v60  ;;  %v1533_v63 = vpop.f32.mrf.mxu0  ;;  %v2300_v57 = vld [vmem:[%s2979_s29] ss:$0 sm:$0xff]  ;;  %v1749_v60 = vld [vmem:[#allocation26 + $0x38] sm:$0xff] }
 0x643   :  { %v1567_v2 = vpop.f32.mrf.mxu1  ;;  %1773 = vmatpush.msra.mxu0 %v1749_v60 }
 0x644   :  { %v1576_v3 = vadd.f32 %v2296_v62, %v1570_v61  ;;  %v1789_v61 = vld [vmem:[#allocation28 + $0x30] sm:$0xff] }
 0x645   :  { %1809 = vmatpush.msrb.mxu1 %v1789_v61 }
 0x646   :  { %v1578_v31 = vsel %vm370_vm0, %v1576_v3, 0.0 }
 0x647   :  { %v1504_v0 = vpop.f32.mrf.mxu3 }
 0x648   :  { %v1534_v1 = vadd.f32 %v1533_v63, %v1504_v0  ;;  %v1788_v0 = vld [vmem:[#allocation28 + $0x28] sm:$0xff] }
 0x649   :  { %1810 = vmatpush.msrb.mxu1 %v1788_v0 }
 0x64a   :  { %v1571_v27 = vadd.f32 %v1567_v2, %v1534_v1  ;;  %v1747_v1 = vld [vmem:[#allocation26 + $0x28] sm:$0xff] }
 0x64c   :  { %v1577_v4 = vadd.f32 %v2296_v62, %v1571_v27  ;;  %v1748_v62 = vld [vmem:[#allocation26 + $0x30] sm:$0xff]  ;;  %v1746_v27 = vld [vmem:[#allocation26 + $0x20] sm:$0xff] }
 0x64d   :  { %1774 = vmatpush.msra.mxu0 %v1748_v62 }
 0x64e   :  { %v1579_v5 = vsel %vm370_vm0, %v1577_v4, 0.0 }
 0x64f   :  { %v1580_v6 = vadd.f32 %v1579_v5, %v1578_v31  ;;  %1775 = vmatpush.msra.mxu0 %v1747_v1 }
 0x651   :  { %v1581_v7 = vrot.slane %v1580_v6, 4  ;;  %1776 = vmatpush.msra.mxu0 %v1746_v27 }
 0x653   :  { %v1582_v8 = vadd.f32 %v1581_v7, %v1580_v6 }
 0x655   :  { %v1583_v37 = vrot.slane %v1582_v8, 2 }
 0x657   :  { %v1584_v29 = vadd.f32 %v1583_v37, %v1582_v8 }
 0x659   :  { %v1585_v9 = vrot.slane %v1584_v29, 1 }
 0x65b   :  { %v1586_v10 = vadd.f32 %v1585_v9, %v1584_v29 }
 0x65d   :  { %v1587_v11 = vmul.f32 %v1586_v10, %v3095_v26 }
 0x65f   :  { %v1588_v12 = vsub.f32 %v1576_v3, %v1587_v11  ;;  %v1589_v13 = vsub.f32 %v1577_v4, %v1587_v11  ;;  %v1787_v3 = vld [vmem:[#allocation28 + $0x20] sm:$0xff] }
 0x660   :  { %1811 = vmatpush.msrb.mxu1 %v1787_v3 }
 0x661   :  { %v1590_v14 = vmul.f32 %v1588_v12, %v1588_v12  ;;  %v1591_v15 = vmul.f32 %v1589_v13, %v1589_v13 }
 0x663   :  { %v1592_v16 = vsel %vm370_vm0, %v1590_v14, 0.0  ;;  %v1593_v17 = vsel %vm370_vm0, %v1591_v15, 0.0 }
 0x664   :  { %v1594_v18 = vadd.f32 %v1593_v17, %v1592_v16 }
 0x666   :  { %v1595_v19 = vrot.slane %v1594_v18, 4 }
 0x668   :  { %v1596_v20 = vadd.f32 %v1595_v19, %v1594_v18 }
 0x66a   :  { %v1597_v23 = vrot.slane %v1596_v20, 2 }
 0x66c   :  { %v1598_v32 = vadd.f32 %v1597_v23, %v1596_v20 }
 0x66e   :  { %v1599_v35 = vrot.slane %v1598_v32, 1 }
 0x670   :  { %v1600_v36 = vadd.f32 %v1599_v35, %v1598_v32 }
 0x672   :  { %v1601_v38 = vmul.f32 %v1600_v36, %v3095_v26  ;;  %v2353_v26 = vld [vmem:[#allocation3] sm:$0xff] }
 0x674   :  { %v1602_v39 = vadd.f32 1e-05, %v1601_v38 }
 0x676   :  { %2319 = vrsqrt.f32 %v1602_v39  ;;  %vm1609_vm5 = vweird.f32 %v1602_v39 }
 0x67c   :  { %v2320_v40 = vpop.eup %2319 }
 0x67d   :  { %v1604_v54 = vmul.f32 %v2320_v40, %v1602_v39  ;;  %vm1610_vm2 = vweird.f32 %v2320_v40 }
 0x67e   :  { %vm1611_vm6 = vmor %vm1609_vm5, %vm1610_vm2 }
 0x67f   :  { %v1605_v41 = vmul.f32 %v2320_v40, %v1604_v54 }
 0x681   :  { %v1606_v42 = vmul.f32 0.5, %v1605_v41 }
 0x683   :  { %v1607_v43 = vsub.f32 1.5, %v1606_v42 }
 0x685   :  { %v1608_v44 = vmul.f32 %v2320_v40, %v1607_v43 }
 0x687   :  { %v1612_v45 = vsel %vm1611_vm6, %v2320_v40, %v1608_v44 }
 0x688   :  { %v1613_v46 = vmul.f32 %v1612_v45, %v1588_v12  ;;  %v1614_v48 = vmul.f32 %v1612_v45, %v1589_v13  ;;  %v2299_v12 = vld [vmem:[%s2969_s17] ss:$0 sm:$0xff] }
 0x68a   :  { %v1619_v49 = vmul.f32 %v2297_v59, %v1613_v46  ;;  %v1620_v52 = vmul.f32 %v2297_v59, %v1614_v48  ;;  %v1910_v48 = vld [vmem:[#allocation28 + $0x58] sm:$0xff] }
 0x68b   :  { %1928 = vmatpush.msrb.mxu3 %v1910_v48 }
 0x68c   :  { %v1625_v50 = vadd.f32 %v2298_v47, %v1619_v49  ;;  %v1626_v53 = vadd.f32 %v2298_v47, %v1620_v52  ;;  %v2302_v47 = vld [vmem:[%s2979_s29 + $0x1] ss:$0 sm:$0xff]  ;;  %v1869_v49 = vld [vmem:[#allocation26 + $0x58] sm:$0xff]  ;;  %v1908_v52 = vld [vmem:[#allocation28 + $0x48] sm:$0xff] }
 0x68d   :  { %1893 = vmatpush.msra.mxu2 %v1869_v49 }
 0x68e   :  { %v3230_v51 = vadd.f32 %v2353_v26, %v1625_v50  ;;  %v3236_v56 = vadd.f32 %v2354_v55, %v1626_v53  ;;  %v1909_v50 = vld [vmem:[#allocation28 + $0x50] sm:$0xff]  ;;  %v1867_v53 = vld [vmem:[#allocation26 + $0x48] sm:$0xff] }
 0x68f   :  { %v1868_v26 = vld [vmem:[#allocation26 + $0x50] sm:$0xff]  ;;  %1929 = vmatpush.msrb.mxu3 %v1909_v50 }
 0x690   :  { %2199 = vmatmul.msk.f32.vlgmr.msrb.gmra.mxu2 %vm370_vm0, %v3230_v51  ;;  %2201 = vmatmul.msk.f32.vlgmr.msra.gmra.mxu3 %vm370_vm0, %v3230_v51 }
 0x691   :  { %1894 = vmatpush.msra.mxu2 %v1868_v26  ;;  %1930 = vmatpush.msrb.mxu3 %v1908_v52 }
 0x693   :  { %1895 = vmatpush.msra.mxu2 %v1867_v53 }
 0x698   :  { %2200 = vmatmul.msk.f32.gmra.mxu2 %vm370_vm0, %v3236_v56  ;;  %2202 = vmatmul.msk.f32.gmra.mxu3 %vm370_vm0, %v3236_v56 }
 0x713   :  { %v1693_v63 = vpop.f32.mrf.mxu3  ;;  %v1660_v11 = vpop.f32.mrf.mxu2 }
 0x714   :  { %v1694_v2 = vadd.f32 %v2300_v57, %v1693_v63  ;;  %v1661_v17 = vadd.f32 %v2299_v12, %v1660_v11 }
 0x716   :  { %v2203_v4 = vmul.f32 -1.442695, %v1694_v2  ;;  %v1666_v24 = vmax.f32 %v1661_v17, 0.0 }
 0x718   :  { %2321 = vpow2.f32 %v2203_v4 }
 0x71b   :  { %v1696_v31 = vpop.f32.mrf.mxu3  ;;  %v1663_v30 = vpop.f32.mrf.mxu2 }
 0x71c   :  { %v1697_v5 = vadd.f32 %v2300_v57, %v1696_v31  ;;  %v1664_v38 = vadd.f32 %v2299_v12, %v1663_v30  ;;  %v1866_v57 = vld [vmem:[#allocation26 + $0x40] sm:$0xff] }
 0x71d   :  { %1896 = vmatpush.msra.mxu2 %v1866_v57  ;;  %v2301_v31 = vld [vmem:[%s2969_s17 + $0x1] ss:$0 sm:$0xff] }
 0x71e   :  { %v2322_v6 = vpop.eup %2321  ;;  %v2204_v7 = vmul.f32 -1.442695, %v1697_v5  ;;  %v1667_v43 = vmax.f32 %v1664_v38, 0.0 }
 0x71f   :  { %v1705_v8 = vadd.f32 1.0, %v2322_v6 }
 0x720   :  { %2323 = vpow2.f32 %v2204_v7 }
 0x721   :  { %2325 = vrcp.f32 %v1705_v8  ;;  %v1718_v14 = vand.u32 2147483648, %v1705_v8  ;;  %v1716_v16 = vand.u32 2147483647, %v1705_v8  ;;  %vm1712_vm8 = vweird.f32 %v1705_v8 }
 0x723   :  { %v1719_v20 = vor.u32 1.1754944e-38, %v1718_v14  ;;  %vm1717_vm10 = vcmp.eq.f32.partialorder %v1716_v16, 8.507059e+37 }
 0x726   :  { %v2324_v37 = vpop.eup %2323 }
 0x727   :  { %v2326_v29 = vpop.eup %2325  ;;  %v1706_v9 = vadd.f32 1.0, %v2324_v37 }
 0x728   :  { %v1708_v10 = vmul.f32 %v2326_v29, %v1705_v8  ;;  %vm1713_vm7 = vweird.f32 %v2326_v29 }
 0x729   :  { %2327 = vrcp.f32 %v1706_v9  ;;  %vm1714_vm9 = vmor %vm1712_vm8, %vm1713_vm7  ;;  %v1731_v32 = vand.u32 2147483647, %v1706_v9  ;;  %v1733_v33 = vand.u32 2147483648, %v1706_v9  ;;  %vm1727_vm12 = vweird.f32 %v1706_v9 }
 0x72a   :  { %v1709_v13 = vsub.f32 1.0, %v1708_v10 }
 0x72b   :  { %v1734_v54 = vor.u32 1.1754944e-38, %v1733_v33  ;;  %vm1732_vm14 = vcmp.eq.f32.partialorder %v1731_v32, 8.507059e+37 }
 0x72c   :  { %v1710_v15 = vmul.f32 %v2326_v29, %v1709_v13 }
 0x72e   :  { %v1711_v18 = vadd.f32 %v2326_v29, %v1710_v15 }
 0x72f   :  { %v2328_v19 = vpop.eup %2327 }
 0x730   :  { %v1723_v21 = vmul.f32 %v2328_v19, %v1706_v9  ;;  %v1715_v22 = vsel %vm1714_vm9, %v2326_v29, %v1711_v18  ;;  %vm1728_vm11 = vweird.f32 %v2328_v19 }
 0x731   :  { %v1720_v23 = vsel %vm1717_vm10, %v1719_v20, %v1715_v22  ;;  %vm1729_vm13 = vmor %vm1727_vm12, %vm1728_vm11 }
 0x732   :  { %v1724_v25 = vsub.f32 1.0, %v1723_v21  ;;  %v1739_v28 = vsub.f32 1.0, %v1720_v23  ;;  %v1737_v34 = vmul.f32 %v1720_v23, %v1666_v24 }
 0x734   :  { %v1741_v35 = vmul.f32 %v1739_v28, %v3230_v51  ;;  %v1725_v36 = vmul.f32 %v2328_v19, %v1724_v25 }
 0x736   :  { %v3245_v39 = vadd.f32 %v1741_v35, %v1737_v34  ;;  %v1726_v40 = vadd.f32 %v2328_v19, %v1725_v36 }
 0x738   :  { %2206 = vmatmul.msk.f32.vlgmr.msra.gmra.mxu0 %vm370_vm0, %v3245_v39  ;;  %2209 = vmatmul.msk.f32.vlgmr.msrb.gmra.mxu1 %vm370_vm0, %v3245_v39  ;;  %v1730_v41 = vsel %vm1729_vm13, %v2328_v19, %v1726_v40  ;;  %v2030_v40 = vld [vmem:[#allocation28 + $0x78] sm:$0xff] }
 0x739   :  { %v1735_v42 = vsel %vm1732_vm14, %v1734_v54, %v1730_v41  ;;  %v1989_v54 = vld [vmem:[#allocation26 + $0x78] sm:$0xff]  ;;  %2048 = vmatpush.msra.mxu1 %v2030_v40  ;;  %v2029_v41 = vld [vmem:[#allocation28 + $0x70] sm:$0xff] }
 0x73a   :  { %v1740_v44 = vsub.f32 1.0, %v1735_v42  ;;  %v1738_v59 = vmul.f32 %v1735_v42, %v1667_v43  ;;  %2013 = vmatpush.msrb.mxu0 %v1989_v54  ;;  %v1988_v42 = vld [vmem:[#allocation26 + $0x70] sm:$0xff] }
 0x73b   :  { %2049 = vmatpush.msra.mxu1 %v2029_v41 }
 0x73c   :  { %v1742_v45 = vmul.f32 %v1740_v44, %v3236_v56  ;;  %v1907_v56 = vld [vmem:[#allocation28 + $0x40] sm:$0xff]  ;;  %v2028_v44 = vld [vmem:[#allocation28 + $0x68] sm:$0xff]  ;;  %2014 = vmatpush.msrb.mxu0 %v1988_v42 }
 0x73d   :  { %1931 = vmatpush.msrb.mxu3 %v1907_v56  ;;  %2050 = vmatpush.msra.mxu1 %v2028_v44  ;;  %v2305_v42 = vld [vmem:[%s2969_s17 + $0x3] ss:$0 sm:$0xff] }
 0x73e   :  { %v3252_v46 = vadd.f32 %v1742_v45, %v1738_v59  ;;  %v1987_v59 = vld [vmem:[#allocation26 + $0x68] sm:$0xff] }
 0x73f   :  { %2015 = vmatpush.msrb.mxu0 %v1987_v59 }
 0x740   :  { %2207 = vmatmul.msk.f32.gmra.mxu0 %vm370_vm0, %v3252_v46  ;;  %2210 = vmatmul.msk.f32.gmra.mxu1 %vm370_vm0, %v3252_v46 }
 0x7b5   :  { %v1813_v51 = vpop.f32.mrf.mxu1  ;;  %v1778_v4 = vpop.f32.mrf.mxu0 }
 0x7b6   :  { %v1814_v55 = vadd.f32 %v2302_v47, %v1813_v51  ;;  %v1779_v37 = vadd.f32 %v2301_v31, %v1778_v4 }
 0x7b8   :  { %v2211_v58 = vmul.f32 -1.442695, %v1814_v55  ;;  %v1784_v14 = vmax.f32 %v1779_v37, 0.0 }
 0x7ba   :  { %2329 = vpow2.f32 %v2211_v58 }
 0x7bd   :  { %v1816_v60 = vpop.f32.mrf.mxu1  ;;  %v1781_v17 = vpop.f32.mrf.mxu0 }
 0x7be   :  { %v1817_v61 = vadd.f32 %v2302_v47, %v1816_v60  ;;  %v1782_v23 = vadd.f32 %v2301_v31, %v1781_v17  ;;  %v1986_v47 = vld [vmem:[#allocation26 + $0x60] sm:$0xff] }
 0x7bf   :  { %2016 = vmatpush.msrb.mxu0 %v1986_v47  ;;  %v2303_v60 = vld [vmem:[%s2969_s17 + $0x2] ss:$0 sm:$0xff] }
 0x7c0   :  { %v2330_v62 = vpop.eup %2329  ;;  %v2212_v63 = vmul.f32 -1.442695, %v1817_v61  ;;  %v1785_v33 = vmax.f32 %v1782_v23, 0.0 }
 0x7c1   :  { %v1825_v0 = vadd.f32 1.0, %v2330_v62 }
 0x7c2   :  { %2331 = vpow2.f32 %v2212_v63 }
 0x7c3   :  { %2333 = vrcp.f32 %v1825_v0  ;;  %v1838_v6 = vand.u32 2147483648, %v1825_v0  ;;  %v1836_v8 = vand.u32 2147483647, %v1825_v0  ;;  %vm1832_vm1 = vweird.f32 %v1825_v0 }
 0x7c5   :  { %v1839_v10 = vor.u32 1.1754944e-38, %v1838_v6  ;;  %vm1837_vm4 = vcmp.eq.f32.partialorder %v1836_v8, 8.507059e+37 }
 0x7c8   :  { %v2332_v1 = vpop.eup %2331 }
 0x7c9   :  { %v2334_v2 = vpop.eup %2333  ;;  %v1826_v3 = vadd.f32 1.0, %v2332_v1 }
 0x7ca   :  { %v1828_v27 = vmul.f32 %v2334_v2, %v1825_v0  ;;  %vm1833_vm15 = vweird.f32 %v2334_v2 }
 0x7cb   :  { %2335 = vrcp.f32 %v1826_v3  ;;  %vm1834_vm3 = vmor %vm1832_vm1, %vm1833_vm15  ;;  %v1851_v18 = vand.u32 2147483647, %v1826_v3  ;;  %v1853_v19 = vand.u32 2147483648, %v1826_v3  ;;  %vm1847_vm5 = vweird.f32 %v1826_v3 }
 0x7cc   :  { %v1829_v5 = vsub.f32 1.0, %v1828_v27 }
 0x7cd   :  { %v1854_v28 = vor.u32 1.1754944e-38, %v1853_v19  ;;  %vm1852_vm7 = vcmp.eq.f32.partialorder %v1851_v18, 8.507059e+37 }
 0x7ce   :  { %v1830_v7 = vmul.f32 %v2334_v2, %v1829_v5 }
 0x7d0   :  { %v1831_v29 = vadd.f32 %v2334_v2, %v1830_v7 }
 0x7d1   :  { %v2336_v9 = vpop.eup %2335 }
 0x7d2   :  { %v1843_v11 = vmul.f32 %v2336_v9, %v1826_v3  ;;  %v1835_v12 = vsel %vm1834_vm3, %v2334_v2, %v1831_v29  ;;  %vm1848_vm2 = vweird.f32 %v2336_v9 }
 0x7d3   :  { %v1840_v13 = vsel %vm1837_vm4, %v1839_v10, %v1835_v12  ;;  %vm1849_vm6 = vmor %vm1847_vm5, %vm1848_vm2 }
 0x7d4   :  { %v1844_v15 = vsub.f32 1.0, %v1843_v11  ;;  %v1859_v16 = vsub.f32 1.0, %v1840_v13  ;;  %v1857_v20 = vmul.f32 %v1840_v13, %v1784_v14 }
 0x7d6   :  { %v1861_v21 = vmul.f32 %v1859_v16, %v3245_v39  ;;  %v1845_v22 = vmul.f32 %v2336_v9, %v1844_v15  ;;  %v2304_v39 = vld [vmem:[%s2979_s29 + $0x2] ss:$0 sm:$0xff] }
 0x7d8   :  { %v3261_v24 = vadd.f32 %v1861_v21, %v1857_v20  ;;  %v1846_v25 = vadd.f32 %v2336_v9, %v1845_v22 }
 0x7da   :  { %2214 = vmatmul.msk.f32.vlgmr.msra.gmra.mxu2 %vm370_vm0, %v3261_v24  ;;  %2217 = vmatmul.msk.f32.vlgmr.msrb.gmra.mxu3 %vm370_vm0, %v3261_v24  ;;  %v1850_v30 = vsel %vm1849_vm6, %v2336_v9, %v1846_v25 }
 0x7db   :  { %v1855_v32 = vsel %vm1852_vm7, %v1854_v28, %v1850_v30 }
 0x7dc   :  { %v1860_v34 = vsub.f32 1.0, %v1855_v32  ;;  %v1858_v35 = vmul.f32 %v1855_v32, %v1785_v33 }
 0x7de   :  { %v1862_v36 = vmul.f32 %v1860_v34, %v3252_v46  ;;  %v2027_v46 = vld [vmem:[#allocation28 + $0x60] sm:$0xff] }
 0x7df   :  { %2051 = vmatpush.msra.mxu1 %v2027_v46 }
 0x7e0   :  { %v3268_v38 = vadd.f32 %v1862_v36, %v1858_v35 }
 0x7e2   :  { %2215 = vmatmul.msk.f32.gmra.mxu2 %vm370_vm0, %v3268_v38  ;;  %2218 = vmatmul.msk.f32.gmra.mxu3 %vm370_vm0, %v3268_v38 }
 0x85d   :  { %v1933_v43 = vpop.f32.mrf.mxu3  ;;  %v1898_v58 = vpop.f32.mrf.mxu2 }
 0x85e   :  { %v1934_v45 = vadd.f32 %v2304_v39, %v1933_v43  ;;  %v1899_v1 = vadd.f32 %v2303_v60, %v1898_v58 }
 0x860   :  { %v2219_v48 = vmul.f32 -1.442695, %v1934_v45  ;;  %v1904_v6 = vmax.f32 %v1899_v1, 0.0 }
 0x862   :  { %2337 = vpow2.f32 %v2219_v48 }
 0x865   :  { %v1936_v49 = vpop.f32.mrf.mxu3  ;;  %v1901_v37 = vpop.f32.mrf.mxu2 }
 0x866   :  { %v1937_v50 = vadd.f32 %v2304_v39, %v1936_v49  ;;  %v1902_v13 = vadd.f32 %v2303_v60, %v1901_v37 }
 0x868   :  { %v2338_v26 = vpop.eup %2337  ;;  %v2220_v51 = vmul.f32 -1.442695, %v1937_v50  ;;  %v1905_v19 = vmax.f32 %v1902_v13, 0.0 }
 0x869   :  { %v1945_v52 = vadd.f32 1.0, %v2338_v26 }
 0x86a   :  { %2339 = vpow2.f32 %v2220_v51 }
 0x86b   :  { %2341 = vrcp.f32 %v1945_v52  ;;  %v1958_v62 = vand.u32 2147483648, %v1945_v52  ;;  %v1956_v0 = vand.u32 2147483647, %v1945_v52  ;;  %vm1952_vm9 = vweird.f32 %v1945_v52 }
 0x86d   :  { %v1959_v27 = vor.u32 1.1754944e-38, %v1958_v62  ;;  %vm1957_vm11 = vcmp.eq.f32.partialorder %v1956_v0, 8.507059e+37 }
 0x870   :  { %v2340_v53 = vpop.eup %2339 }
 0x871   :  { %v2342_v55 = vpop.eup %2341  ;;  %v1946_v56 = vadd.f32 1.0, %v2340_v53 }
 0x872   :  { %v1948_v57 = vmul.f32 %v2342_v55, %v1945_v52  ;;  %vm1953_vm8 = vweird.f32 %v2342_v55 }
 0x873   :  { %2343 = vrcp.f32 %v1946_v56  ;;  %vm1954_vm10 = vmor %vm1952_vm9, %vm1953_vm8  ;;  %v1971_v29 = vand.u32 2147483647, %v1946_v56  ;;  %v1973_v9 = vand.u32 2147483648, %v1946_v56  ;;  %vm1967_vm13 = vweird.f32 %v1946_v56 }
 0x874   :  { %v1949_v61 = vsub.f32 1.0, %v1948_v57 }
 0x875   :  { %v1974_v16 = vor.u32 1.1754944e-38, %v1973_v9  ;;  %vm1972_vm15 = vcmp.eq.f32.partialorder %v1971_v29, 8.507059e+37 }
 0x876   :  { %v1950_v63 = vmul.f32 %v2342_v55, %v1949_v61 }
 0x878   :  { %v1951_v2 = vadd.f32 %v2342_v55, %v1950_v63 }
 0x879   :  { %v2344_v3 = vpop.eup %2343 }
 0x87a   :  { %v1963_v4 = vmul.f32 %v2344_v3, %v1946_v56  ;;  %v1955_v31 = vsel %vm1954_vm10, %v2342_v55, %v1951_v2  ;;  %vm1968_vm12 = vweird.f32 %v2344_v3 }
 0x87b   :  { %v1960_v5 = vsel %vm1957_vm11, %v1959_v27, %v1955_v31  ;;  %vm1969_vm14 = vmor %vm1967_vm13, %vm1968_vm12 }
 0x87c   :  { %v1964_v7 = vsub.f32 1.0, %v1963_v4  ;;  %v1979_v8 = vsub.f32 1.0, %v1960_v5  ;;  %v1977_v10 = vmul.f32 %v1960_v5, %v1904_v6 }
 0x87e   :  { %v1981_v11 = vmul.f32 %v1979_v8, %v3261_v24  ;;  %v1965_v12 = vmul.f32 %v2344_v3, %v1964_v7  ;;  %v2306_v24 = vld [vmem:[%s2979_s29 + $0x3] ss:$0 sm:$0xff] }
 0x880   :  { %v1983_v14 = vadd.f32 %v1981_v11, %v1977_v10  ;;  %v1966_v15 = vadd.f32 %v2344_v3, %v1965_v12 }
 0x882   :  { %2222 = vmatmul.msk.f32.vlgmr.msrb.gmra.mxu0 %vm370_vm0, %v1983_v14  ;;  %2225 = vmatmul.msk.f32.vlgmr.msra.gmra.mxu1 %vm370_vm0, %v1983_v14  ;;  %v1970_v17 = vsel %vm1969_vm14, %v2344_v3, %v1966_v15 }
 0x883   :  { %v1975_v18 = vsel %vm1972_vm15, %v1974_v16, %v1970_v17 }
 0x884   :  { %v1980_v20 = vsub.f32 1.0, %v1975_v18  ;;  %v1978_v21 = vmul.f32 %v1975_v18, %v1905_v19 }
 0x886   :  { %v1982_v22 = vmul.f32 %v1980_v20, %v3268_v38 }
 0x888   :  { %v1984_v23 = vadd.f32 %v1982_v22, %v1978_v21 }
 0x88a   :  { %2223 = vmatmul.msk.f32.gmra.mxu0 %vm370_vm0, %v1984_v23  ;;  %2226 = vmatmul.msk.f32.gmra.mxu1 %vm370_vm0, %v1984_v23 }
 0x8ff   :  { %v2053_v25 = vpop.f32.mrf.mxu1  ;;  %v2018_v41 = vpop.f32.mrf.mxu0 }
 0x900   :  { %v2054_v28 = vadd.f32 %v2306_v24, %v2053_v25  ;;  %v2019_v46 = vadd.f32 %v2305_v42, %v2018_v41 }
 0x902   :  { %v2227_v30 = vmul.f32 -1.442695, %v2054_v28  ;;  %v2024_v52 = vmax.f32 %v2019_v46, 0.0 }
 0x904   :  { %2345 = vpow2.f32 %v2227_v30 }
 0x907   :  { %v2056_v32 = vpop.f32.mrf.mxu1  ;;  %v2021_v56 = vpop.f32.mrf.mxu0 }
 0x908   :  { %v2057_v33 = vadd.f32 %v2306_v24, %v2056_v32  ;;  %v2022_v0 = vadd.f32 %v2305_v42, %v2021_v56 }
 0x90a   :  { %v2346_v34 = vpop.eup %2345  ;;  %v2228_v35 = vmul.f32 -1.442695, %v2057_v33  ;;  %v2025_v4 = vmax.f32 %v2022_v0, 0.0 }
 0x90b   :  { %v2065_v36 = vadd.f32 1.0, %v2346_v34 }
 0x90c   :  { %2347 = vpow2.f32 %v2228_v35 }
 0x90d   :  { %2349 = vrcp.f32 %v2065_v36  ;;  %v2078_v44 = vand.u32 2147483648, %v2065_v36  ;;  %v2076_v45 = vand.u32 2147483647, %v2065_v36  ;;  %vm2072_vm3 = vweird.f32 %v2065_v36 }
 0x90f   :  { %v2079_v49 = vor.u32 1.1754944e-38, %v2078_v44  ;;  %vm2077_vm2 = vcmp.eq.f32.partialorder %v2076_v45, 8.507059e+37 }
 0x912   :  { %v2348_v39 = vpop.eup %2347 }
 0x913   :  { %v2350_v38 = vpop.eup %2349  ;;  %v2066_v40 = vadd.f32 1.0, %v2348_v39 }
 0x914   :  { %v2068_v54 = vmul.f32 %v2350_v38, %v2065_v36  ;;  %vm2073_vm1 = vweird.f32 %v2350_v38 }
 0x915   :  { %2351 = vrcp.f32 %v2066_v40  ;;  %vm2074_vm4 = vmor %vm2072_vm3, %vm2073_vm1  ;;  %v2091_v57 = vand.u32 2147483647, %v2066_v40  ;;  %v2093_v58 = vand.u32 2147483648, %v2066_v40  ;;  %vm2087_vm6 = vweird.f32 %v2066_v40 }
 0x916   :  { %v2069_v43 = vsub.f32 1.0, %v2068_v54 }
 0x917   :  { %v2094_v2 = vor.u32 1.1754944e-38, %v2093_v58  ;;  %vm2092_vm8 = vcmp.eq.f32.partialorder %v2091_v57, 8.507059e+37 }
 0x918   :  { %v2070_v59 = vmul.f32 %v2350_v38, %v2069_v43 }
 0x91a   :  { %v2071_v47 = vadd.f32 %v2350_v38, %v2070_v59 }
 0x91b   :  { %v2352_v48 = vpop.eup %2351 }
 0x91c   :  { %v2075_v50 = vsel %vm2074_vm4, %v2350_v38, %v2071_v47  ;;  %v2083_v26 = vmul.f32 %v2352_v48, %v2066_v40  ;;  %vm2088_vm5 = vweird.f32 %v2352_v48 }
 0x91d   :  { %v2080_v51 = vsel %vm2077_vm2, %v2079_v49, %v2075_v50  ;;  %vm2089_vm7 = vmor %vm2087_vm6, %vm2088_vm5 }
 0x91e   :  { %v2099_v53 = vsub.f32 1.0, %v2080_v51  ;;  %v2084_v55 = vsub.f32 1.0, %v2083_v26  ;;  %v2097_v60 = vmul.f32 %v2080_v51, %v2024_v52 }
 0x920   :  { %v2101_v61 = vmul.f32 %v2099_v53, %v1983_v14  ;;  %v2085_v62 = vmul.f32 %v2352_v48, %v2084_v55 }
 0x922   :  { %v2103_v63 = vadd.f32 %v2101_v61, %v2097_v60  ;;  %v2086_v1 = vadd.f32 %v2352_v48, %v2085_v62 }
 0x924   :  { %2105 = vst.msk [vmem:[%s2984_s8] sm:$0xff] %vm370_vm0, %v2103_v63  ;;  %v2090_v3 = vsel %vm2089_vm7, %v2352_v48, %v2086_v1 }
 0x925   :  { %v2095_v27 = vsel %vm2092_vm8, %v2094_v2, %v2090_v3 }
 0x926   :  { %v2100_v31 = vsub.f32 1.0, %v2095_v27  ;;  %v2098_v5 = vmul.f32 %v2095_v27, %v2025_v4 }
 0x928   :  { %v2102_v6 = vmul.f32 %v2100_v31, %v1984_v23 }
 0x92a   :  { %v2104_v7 = vadd.f32 %v2102_v6, %v2098_v5 }
 0x92c   :  { %2106 = vst.msk [vmem:[%s2984_s8 + $0x8] sm:$0xff] %vm370_vm0, %v2104_v7 }
 0x92d   :  { %2111 = vsyncpa [#allocation4], 1 }
 0x92e   :  { %2112 = vsyncpa [#allocation6], 1 }
 0x92f   :  { %2113 = vsyncpa [#allocation9], 1 }
 0x930   :  { %2114 = vsyncpa [#allocation12], 1 }
 0x931   :  { %2115 = vsyncpa [#allocation15], 1 }
 0x932   :  { %2116 = vsyncpa [#allocation18], 1 }
 0x933   :  { %2117 = vsyncpa [#allocation21], 1 }
 0x934   :  { %2118 = vsyncpa [#allocation24], 1 }
 0x935   :  { %2119 = vsyncpa [#allocation27], 1 }

</bundles_post_ra>
